<compile_context>
chip_gen: v7x
topology: tpu7x:2x2x1
jax: 0.10.0
libtpu: 0.0.40
codegen_flags: <defaults>
</compile_context>

<pallas_src>
import math
from functools import partial

import jax
import jax.numpy as jnp
from jax.experimental import pallas as pl
from jax.experimental.pallas import tpu as pltpu


# ----------------------------------------------------------------------------
# helpers
# ----------------------------------------------------------------------------
def _softmax_lastdim(s):
    m = jnp.max(s, axis=-1, keepdims=True)
    e = jnp.exp(s - m)
    denom = jnp.sum(e, axis=-1, keepdims=True)
    return e * pl.reciprocal(denom, approx=True)


def _swap01(x):
    """(A, B, C) -> (B, A, C) keeping the lane (last) dim in place."""
    if hasattr(pltpu, "einshape"):
        return pltpu.einshape("abc->bac", x)
    # Fallback (older jax): bulk static slicing over the (small) second axis.
    a, b, c = x.shape
    return jnp.concatenate([x[:, j] for j in range(b)], axis=0).reshape(b, a, c)


# ----------------------------------------------------------------------------
# Pallas kernel: full residual stack, batched over Bb samples per grid step
# ----------------------------------------------------------------------------
def _diff_csdi_kernel(
    # inputs -----------------------------------------------------------------
    xy_ref, cond_ref, diffp_ref,
    w_in_ref, b_in_ref,
    wqkv_t_ref, wo_t_ref, wqkv_f_ref, wo_f_ref,
    w_mc_ref, b_mc_ref, w_out_ref, b_out_ref,
    w_o1_ref, b_o1_ref, w_o2_ref, b_o2_ref,
    # output -----------------------------------------------------------------
    sse_ref,
    # scratch ----------------------------------------------------------------
    h_ref, skip_ref, ycat_ref,
    *, Bb, K, L, n_layers,
):
    """grid = (B//Bb, n_layers).  Per-batch-block state (h, skip accumulator,
    concat buffer) lives in VMEM scratch across the layer axis; all layer
    weights are resident (constant block index) and selected with a dynamic
    leading-axis index."""
    C = w_in_ref.shape[1]
    T = K * L
    M = Bb * T
    layer = pl.program_id(1)
    bf16 = jnp.bfloat16

    # ---- layer 0: input Conv1d(1, C, 1) + ReLU, init running state ---------
    @pl.when(layer == 0)
    def _init():
        xy = xy_ref[...]                                          # (Bb, T, 2)
        noisy = xy[:, :, 0:1].reshape(M, 1)
        h0 = noisy * w_in_ref[...] + b_in_ref[...]                # (M, C)
        h_ref[...] = jnp.maximum(h0, 0.0)
        skip_ref[...] = jnp.zeros_like(skip_ref)
        # cond lanes of the persistent concat buffer are layer-invariant:
        # fill them once per batch block.
        ycat_ref[:, C:] = cond_ref[...].reshape(M, ycat_ref.shape[1] - C)

    # ---- residual layer -----------------------------------------------------
    h = h_ref[...]                                                # (M, C) f32
    dp = diffp_ref[layer]                                         # (Bb, 1, C)
    y = (h.reshape(Bb, T, C) + dp).reshape(M, C)                  # diff-step emb

    wqkv_t = wqkv_t_ref[layer]
    wo_t = wo_t_ref[layer]
    wqkv_f = wqkv_f_ref[layer]
    wo_f = wo_f_ref[layer]

    def group_attention(y2d, wqkv, wo, g, n):
        """Single-head attention restricted to `g` groups of `n` tokens."""
        qkv = jnp.dot(y2d.astype(bf16), wqkv,
                      preferred_element_type=jnp.float32)         # (g*n, 3C)
        # reshape first, cast after (avoids packed-sublane relayout on v5e)
        q = qkv[:, :C].reshape(g, n, C).astype(bf16)              # scale in W_q
        k = qkv[:, C:2 * C].reshape(g, n, C).astype(bf16)
        v = qkv[:, 2 * C:].reshape(g, n, C).astype(bf16)
        s = jnp.einsum('gqd,gkd->gqk', q, k,
                       preferred_element_type=jnp.float32)        # (g, n, n)
        p = _softmax_lastdim(s).astype(bf16)
        a = jnp.einsum('gqk,gkd->gqd', p, v,
                       preferred_element_type=jnp.float32)        # (g, n, C)
        return jnp.dot(a.reshape(g * n, C).astype(bf16), wo,
                       preferred_element_type=jnp.float32)        # (g*n, C)

    # time transformer: attend within the same (sample, feature) -> Bb*K
    # groups of L tokens; rows are already (b, k, l)-ordered.
    y = y + group_attention(y, wqkv_t, wo_t, Bb * K, L)

    # feature transformer: attend within the same (time, sample) -> one bulk
    # axis swap (b,k,l) <-> (l,b,k) instead of per-row slice/concat loops.
    y_lmaj = _swap01(y.reshape(Bb * K, L, C)).reshape(M, C)       # rows (l,b,k)
    o_lmaj = group_attention(y_lmaj, wqkv_f, wo_f, L * Bb, K)
    o_kmaj = _swap01(o_lmaj.reshape(L, Bb * K, C)).reshape(M, C)  # rows (b,k,l)
    y = y + o_kmaj

    # fused (mid + cond) projection -> gated activation -> output projection.
    # cond lanes of ycat were filled once at layer 0; only y lanes change.
    ycat_ref[:, :C] = y.astype(bf16)
    y2 = jnp.dot(ycat_ref[...], w_mc_ref[layer],
                 preferred_element_type=jnp.float32) + b_mc_ref[layer]   # (M,2C)
    gate = jax.nn.sigmoid(y2[:, :C]) * jnp.tanh(y2[:, C:])
    o = jnp.dot(gate.astype(bf16), w_out_ref[layer],
                preferred_element_type=jnp.float32) + b_out_ref[layer]   # (M,2C)
    h_ref[...] = (h + o[:, :C]) * (1.0 / math.sqrt(2.0))
    skip_ref[...] = skip_ref[...] + o[:, C:]

    # ---- last layer: output head + fused per-sample squared error ----------
    @pl.when(layer == n_layers - 1)
    def _finalize():
        skip = skip_ref[...] * (1.0 / math.sqrt(n_layers))
        o1 = jnp.maximum(
            jnp.dot(skip.astype(bf16), w_o1_ref[...],
                    preferred_element_type=jnp.float32) + b_o1_ref[...], 0.0)
        pred = jnp.dot(o1.astype(bf16), w_o2_ref[...],
                       preferred_element_type=jnp.float32) + b_o2_ref[...]  # (M,1)
        noise = xy_ref[...][:, :, 1:2].reshape(M, 1)
        r = noise - pred
        sse = jnp.sum((r * r).reshape(Bb, T, 1), axis=1)              # (Bb, 1)
        sse_ref[...] = sse.reshape(Bb, 1, 1)


# ----------------------------------------------------------------------------
# ConditionalGenerator (JAX/Pallas port)
# ----------------------------------------------------------------------------
class ConditionalGeneratorPallas:
    def __init__(self, cfg, key):
        self.K = cfg['K']
        self.L = cfg['L']
        # TODO(synk): kernel reshapes assume K and L are multiples of 8
        # (TPU sublane alignment); pad K/L for other problem sizes.
        assert self.K % 8 == 0 and self.L % 8 == 0
        self.T = self.K * self.L
        self.n_attrs = cfg['n_attrs']
        self.attr_vocab = cfg['attr_vocab']
        self.attr_emb_dim = cfg['attr_emb_dim']
        self.time_emb_dim = cfg['time_emb_dim']
        self.feat_emb_dim = cfg['feat_emb_dim']
        self.side_dim = self.time_emb_dim + self.feat_emb_dim
        self.cond_dim = self.side_dim + self.attr_emb_dim
        self.channels = cfg['channels']
        self.n_layers = cfg['n_layers']
        self.diff_emb_dim = cfg['diff_emb_dim']
        self.num_steps = cfg['num_steps']
        self.edit_steps = cfg['edit_steps']
        self.bootstrap_ratio = cfg['bootstrap_ratio']

        # DDPM schedule (quad schedule as in CSDI)
        if cfg['schedule'] == 'quad':
            betas = jnp.linspace(cfg['beta_start'] ** 0.5,
                                 cfg['beta_end'] ** 0.5, self.num_steps) ** 2
        else:
            betas = jnp.linspace(cfg['beta_start'], cfg['beta_end'],
                                 self.num_steps)
        alpha_bar = jnp.cumprod(1.0 - betas)
        self.sqrt_ab = jnp.sqrt(alpha_bar).astype(jnp.float32)
        self.sqrt_1mab = jnp.sqrt(1.0 - alpha_bar).astype(jnp.float32)

        self.params = self._init_params(key)
        self._packed = self._pack_params()
        self._train_key = jax.random.PRNGKey(7)
        self._call_cache = {}

    # ---------------- parameters ----------------
    def _init_params(self, key):
        C, nL, Dc, D = self.channels, self.n_layers, self.cond_dim, self.diff_emb_dim
        keys = iter(jax.random.split(key, 40))

        def nrm(shape, scale=0.1):
            return scale * jax.random.normal(next(keys), shape, jnp.float32)

        z = lambda shape: jnp.zeros(shape, jnp.float32)
        return {
            'w_in': nrm((1, C)), 'b_in': z((1, C)),
            'wq_t': nrm((nL, C, C)), 'wk_t': nrm((nL, C, C)),
            'wv_t': nrm((nL, C, C)), 'wo_t': nrm((nL, C, C)),
            'wq_f': nrm((nL, C, C)), 'wk_f': nrm((nL, C, C)),
            'wv_f': nrm((nL, C, C)), 'wo_f': nrm((nL, C, C)),
            'w_mid': nrm((nL, C, 2 * C)), 'b_mid': z((nL, 1, 2 * C)),
            'w_cond': nrm((nL, Dc, 2 * C)), 'b_cond': z((nL, 1, 2 * C)),
            'w_out': nrm((nL, C, 2 * C)), 'b_out': z((nL, 1, 2 * C)),
            'w_o1': nrm((C, C)), 'b_o1': z((1, C)),
            'w_o2': nrm((C, 1)), 'b_o2': z((1, 1)),
            'feat_emb': nrm((self.K, self.feat_emb_dim), 1.0),
            'attr_tables': nrm((self.n_attrs, self.attr_vocab,
                                self.attr_emb_dim), 1.0),
            'diff_w1': nrm((D, D)), 'diff_b1': z((D,)),
            'diff_w2': nrm((D, D)), 'diff_b2': z((D,)),
            'diff_wl': nrm((nL, D, C)), 'diff_bl': z((nL, C)),
        }

    def _pack_params(self):
        """Fuse QKV / mid+cond weights, bake the 1/sqrt(C) scale into W_q and
        cast MXU operands to bf16 (f32-accumulated in the kernel)."""
        p = self.params
        C = self.channels
        scale = 1.0 / math.sqrt(C)
        bf = jnp.bfloat16
        return {
            'w_in': p['w_in'], 'b_in': p['b_in'],
            'wqkv_t': jnp.concatenate(
                [p['wq_t'] * scale, p['wk_t'], p['wv_t']], axis=-1).astype(bf),
            'wo_t': p['wo_t'].astype(bf),
            'wqkv_f': jnp.concatenate(
                [p['wq_f'] * scale, p['wk_f'], p['wv_f']], axis=-1).astype(bf),
            'wo_f': p['wo_f'].astype(bf),
            'w_mc': jnp.concatenate([p['w_mid'], p['w_cond']], axis=1).astype(bf),
            'b_mc': p['b_mid'] + p['b_cond'],
            'w_out': p['w_out'].astype(bf),
            'b_out': p['b_out'],
            'w_o1': p['w_o1'].astype(bf),
            'b_o1': p['b_o1'],
            'w_o2': p['w_o2'].astype(bf),
            'b_o2': p['b_o2'],
        }

    # ---------------- condition encoders (glue) ----------------
    def side_encode(self, tp):
        """tp: (B, L) -> token-major side embedding (B, T, side_dim)."""
        B, L = tp.shape
        d = self.time_emb_dim
        half = d // 2
        div = 1.0 / (10000.0 ** (jnp.arange(half, dtype=jnp.float32) * 2.0 / d))
        ang = tp[..., None] * div                                    # (B, L, half)
        te = jnp.concatenate([jnp.sin(ang), jnp.cos(ang)], axis=-1)  # (B, L, d)
        te = jnp.broadcast_to(te[:, None, :, :], (B, self.K, L, d))
        fe = jnp.broadcast_to(self.params['feat_emb'][None, :, None, :],
                              (B, self.K, L, self.feat_emb_dim))
        side = jnp.concatenate([te, fe], axis=-1)                    # (B,K,L,Ds)
        return side.reshape(B, self.T, self.side_dim)

    def attr_encode(self, attrs):
        """attrs: (B, n_attrs) int -> (B, n_attrs, attr_emb_dim)."""
        a_idx = jnp.arange(self.n_attrs)[None, :]
        return self.params['attr_tables'][a_idx, attrs]

    def _diffusion_embedding(self, t):
        """t: (B,) int -> per-layer diffusion projections (n_layers, B, 1, C)."""
        p = self.params
        half = self.diff_emb_dim // 2
        freqs = 10.0 ** (jnp.arange(half, dtype=jnp.float32) * 4.0 / (half - 1))
        table = t.astype(jnp.float32)[:, None] * freqs[None, :]
        emb = jnp.concatenate([jnp.sin(table), jnp.cos(table)], axis=-1)
        emb = jax.nn.silu(emb @ p['diff_w1'] + p['diff_b1'])
        emb = jax.nn.silu(emb @ p['diff_w2'] + p['diff_b2'])
        out = jnp.einsum('bd,ldc->lbc', emb, p['diff_wl'])
        out = out + p['diff_bl'][:, None, :]
        return out[:, :, None, :].astype(jnp.float32)               # (nL,B,1,C)

    # ---------------- diffusion model (Pallas hot path) ----------------
    def _pick_block_batch(self, B):
        """Largest divisor of B with Bb*T around >=256 matmul rows; keep >=2
        batch blocks when cheap (v7x dual TensorCores)."""
        target = max(1, -(-256 // self.T))          # ceil(256 / T)
        best = 1
        for d in range(1, B + 1):
            if B % d == 0 and d <= target:
                best = d
        if best == B and B > 1 and B % 2 == 0 and (B // 2) * self.T >= 256:
            best = B // 2
        return best

    def _cost_estimate(self, B):
        T, C, Dc = self.T, self.channels, self.cond_dim
        K, L, nL = self.K, self.L, self.n_layers
        attn_t = 2 * T * C * 3 * C + 4 * K * L * L * C + 2 * T * C * C
        attn_f = 2 * T * C * 3 * C + 4 * L * K * K * C + 2 * T * C * C
        midcond = 2 * T * (C + Dc) * 2 * C
        outp = 2 * T * C * 2 * C
        per_layer = attn_t + attn_f + midcond + outp
        head = 2 * T * C * C + 2 * T * C
        flops = B * (nL * per_layer + head + 2 * T * C)
        transc = B * nL * (K * L * L + L * K * K + 2 * T * C)
        w_bytes = sum(int(a.size) * a.dtype.itemsize
                      for a in self._packed.values())
        act_bytes = B * T * 2 * 4 + B * T * Dc * 2 + nL * B * C * 4 + B * 4
        return pl.CostEstimate(flops=int(flops), transcendentals=int(transc),
                               bytes_accessed=int(w_bytes + act_bytes)), w_bytes

    def _build_call(self, B):
        p = self._packed
        T, C, Dc = self.T, self.channels, self.cond_dim
        nL = self.n_layers
        Bb = self._pick_block_batch(B)
        nb = B // Bb
        M = Bb * T

        def const_map(nd):
            return lambda b, l: (0,) * nd

        per_batch3 = lambda b, l: (b, 0, 0)
        in_specs = [
            pl.BlockSpec((Bb, T, 2), per_batch3),                    # noisy|noise
            pl.BlockSpec((Bb, T, Dc), per_batch3),                   # cond tokens
            pl.BlockSpec((nL, Bb, 1, C), lambda b, l: (0, b, 0, 0)), # diff emb
            pl.BlockSpec((1, C), const_map(2)),                      # w_in
            pl.BlockSpec((1, C), const_map(2)),                      # b_in
            pl.BlockSpec((nL, C, 3 * C), const_map(3)),              # wqkv_t
            pl.BlockSpec((nL, C, C), const_map(3)),                  # wo_t
            pl.BlockSpec((nL, C, 3 * C), const_map(3)),              # wqkv_f
            pl.BlockSpec((nL, C, C), const_map(3)),                  # wo_f
            pl.BlockSpec((nL, C + Dc, 2 * C), const_map(3)),         # w_mc
            pl.BlockSpec((nL, 1, 2 * C), const_map(3)),              # b_mc
            pl.BlockSpec((nL, C, 2 * C), const_map(3)),              # w_out
            pl.BlockSpec((nL, 1, 2 * C), const_map(3)),              # b_out
            pl.BlockSpec((C, C), const_map(2)),                      # w_o1
            pl.BlockSpec((1, C), const_map(2)),                      # b_o1
            pl.BlockSpec((C, 1), const_map(2)),                      # w_o2
            pl.BlockSpec((1, 1), const_map(2)),                      # b_o2
        ]

        cost, w_bytes = self._cost_estimate(B)
        # resident weights (x2 buffers) + activation blocks (x2) + state/scratch
        act_block = Bb * T * 2 * 4 + Bb * T * Dc * 2 + nL * Bb * C * 4
        scratch = 2 * M * C * 4 + M * (C + Dc) * 2
        working = 8 * M * max(3 * C, 2 * C, C + Dc) * 4
        est = 2 * w_bytes + 2 * act_block + scratch + working
        # cap at 48 MiB so the same setting fits v7x's 64 MiB physical VMEM.
        vmem_limit = int(min(48 << 20, max(32 << 20, 2 * est + (8 << 20))))

        kernel = partial(_diff_csdi_kernel,
                         Bb=Bb, K=self.K, L=self.L, n_layers=nL)
        return pl.pallas_call(
            kernel,
            out_shape=jax.ShapeDtypeStruct((B, 1, 1), jnp.float32),
            grid=(nb, nL),
            in_specs=in_specs,
            out_specs=pl.BlockSpec((Bb, 1, 1), lambda b, l: (b, 0, 0)),
            scratch_shapes=[
                pltpu.VMEM((M, C), jnp.float32),          # h state
                pltpu.VMEM((M, C), jnp.float32),          # skip accumulator
                pltpu.VMEM((M, C + Dc), jnp.bfloat16),    # persistent [y|cond]
            ],
            compiler_params=pltpu.CompilerParams(
                dimension_semantics=("parallel", "arbitrary"),
                vmem_limit_bytes=vmem_limit),
            cost_estimate=cost,
        )

    def _pallas_sse(self, xy_tok, cond_tok, diffp):
        """Per-sample sum of squared noise-prediction error, fused in-kernel."""
        B = xy_tok.shape[0]
        if B not in self._call_cache:
            self._call_cache[B] = self._build_call(B)
        p = self._packed
        return self._call_cache[B](
            xy_tok, cond_tok, diffp,
            p['w_in'], p['b_in'],
            p['wqkv_t'], p['wo_t'], p['wqkv_f'], p['wo_f'],
            p['w_mc'], p['b_mc'], p['w_out'], p['b_out'],
            p['w_o1'], p['b_o1'], p['w_o2'], p['b_o2'])

    # ---------------- losses ----------------
    def _noise_estimation_loss(self, x, cond_tok, t, key):
        B = x.shape[0]
        noise = jax.random.normal(key, x.shape, jnp.float32)
        x_tok = x.reshape(B, self.T, 1)
        noise_tok = noise.reshape(B, self.T, 1)
        # DDPM forward noising (2 scalars/sample) folded into the wrapper.
        ca = self.sqrt_ab[t][:, None, None]
        cb = self.sqrt_1mab[t][:, None, None]
        noisy_tok = ca * x_tok + cb * noise_tok
        xy_tok = jnp.concatenate([noisy_tok, noise_tok], axis=-1)   # (B, T, 2)
        diffp = self._diffusion_embedding(t)                        # (nL,B,1,C)
        sse = self._pallas_sse(xy_tok, cond_tok, diffp)
        return jnp.sum(sse) / (B * self.T)

    # ---------------- forward ----------------
    def _unpack_data_cond_gen(self, batch):
        x = jnp.transpose(batch['x'].astype(jnp.float32), (0, 2, 1))  # (B,K,L)
        tp = batch['tp'].astype(jnp.float32)
        attrs = batch['attrs'].astype(jnp.int32)
        return x, tp, attrs

    def pretrain(self, batch, is_train):
        x, tp, attrs = self._unpack_data_cond_gen(batch)
        side_tok = self.side_encode(tp)                              # (B,T,Ds)
        attr_emb = self.attr_encode(attrs)                           # (B,A,De)
        # TODO(synk): exact TEdit attribute-injection scheme unknown;
        # using mean-pooled attr embedding broadcast onto every token.
        attr_pool = attr_emb.mean(axis=1)
        B = x.shape[0]
        cond_tok = jnp.concatenate(
            [side_tok,
             jnp.broadcast_to(attr_pool[:, None, :],
                              (B, self.T, self.attr_emb_dim))],
            axis=-1).astype(jnp.bfloat16)
        if is_train:
            self._train_key, kt, kn = jax.random.split(self._train_key, 3)
            t = jax.random.randint(kt, (B,), 0, self.num_steps)
            return self._noise_estimation_loss(x, cond_tok, t, kn)
        loss = jnp.float32(0.0)
        for step in range(self.num_steps):
            t = jnp.full((B,), step, dtype=jnp.int32)
            key = jax.random.fold_in(jax.random.PRNGKey(123), step)
            loss = loss + self._noise_estimation_loss(x, cond_tok, t, key)
        return loss / self.num_steps

    def fintune(self, batch, is_train):
        # TODO(synk): DDIM edit / bootstrap finetuning loop (sampler rollout,
        # topk selection) not ported; the diffusion hot path is `pretrain`.
        raise NotImplementedError("finetune path not ported to Pallas")

    def forward(self, batch, is_train=False, mode='pretrain'):
        if mode == 'pretrain':
            return self.pretrain(batch, is_train)
        elif mode == 'finetune':
            return self.fintune(batch, is_train)


# ----------------------------------------------------------------------------
if __name__ == "__main__":
    cfg = {
        'K': 8, 'L': 8,
        'n_attrs': 2, 'attr_vocab': 8, 'attr_emb_dim': 8,
        'time_emb_dim': 16, 'feat_emb_dim': 8,
        'channels': 32, 'n_layers': 2, 'diff_emb_dim': 32,
        'num_steps': 4, 'beta_start': 1e-4, 'beta_end': 0.1, 'schedule': 'quad',
        'edit_steps': 2, 'bootstrap_ratio': 0.0,
    }
    B, K, L = 2, cfg['K'], cfg['L']

    root = jax.random.PRNGKey(0)
    k_param, k_x, k_attr = jax.random.split(root, 3)

    model = ConditionalGeneratorPallas(cfg, k_param)

    batch = {
        'x': jax.random.normal(k_x, (B, L, K), jnp.float32),   # (B, L, K)
        'tp': jnp.broadcast_to(
            jnp.arange(L, dtype=jnp.float32)[None, :], (B, L)),
        'attrs': jax.random.randint(k_attr, (B, cfg['n_attrs']),
                                    0, cfg['attr_vocab']),
    }

    loss = model.forward(batch, is_train=False, mode='pretrain')
    jax.block_until_ready(loss)
    print("KERNEL_OK")
</pallas_src>

<mosaic_0001>
module attributes {stable_mosaic.version = 11 : i64} {
  func.func @_diff_csdi_kernel(%arg0: i32, %arg1: i32, %arg2: memref<2x64x2xf32, #tpu.memory_space<vmem>>, %arg3: memref<2x64x32xbf16, #tpu.memory_space<vmem>>, %arg4: memref<2x2x1x32xf32, #tpu.memory_space<vmem>>, %arg5: memref<1x32xf32, #tpu.memory_space<vmem>>, %arg6: memref<1x32xf32, #tpu.memory_space<vmem>>, %arg7: memref<2x32x96xbf16, #tpu.memory_space<vmem>>, %arg8: memref<2x32x32xbf16, #tpu.memory_space<vmem>>, %arg9: memref<2x32x96xbf16, #tpu.memory_space<vmem>>, %arg10: memref<2x32x32xbf16, #tpu.memory_space<vmem>>, %arg11: memref<2x64x64xbf16, #tpu.memory_space<vmem>>, %arg12: memref<2x1x64xf32, #tpu.memory_space<vmem>>, %arg13: memref<2x32x64xbf16, #tpu.memory_space<vmem>>, %arg14: memref<2x1x64xf32, #tpu.memory_space<vmem>>, %arg15: memref<32x32xbf16, #tpu.memory_space<vmem>>, %arg16: memref<1x32xf32, #tpu.memory_space<vmem>>, %arg17: memref<32x1xbf16, #tpu.memory_space<vmem>>, %arg18: memref<1x1xf32, #tpu.memory_space<vmem>>, %arg19: memref<2x1x1xf32, #tpu.memory_space<vmem>>, %arg20: memref<128x32xf32, #tpu.memory_space<vmem>>, %arg21: memref<128x32xf32, #tpu.memory_space<vmem>>, %arg22: memref<128x64xbf16, #tpu.memory_space<vmem>>) attributes {dimension_semantics = [#tpu.dimension_semantics<parallel>, #tpu.dimension_semantics<arbitrary>], iteration_bounds = array<i64: 1, 2>, scalar_prefetch = 0 : i64, scratch_operands = 3 : i64, tpu.core_type = #tpu.core_type<tc>, window_params = [{transform_indices = @transform_0, window_bounds = array<i64: 2, 64, 2>}, {transform_indices = @transform_1, window_bounds = array<i64: 2, 64, 32>}, {transform_indices = @transform_2, window_bounds = array<i64: 2, 2, 1, 32>}, {pipeline_mode = #tpu.pipeline_mode<synchronous>, transform_indices = @transform_3, window_bounds = array<i64: 1, 32>}, {pipeline_mode = #tpu.pipeline_mode<synchronous>, transform_indices = @transform_4, window_bounds = array<i64: 1, 32>}, {pipeline_mode = #tpu.pipeline_mode<synchronous>, transform_indices = @transform_5, window_bounds = array<i64: 2, 32, 96>}, {pipeline_mode = #tpu.pipeline_mode<synchronous>, transform_indices = @transform_6, window_bounds = array<i64: 2, 32, 32>}, {pipeline_mode = #tpu.pipeline_mode<synchronous>, transform_indices = @transform_7, window_bounds = array<i64: 2, 32, 96>}, {pipeline_mode = #tpu.pipeline_mode<synchronous>, transform_indices = @transform_8, window_bounds = array<i64: 2, 32, 32>}, {pipeline_mode = #tpu.pipeline_mode<synchronous>, transform_indices = @transform_9, window_bounds = array<i64: 2, 64, 64>}, {pipeline_mode = #tpu.pipeline_mode<synchronous>, transform_indices = @transform_10, window_bounds = array<i64: 2, 1, 64>}, {pipeline_mode = #tpu.pipeline_mode<synchronous>, transform_indices = @transform_11, window_bounds = array<i64: 2, 32, 64>}, {pipeline_mode = #tpu.pipeline_mode<synchronous>, transform_indices = @transform_12, window_bounds = array<i64: 2, 1, 64>}, {pipeline_mode = #tpu.pipeline_mode<synchronous>, transform_indices = @transform_13, window_bounds = array<i64: 32, 32>}, {pipeline_mode = #tpu.pipeline_mode<synchronous>, transform_indices = @transform_14, window_bounds = array<i64: 1, 32>}, {pipeline_mode = #tpu.pipeline_mode<synchronous>, transform_indices = @transform_15, window_bounds = array<i64: 32, 1>}, {pipeline_mode = #tpu.pipeline_mode<synchronous>, transform_indices = @transform_16, window_bounds = array<i64: 1, 1>}, {transform_indices = @transform_17, window_bounds = array<i64: 2, 1, 1>}]} {
    %c0_i32 = arith.constant 0 : i32
    %0 = arith.cmpi eq, %arg1, %c0_i32 : i32
    %1 = arith.extui %0 : i1 to i32
    %c0_i32_0 = arith.constant 0 : i32
    %2 = arith.cmpi ne, %1, %c0_i32_0 : i32
    scf.if %2 {
      %c0_47 = arith.constant 0 : index
      %c0_48 = arith.constant 0 : index
      %c0_49 = arith.constant 0 : index
      %128 = vector.load %arg2[%c0_47, %c0_48, %c0_49] : memref<2x64x2xf32, #tpu.memory_space<vmem>>, vector<2x64x2xf32>
      %129 = vector.extract_strided_slice %128 {offsets = [0, 0, 0], sizes = [2, 64, 1], strides = [1, 1, 1]} : vector<2x64x2xf32> to vector<2x64x1xf32>
      %130 = vector.shape_cast %129 : vector<2x64x1xf32> to vector<128x1xf32>
      %c0_50 = arith.constant 0 : index
      %c0_51 = arith.constant 0 : index
      %131 = vector.load %arg5[%c0_50, %c0_51] : memref<1x32xf32, #tpu.memory_space<vmem>>, vector<1x32xf32>
      %132 = vector.broadcast %130 : vector<128x1xf32> to vector<128x32xf32>
      %133 = vector.broadcast %131 : vector<1x32xf32> to vector<128x32xf32>
      %134 = arith.mulf %132, %133 : vector<128x32xf32>
      %c0_52 = arith.constant 0 : index
      %c0_53 = arith.constant 0 : index
      %135 = vector.load %arg6[%c0_52, %c0_53] : memref<1x32xf32, #tpu.memory_space<vmem>>, vector<1x32xf32>
      %136 = vector.broadcast %135 : vector<1x32xf32> to vector<128x32xf32>
      %137 = arith.addf %134, %136 : vector<128x32xf32>
      %cst_54 = arith.constant 0.000000e+00 : f32
      %138 = vector.broadcast %cst_54 : f32 to vector<128x32xf32>
      %139 = arith.maximumf %137, %138 : vector<128x32xf32>
      %c0_55 = arith.constant 0 : index
      %c0_56 = arith.constant 0 : index
      %140 = vector.load %arg20[%c0_55, %c0_56] : memref<128x32xf32, #tpu.memory_space<vmem>>, vector<128x32xf32>
      tpu.vector_store %arg20[%c0_55, %c0_56], %139 {strides = array<i32>} : memref<128x32xf32, #tpu.memory_space<vmem>>, vector<128x32xf32>,
      %cst_57 = arith.constant 0.000000e+00 : f32
      %141 = vector.broadcast %cst_57 : f32 to vector<128x32xf32>
      %c0_58 = arith.constant 0 : index
      %c0_59 = arith.constant 0 : index
      %142 = vector.load %arg21[%c0_58, %c0_59] : memref<128x32xf32, #tpu.memory_space<vmem>>, vector<128x32xf32>
      tpu.vector_store %arg21[%c0_58, %c0_59], %141 {strides = array<i32>} : memref<128x32xf32, #tpu.memory_space<vmem>>, vector<128x32xf32>,
      %c0_60 = arith.constant 0 : index
      %c0_61 = arith.constant 0 : index
      %c0_62 = arith.constant 0 : index
      %143 = vector.load %arg3[%c0_60, %c0_61, %c0_62] : memref<2x64x32xbf16, #tpu.memory_space<vmem>>, vector<2x64x32xbf16>
      %144 = vector.shape_cast %143 : vector<2x64x32xbf16> to vector<128x32xbf16>
      %c0_63 = arith.constant 0 : index
      %c32 = arith.constant 32 : index
      %145 = vector.load %arg22[%c0_63, %c32] : memref<128x64xbf16, #tpu.memory_space<vmem>>, vector<128x32xbf16>
      tpu.vector_store %arg22[%c0_63, %c32], %144 {strides = array<i32>} : memref<128x64xbf16, #tpu.memory_space<vmem>>, vector<128x32xbf16>,
    } else {
    }
    %c0 = arith.constant 0 : index
    %c0_1 = arith.constant 0 : index
    %3 = vector.load %arg20[%c0, %c0_1] : memref<128x32xf32, #tpu.memory_space<vmem>>, vector<128x32xf32>
    %4 = arith.index_cast %arg1 : i32 to index
    %c0_2 = arith.constant 0 : index
    %c0_3 = arith.constant 0 : index
    %c0_4 = arith.constant 0 : index
    %5 = vector.load %arg4[%4, %c0_2, %c0_3, %c0_4] : memref<2x2x1x32xf32, #tpu.memory_space<vmem>>, vector<1x2x1x32xf32>
    %6 = vector.shape_cast %5 : vector<1x2x1x32xf32> to vector<2x1x32xf32>
    %7 = vector.shape_cast %3 : vector<128x32xf32> to vector<2x64x32xf32>
    %8 = vector.broadcast %6 : vector<2x1x32xf32> to vector<2x64x32xf32>
    %9 = arith.addf %7, %8 : vector<2x64x32xf32>
    %10 = vector.shape_cast %9 : vector<2x64x32xf32> to vector<128x32xf32>
    %11 = arith.index_cast %arg1 : i32 to index
    %c0_5 = arith.constant 0 : index
    %c0_6 = arith.constant 0 : index
    %12 = vector.load %arg7[%11, %c0_5, %c0_6] : memref<2x32x96xbf16, #tpu.memory_space<vmem>>, vector<1x32x96xbf16>
    %13 = vector.shape_cast %12 : vector<1x32x96xbf16> to vector<32x96xbf16>
    %14 = arith.index_cast %arg1 : i32 to index
    %c0_7 = arith.constant 0 : index
    %c0_8 = arith.constant 0 : index
    %15 = vector.load %arg8[%14, %c0_7, %c0_8] : memref<2x32x32xbf16, #tpu.memory_space<vmem>>, vector<1x32x32xbf16>
    %16 = vector.shape_cast %15 : vector<1x32x32xbf16> to vector<32x32xbf16>
    %17 = arith.index_cast %arg1 : i32 to index
    %c0_9 = arith.constant 0 : index
    %c0_10 = arith.constant 0 : index
    %18 = vector.load %arg9[%17, %c0_9, %c0_10] : memref<2x32x96xbf16, #tpu.memory_space<vmem>>, vector<1x32x96xbf16>
    %19 = vector.shape_cast %18 : vector<1x32x96xbf16> to vector<32x96xbf16>
    %20 = arith.index_cast %arg1 : i32 to index
    %c0_11 = arith.constant 0 : index
    %c0_12 = arith.constant 0 : index
    %21 = vector.load %arg10[%20, %c0_11, %c0_12] : memref<2x32x32xbf16, #tpu.memory_space<vmem>>, vector<1x32x32xbf16>
    %22 = vector.shape_cast %21 : vector<1x32x32xbf16> to vector<32x32xbf16>
    %23 = arith.truncf %10 : vector<128x32xf32> to vector<128x32xbf16>
    %cst = arith.constant dense<0.000000e+00> : vector<128x96xf32>
    %24 = tpu.matmul %23, %13, %cst {dimension_numbers = #tpu.dot_dimension_numbers<[1], [0], [0], [1], [0, 0, 1, 1], [], []>} : vector<128x32xbf16>, vector<32x96xbf16>, vector<128x96xf32> -> vector<128x96xf32>
    %25 = vector.extract_strided_slice %24 {offsets = [0, 0], sizes = [128, 32], strides = [1, 1]} : vector<128x96xf32> to vector<128x32xf32>
    %26 = vector.shape_cast %25 : vector<128x32xf32> to vector<16x8x32xf32>
    %27 = arith.truncf %26 : vector<16x8x32xf32> to vector<16x8x32xbf16>
    %28 = vector.extract_strided_slice %24 {offsets = [0, 32], sizes = [128, 32], strides = [1, 1]} : vector<128x96xf32> to vector<128x32xf32>
    %29 = vector.shape_cast %28 : vector<128x32xf32> to vector<16x8x32xf32>
    %30 = arith.truncf %29 : vector<16x8x32xf32> to vector<16x8x32xbf16>
    %31 = vector.extract_strided_slice %24 {offsets = [0, 64], sizes = [128, 32], strides = [1, 1]} : vector<128x96xf32> to vector<128x32xf32>
    %32 = vector.shape_cast %31 : vector<128x32xf32> to vector<16x8x32xf32>
    %33 = arith.truncf %32 : vector<16x8x32xf32> to vector<16x8x32xbf16>
    "tpu.trace_start"() <{level = 10 : i32, message = "gqd,gkd->gqk"}> : () -> ()
    %cst_13 = arith.constant dense<0.000000e+00> : vector<16x8x8xf32>
    %34 = tpu.matmul %27, %30, %cst_13 {dimension_numbers = #tpu.dot_dimension_numbers<[2], [2], [1], [1], [0, 0, 0, 1, 1, 1], [0], [0]>} : vector<16x8x32xbf16>, vector<16x8x32xbf16>, vector<16x8x8xf32> -> vector<16x8x8xf32>
    "tpu.trace_stop"() : () -> ()
    %cst_14 = arith.constant dense<0xFF800000> : vector<16x8xf32>
    %35 = vector.multi_reduction <maximumf>, %34, %cst_14 [2] : vector<16x8x8xf32> to vector<16x8xf32>
    %36 = vector.shape_cast %35 : vector<16x8xf32> to vector<16x8x1xf32>
    %37 = vector.broadcast %36 : vector<16x8x1xf32> to vector<16x8x8xf32>
    %38 = arith.subf %34, %37 : vector<16x8x8xf32>
    %39 = math.exp %38 : vector<16x8x8xf32>
    %cst_15 = arith.constant dense<0.000000e+00> : vector<16x8xf32>
    %40 = vector.multi_reduction <add>, %39, %cst_15 [2] : vector<16x8x8xf32> to vector<16x8xf32>
    %41 = vector.shape_cast %40 : vector<16x8xf32> to vector<16x8x1xf32>
    %42 = tpu.reciprocal %41 {approx = true} : vector<16x8x1xf32> -> vector<16x8x1xf32>
    %43 = vector.broadcast %42 : vector<16x8x1xf32> to vector<16x8x8xf32>
    %44 = arith.mulf %39, %43 : vector<16x8x8xf32>
    %45 = arith.truncf %44 : vector<16x8x8xf32> to vector<16x8x8xbf16>
    "tpu.trace_start"() <{level = 10 : i32, message = "gqk,gkd->gqd"}> : () -> ()
    %cst_16 = arith.constant dense<0.000000e+00> : vector<16x8x32xf32>
    %46 = tpu.matmul %45, %33, %cst_16 {dimension_numbers = #tpu.dot_dimension_numbers<[2], [1], [1], [2], [0, 0, 0, 1, 1, 2], [0], [0]>} : vector<16x8x8xbf16>, vector<16x8x32xbf16>, vector<16x8x32xf32> -> vector<16x8x32xf32>
    "tpu.trace_stop"() : () -> ()
    %47 = vector.shape_cast %46 : vector<16x8x32xf32> to vector<128x32xf32>
    %48 = arith.truncf %47 : vector<128x32xf32> to vector<128x32xbf16>
    %cst_17 = arith.constant dense<0.000000e+00> : vector<128x32xf32>
    %49 = tpu.matmul %48, %16, %cst_17 {dimension_numbers = #tpu.dot_dimension_numbers<[1], [0], [0], [1], [0, 0, 1, 1], [], []>} : vector<128x32xbf16>, vector<32x32xbf16>, vector<128x32xf32> -> vector<128x32xf32>
    %50 = arith.addf %10, %49 : vector<128x32xf32>
    %51 = vector.shape_cast %50 : vector<128x32xf32> to vector<16x8x32xf32>
    %52 = tpu.transpose %51, [1, 0, 2] : vector<16x8x32xf32> -> vector<8x16x32xf32>
    %53 = vector.shape_cast %52 : vector<8x16x32xf32> to vector<128x32xf32>
    %54 = arith.truncf %53 : vector<128x32xf32> to vector<128x32xbf16>
    %cst_18 = arith.constant dense<0.000000e+00> : vector<128x96xf32>
    %55 = tpu.matmul %54, %19, %cst_18 {dimension_numbers = #tpu.dot_dimension_numbers<[1], [0], [0], [1], [0, 0, 1, 1], [], []>} : vector<128x32xbf16>, vector<32x96xbf16>, vector<128x96xf32> -> vector<128x96xf32>
    %56 = vector.extract_strided_slice %55 {offsets = [0, 0], sizes = [128, 32], strides = [1, 1]} : vector<128x96xf32> to vector<128x32xf32>
    %57 = vector.shape_cast %56 : vector<128x32xf32> to vector<16x8x32xf32>
    %58 = arith.truncf %57 : vector<16x8x32xf32> to vector<16x8x32xbf16>
    %59 = vector.extract_strided_slice %55 {offsets = [0, 32], sizes = [128, 32], strides = [1, 1]} : vector<128x96xf32> to vector<128x32xf32>
    %60 = vector.shape_cast %59 : vector<128x32xf32> to vector<16x8x32xf32>
    %61 = arith.truncf %60 : vector<16x8x32xf32> to vector<16x8x32xbf16>
    %62 = vector.extract_strided_slice %55 {offsets = [0, 64], sizes = [128, 32], strides = [1, 1]} : vector<128x96xf32> to vector<128x32xf32>
    %63 = vector.shape_cast %62 : vector<128x32xf32> to vector<16x8x32xf32>
    %64 = arith.truncf %63 : vector<16x8x32xf32> to vector<16x8x32xbf16>
    "tpu.trace_start"() <{level = 10 : i32, message = "gqd,gkd->gqk"}> : () -> ()
    %cst_19 = arith.constant dense<0.000000e+00> : vector<16x8x8xf32>
    %65 = tpu.matmul %58, %61, %cst_19 {dimension_numbers = #tpu.dot_dimension_numbers<[2], [2], [1], [1], [0, 0, 0, 1, 1, 1], [0], [0]>} : vector<16x8x32xbf16>, vector<16x8x32xbf16>, vector<16x8x8xf32> -> vector<16x8x8xf32>
    "tpu.trace_stop"() : () -> ()
    %cst_20 = arith.constant dense<0xFF800000> : vector<16x8xf32>
    %66 = vector.multi_reduction <maximumf>, %65, %cst_20 [2] : vector<16x8x8xf32> to vector<16x8xf32>
    %67 = vector.shape_cast %66 : vector<16x8xf32> to vector<16x8x1xf32>
    %68 = vector.broadcast %67 : vector<16x8x1xf32> to vector<16x8x8xf32>
    %69 = arith.subf %65, %68 : vector<16x8x8xf32>
    %70 = math.exp %69 : vector<16x8x8xf32>
    %cst_21 = arith.constant dense<0.000000e+00> : vector<16x8xf32>
    %71 = vector.multi_reduction <add>, %70, %cst_21 [2] : vector<16x8x8xf32> to vector<16x8xf32>
    %72 = vector.shape_cast %71 : vector<16x8xf32> to vector<16x8x1xf32>
    %73 = tpu.reciprocal %72 {approx = true} : vector<16x8x1xf32> -> vector<16x8x1xf32>
    %74 = vector.broadcast %73 : vector<16x8x1xf32> to vector<16x8x8xf32>
    %75 = arith.mulf %70, %74 : vector<16x8x8xf32>
    %76 = arith.truncf %75 : vector<16x8x8xf32> to vector<16x8x8xbf16>
    "tpu.trace_start"() <{level = 10 : i32, message = "gqk,gkd->gqd"}> : () -> ()
    %cst_22 = arith.constant dense<0.000000e+00> : vector<16x8x32xf32>
    %77 = tpu.matmul %76, %64, %cst_22 {dimension_numbers = #tpu.dot_dimension_numbers<[2], [1], [1], [2], [0, 0, 0, 1, 1, 2], [0], [0]>} : vector<16x8x8xbf16>, vector<16x8x32xbf16>, vector<16x8x32xf32> -> vector<16x8x32xf32>
    "tpu.trace_stop"() : () -> ()
    %78 = vector.shape_cast %77 : vector<16x8x32xf32> to vector<128x32xf32>
    %79 = arith.truncf %78 : vector<128x32xf32> to vector<128x32xbf16>
    %cst_23 = arith.constant dense<0.000000e+00> : vector<128x32xf32>
    %80 = tpu.matmul %79, %22, %cst_23 {dimension_numbers = #tpu.dot_dimension_numbers<[1], [0], [0], [1], [0, 0, 1, 1], [], []>} : vector<128x32xbf16>, vector<32x32xbf16>, vector<128x32xf32> -> vector<128x32xf32>
    %81 = vector.shape_cast %80 : vector<128x32xf32> to vector<8x16x32xf32>
    %82 = tpu.transpose %81, [1, 0, 2] : vector<8x16x32xf32> -> vector<16x8x32xf32>
    %83 = vector.shape_cast %82 : vector<16x8x32xf32> to vector<128x32xf32>
    %84 = arith.addf %50, %83 : vector<128x32xf32>
    %85 = arith.truncf %84 : vector<128x32xf32> to vector<128x32xbf16>
    %c0_24 = arith.constant 0 : index
    %c0_25 = arith.constant 0 : index
    %86 = vector.load %arg22[%c0_24, %c0_25] : memref<128x64xbf16, #tpu.memory_space<vmem>>, vector<128x32xbf16>
    tpu.vector_store %arg22[%c0_24, %c0_25], %85 {strides = array<i32>} : memref<128x64xbf16, #tpu.memory_space<vmem>>, vector<128x32xbf16>,
    %c0_26 = arith.constant 0 : index
    %c0_27 = arith.constant 0 : index
    %87 = vector.load %arg22[%c0_26, %c0_27] : memref<128x64xbf16, #tpu.memory_space<vmem>>, vector<128x64xbf16>
    %88 = arith.index_cast %arg1 : i32 to index
    %c0_28 = arith.constant 0 : index
    %c0_29 = arith.constant 0 : index
    %89 = vector.load %arg11[%88, %c0_28, %c0_29] : memref<2x64x64xbf16, #tpu.memory_space<vmem>>, vector<1x64x64xbf16>
    %90 = vector.shape_cast %89 : vector<1x64x64xbf16> to vector<64x64xbf16>
    %cst_30 = arith.constant dense<0.000000e+00> : vector<128x64xf32>
    %91 = tpu.matmul %87, %90, %cst_30 {dimension_numbers = #tpu.dot_dimension_numbers<[1], [0], [0], [1], [0, 0, 1, 1], [], []>} : vector<128x64xbf16>, vector<64x64xbf16>, vector<128x64xf32> -> vector<128x64xf32>
    %92 = arith.index_cast %arg1 : i32 to index
    %c0_31 = arith.constant 0 : index
    %c0_32 = arith.constant 0 : index
    %93 = vector.load %arg12[%92, %c0_31, %c0_32] : memref<2x1x64xf32, #tpu.memory_space<vmem>>, vector<1x1x64xf32>
    %94 = vector.shape_cast %93 : vector<1x1x64xf32> to vector<1x64xf32>
    %95 = vector.broadcast %94 : vector<1x64xf32> to vector<128x64xf32>
    %96 = arith.addf %91, %95 : vector<128x64xf32>
    %97 = vector.extract_strided_slice %96 {offsets = [0, 0], sizes = [128, 32], strides = [1, 1]} : vector<128x64xf32> to vector<128x32xf32>
    %98 = arith.negf %97 : vector<128x32xf32>
    %99 = math.exp %98 : vector<128x32xf32>
    %cst_33 = arith.constant 1.000000e+00 : f32
    %100 = vector.broadcast %cst_33 : f32 to vector<128x32xf32>
    %101 = arith.addf %100, %99 : vector<128x32xf32>
    %102 = arith.divf %100, %101 : vector<128x32xf32>
    %103 = vector.extract_strided_slice %96 {offsets = [0, 32], sizes = [128, 32], strides = [1, 1]} : vector<128x64xf32> to vector<128x32xf32>
    %104 = math.tanh %103 : vector<128x32xf32>
    %105 = arith.mulf %102, %104 : vector<128x32xf32>
    %106 = arith.truncf %105 : vector<128x32xf32> to vector<128x32xbf16>
    %107 = arith.index_cast %arg1 : i32 to index
    %c0_34 = arith.constant 0 : index
    %c0_35 = arith.constant 0 : index
    %108 = vector.load %arg13[%107, %c0_34, %c0_35] : memref<2x32x64xbf16, #tpu.memory_space<vmem>>, vector<1x32x64xbf16>
    %109 = vector.shape_cast %108 : vector<1x32x64xbf16> to vector<32x64xbf16>
    %cst_36 = arith.constant dense<0.000000e+00> : vector<128x64xf32>
    %110 = tpu.matmul %106, %109, %cst_36 {dimension_numbers = #tpu.dot_dimension_numbers<[1], [0], [0], [1], [0, 0, 1, 1], [], []>} : vector<128x32xbf16>, vector<32x64xbf16>, vector<128x64xf32> -> vector<128x64xf32>
    %111 = arith.index_cast %arg1 : i32 to index
    %c0_37 = arith.constant 0 : index
    %c0_38 = arith.constant 0 : index
    %112 = vector.load %arg14[%111, %c0_37, %c0_38] : memref<2x1x64xf32, #tpu.memory_space<vmem>>, vector<1x1x64xf32>
    %113 = vector.shape_cast %112 : vector<1x1x64xf32> to vector<1x64xf32>
    %114 = vector.broadcast %113 : vector<1x64xf32> to vector<128x64xf32>
    %115 = arith.addf %110, %114 : vector<128x64xf32>
    %116 = vector.extract_strided_slice %115 {offsets = [0, 0], sizes = [128, 32], strides = [1, 1]} : vector<128x64xf32> to vector<128x32xf32>
    %117 = arith.addf %3, %116 : vector<128x32xf32>
    %cst_39 = arith.constant 0.707106769 : f32
    %118 = vector.broadcast %cst_39 : f32 to vector<128x32xf32>
    %119 = arith.mulf %117, %118 : vector<128x32xf32>
    %c0_40 = arith.constant 0 : index
    %c0_41 = arith.constant 0 : index
    %120 = vector.load %arg20[%c0_40, %c0_41] : memref<128x32xf32, #tpu.memory_space<vmem>>, vector<128x32xf32>
    tpu.vector_store %arg20[%c0_40, %c0_41], %119 {strides = array<i32>} : memref<128x32xf32, #tpu.memory_space<vmem>>, vector<128x32xf32>,
    %c0_42 = arith.constant 0 : index
    %c0_43 = arith.constant 0 : index
    %121 = vector.load %arg21[%c0_42, %c0_43] : memref<128x32xf32, #tpu.memory_space<vmem>>, vector<128x32xf32>
    %122 = vector.extract_strided_slice %115 {offsets = [0, 32], sizes = [128, 32], strides = [1, 1]} : vector<128x64xf32> to vector<128x32xf32>
    %123 = arith.addf %121, %122 : vector<128x32xf32>
    %c0_44 = arith.constant 0 : index
    %c0_45 = arith.constant 0 : index
    %124 = vector.load %arg21[%c0_44, %c0_45] : memref<128x32xf32, #tpu.memory_space<vmem>>, vector<128x32xf32>
    tpu.vector_store %arg21[%c0_44, %c0_45], %123 {strides = array<i32>} : memref<128x32xf32, #tpu.memory_space<vmem>>, vector<128x32xf32>,
    %c1_i32 = arith.constant 1 : i32
    %125 = arith.cmpi eq, %arg1, %c1_i32 : i32
    %126 = arith.extui %125 : i1 to i32
    %c0_i32_46 = arith.constant 0 : i32
    %127 = arith.cmpi ne, %126, %c0_i32_46 : i32
    scf.if %127 {
      %c0_47 = arith.constant 0 : index
      %c0_48 = arith.constant 0 : index
      %128 = vector.load %arg21[%c0_47, %c0_48] : memref<128x32xf32, #tpu.memory_space<vmem>>, vector<128x32xf32>
      %cst_49 = arith.constant 0.707106769 : f32
      %129 = vector.broadcast %cst_49 : f32 to vector<128x32xf32>
      %130 = arith.mulf %128, %129 : vector<128x32xf32>
      %131 = arith.truncf %130 : vector<128x32xf32> to vector<128x32xbf16>
      %c0_50 = arith.constant 0 : index
      %c0_51 = arith.constant 0 : index
      %132 = vector.load %arg15[%c0_50, %c0_51] : memref<32x32xbf16, #tpu.memory_space<vmem>>, vector<32x32xbf16>
      %cst_52 = arith.constant dense<0.000000e+00> : vector<128x32xf32>
      %133 = tpu.matmul %131, %132, %cst_52 {dimension_numbers = #tpu.dot_dimension_numbers<[1], [0], [0], [1], [0, 0, 1, 1], [], []>} : vector<128x32xbf16>, vector<32x32xbf16>, vector<128x32xf32> -> vector<128x32xf32>
      %c0_53 = arith.constant 0 : index
      %c0_54 = arith.constant 0 : index
      %134 = vector.load %arg16[%c0_53, %c0_54] : memref<1x32xf32, #tpu.memory_space<vmem>>, vector<1x32xf32>
      %135 = vector.broadcast %134 : vector<1x32xf32> to vector<128x32xf32>
      %136 = arith.addf %133, %135 : vector<128x32xf32>
      %cst_55 = arith.constant 0.000000e+00 : f32
      %137 = vector.broadcast %cst_55 : f32 to vector<128x32xf32>
      %138 = arith.maximumf %136, %137 : vector<128x32xf32>
      %139 = arith.truncf %138 : vector<128x32xf32> to vector<128x32xbf16>
      %c0_56 = arith.constant 0 : index
      %c0_57 = arith.constant 0 : index
      %140 = vector.load %arg17[%c0_56, %c0_57] : memref<32x1xbf16, #tpu.memory_space<vmem>>, vector<32x1xbf16>
      %cst_58 = arith.constant dense<0.000000e+00> : vector<128x1xf32>
      %141 = tpu.matmul %139, %140, %cst_58 {dimension_numbers = #tpu.dot_dimension_numbers<[1], [0], [0], [1], [0, 0, 1, 1], [], []>} : vector<128x32xbf16>, vector<32x1xbf16>, vector<128x1xf32> -> vector<128x1xf32>
      %c0_59 = arith.constant 0 : index
      %c0_60 = arith.constant 0 : index
      %142 = vector.load %arg18[%c0_59, %c0_60] : memref<1x1xf32, #tpu.memory_space<vmem>>, vector<1x1xf32>
      %143 = vector.broadcast %142 : vector<1x1xf32> to vector<128x1xf32>
      %144 = arith.addf %141, %143 : vector<128x1xf32>
      %c0_61 = arith.constant 0 : index
      %c0_62 = arith.constant 0 : index
      %c0_63 = arith.constant 0 : index
      %145 = vector.load %arg2[%c0_61, %c0_62, %c0_63] : memref<2x64x2xf32, #tpu.memory_space<vmem>>, vector<2x64x2xf32>
      %146 = vector.extract_strided_slice %145 {offsets = [0, 0, 1], sizes = [2, 64, 1], strides = [1, 1, 1]} : vector<2x64x2xf32> to vector<2x64x1xf32>
      %147 = vector.shape_cast %146 : vector<2x64x1xf32> to vector<128x1xf32>
      %148 = arith.subf %147, %144 : vector<128x1xf32>
      %149 = arith.mulf %148, %148 : vector<128x1xf32>
      %150 = vector.shape_cast %149 : vector<128x1xf32> to vector<2x64x1xf32>
      %cst_64 = arith.constant dense<0.000000e+00> : vector<2x1xf32>
      %151 = vector.multi_reduction <add>, %150, %cst_64 [1] : vector<2x64x1xf32> to vector<2x1xf32>
      %152 = vector.shape_cast %151 : vector<2x1xf32> to vector<2x1x1xf32>
      %c0_65 = arith.constant 0 : index
      %c0_66 = arith.constant 0 : index
      %c0_67 = arith.constant 0 : index
      %153 = vector.load %arg19[%c0_65, %c0_66, %c0_67] : memref<2x1x1xf32, #tpu.memory_space<vmem>>, vector<2x1x1xf32>
      tpu.vector_store %arg19[%c0_65, %c0_66, %c0_67], %152 {strides = array<i32>} : memref<2x1x1xf32, #tpu.memory_space<vmem>>, vector<2x1x1xf32>,
    } else {
    }
    return
  }
  func.func @transform_0(%arg0: i32, %arg1: i32) -> (i32, i32, i32) {
    %c0_i32 = arith.constant 0 : i32
    %c0_i32_0 = arith.constant 0 : i32
    %c0_i32_1 = arith.constant 0 : i32
    return %arg0, %c0_i32, %c0_i32_0 : i32, i32, i32
  }
  func.func @transform_1(%arg0: i32, %arg1: i32) -> (i32, i32, i32) {
    %c0_i32 = arith.constant 0 : i32
    %c0_i32_0 = arith.constant 0 : i32
    %c0_i32_1 = arith.constant 0 : i32
    return %arg0, %c0_i32, %c0_i32_0 : i32, i32, i32
  }
  func.func @transform_2(%arg0: i32, %arg1: i32) -> (i32, i32, i32, i32) {
    %c0_i32 = arith.constant 0 : i32
    %c0_i32_0 = arith.constant 0 : i32
    %c0_i32_1 = arith.constant 0 : i32
    %c0_i32_2 = arith.constant 0 : i32
    return %c0_i32, %arg0, %c0_i32_0, %c0_i32_1 : i32, i32, i32, i32
  }
  func.func @transform_3(%arg0: i32, %arg1: i32) -> (i32, i32) {
    %c0_i32 = arith.constant 0 : i32
    %c0_i32_0 = arith.constant 0 : i32
    %c0_i32_1 = arith.constant 0 : i32
    return %c0_i32, %c0_i32_0 : i32, i32
  }
  func.func @transform_4(%arg0: i32, %arg1: i32) -> (i32, i32) {
    %c0_i32 = arith.constant 0 : i32
    %c0_i32_0 = arith.constant 0 : i32
    %c0_i32_1 = arith.constant 0 : i32
    return %c0_i32, %c0_i32_0 : i32, i32
  }
  func.func @transform_5(%arg0: i32, %arg1: i32) -> (i32, i32, i32) {
    %c0_i32 = arith.constant 0 : i32
    %c0_i32_0 = arith.constant 0 : i32
    %c0_i32_1 = arith.constant 0 : i32
    %c0_i32_2 = arith.constant 0 : i32
    return %c0_i32, %c0_i32_0, %c0_i32_1 : i32, i32, i32
  }
  func.func @transform_6(%arg0: i32, %arg1: i32) -> (i32, i32, i32) {
    %c0_i32 = arith.constant 0 : i32
    %c0_i32_0 = arith.constant 0 : i32
    %c0_i32_1 = arith.constant 0 : i32
    %c0_i32_2 = arith.constant 0 : i32
    return %c0_i32, %c0_i32_0, %c0_i32_1 : i32, i32, i32
  }
  func.func @transform_7(%arg0: i32, %arg1: i32) -> (i32, i32, i32) {
    %c0_i32 = arith.constant 0 : i32
    %c0_i32_0 = arith.constant 0 : i32
    %c0_i32_1 = arith.constant 0 : i32
    %c0_i32_2 = arith.constant 0 : i32
    return %c0_i32, %c0_i32_0, %c0_i32_1 : i32, i32, i32
  }
  func.func @transform_8(%arg0: i32, %arg1: i32) -> (i32, i32, i32) {
    %c0_i32 = arith.constant 0 : i32
    %c0_i32_0 = arith.constant 0 : i32
    %c0_i32_1 = arith.constant 0 : i32
    %c0_i32_2 = arith.constant 0 : i32
    return %c0_i32, %c0_i32_0, %c0_i32_1 : i32, i32, i32
  }
  func.func @transform_9(%arg0: i32, %arg1: i32) -> (i32, i32, i32) {
    %c0_i32 = arith.constant 0 : i32
    %c0_i32_0 = arith.constant 0 : i32
    %c0_i32_1 = arith.constant 0 : i32
    %c0_i32_2 = arith.constant 0 : i32
    return %c0_i32, %c0_i32_0, %c0_i32_1 : i32, i32, i32
  }
  func.func @transform_10(%arg0: i32, %arg1: i32) -> (i32, i32, i32) {
    %c0_i32 = arith.constant 0 : i32
    %c0_i32_0 = arith.constant 0 : i32
    %c0_i32_1 = arith.constant 0 : i32
    %c0_i32_2 = arith.constant 0 : i32
    return %c0_i32, %c0_i32_0, %c0_i32_1 : i32, i32, i32
  }
  func.func @transform_11(%arg0: i32, %arg1: i32) -> (i32, i32, i32) {
    %c0_i32 = arith.constant 0 : i32
    %c0_i32_0 = arith.constant 0 : i32
    %c0_i32_1 = arith.constant 0 : i32
    %c0_i32_2 = arith.constant 0 : i32
    return %c0_i32, %c0_i32_0, %c0_i32_1 : i32, i32, i32
  }
  func.func @transform_12(%arg0: i32, %arg1: i32) -> (i32, i32, i32) {
    %c0_i32 = arith.constant 0 : i32
    %c0_i32_0 = arith.constant 0 : i32
    %c0_i32_1 = arith.constant 0 : i32
    %c0_i32_2 = arith.constant 0 : i32
    return %c0_i32, %c0_i32_0, %c0_i32_1 : i32, i32, i32
  }
  func.func @transform_13(%arg0: i32, %arg1: i32) -> (i32, i32) {
    %c0_i32 = arith.constant 0 : i32
    %c0_i32_0 = arith.constant 0 : i32
    %c0_i32_1 = arith.constant 0 : i32
    return %c0_i32, %c0_i32_0 : i32, i32
  }
  func.func @transform_14(%arg0: i32, %arg1: i32) -> (i32, i32) {
    %c0_i32 = arith.constant 0 : i32
    %c0_i32_0 = arith.constant 0 : i32
    %c0_i32_1 = arith.constant 0 : i32
    return %c0_i32, %c0_i32_0 : i32, i32
  }
  func.func @transform_15(%arg0: i32, %arg1: i32) -> (i32, i32) {
    %c0_i32 = arith.constant 0 : i32
    %c0_i32_0 = arith.constant 0 : i32
    %c0_i32_1 = arith.constant 0 : i32
    return %c0_i32, %c0_i32_0 : i32, i32
  }
  func.func @transform_16(%arg0: i32, %arg1: i32) -> (i32, i32) {
    %c0_i32 = arith.constant 0 : i32
    %c0_i32_0 = arith.constant 0 : i32
    %c0_i32_1 = arith.constant 0 : i32
    return %c0_i32, %c0_i32_0 : i32, i32
  }
  func.func @transform_17(%arg0: i32, %arg1: i32) -> (i32, i32, i32) {
    %c0_i32 = arith.constant 0 : i32
    %c0_i32_0 = arith.constant 0 : i32
    %c0_i32_1 = arith.constant 0 : i32
    return %arg0, %c0_i32, %c0_i32_0 : i32, i32, i32
  }
}

</mosaic_0001>

<bundles_post_ra>
// kernel: tpu_custom_call.1
= control target key start
LH: loop header
LB: loop body
LE: loop exit
PB: predicated region body
PF: predicated region fallthrough
CT: control target
= control target key end

     0   :  { %s8350_s26 = smov 0   ;;  %s8352_s27 = smov 0   ;;  %s10044_s0 = inlined_call_operand.vmem [shape: f32[2,64,2], index: 0, kind: input, shape index: {}]   ;;  %s10045_s1 = inlined_call_operand.vmem [shape: bf16[2,64,32], index: 1, kind: input, shape index: {}]   ;;  %s10046_s2 = inlined_call_operand.vmem [shape: f32[2,2,1,32], index: 2, kind: input, shape index: {}]   ;;  %s10047_s3 = inlined_call_operand.vmem [shape: f32[1,32], index: 3, kind: input, shape index: {}]   ;;  %s10048_s4 = inlined_call_operand.vmem [shape: f32[1,32], index: 4, kind: input, shape index: {}]   ;;  %s10049_s5 = inlined_call_operand.vmem [shape: bf16[2,32,96], index: 5, kind: input, shape index: {}]   ;;  %s10050_s6 = inlined_call_operand.vmem [shape: bf16[2,32,32], index: 6, kind: input, shape index: {}]   ;;  %s10051_s7 = inlined_call_operand.vmem [shape: bf16[2,32,96], index: 7, kind: input, shape index: {}]   ;;  %s10052_s8 = inlined_call_operand.vmem [shape: bf16[2,32,32], index: 8, kind: input, shape index: {}]   ;;  %s10053_s9 = inlined_call_operand.vmem [shape: bf16[2,64,64], index: 9, kind: input, shape index: {}]   ;;  %s10054_s10 = inlined_call_operand.vmem [shape: f32[2,1,64], index: 10, kind: input, shape index: {}]   ;;  %s10055_s11 = inlined_call_operand.vmem [shape: bf16[2,32,64], index: 11, kind: input, shape index: {}]   ;;  %s10056_s12 = inlined_call_operand.vmem [shape: f32[2,1,64], index: 12, kind: input, shape index: {}]   ;;  %s10057_s13 = inlined_call_operand.vmem [shape: bf16[32,32], index: 13, kind: input, shape index: {}]   ;;  %s10058_s14 = inlined_call_operand.vmem [shape: f32[1,32], index: 14, kind: input, shape index: {}]   ;;  %s10059_s15 = inlined_call_operand.vmem [shape: bf16[32,1], index: 15, kind: input, shape index: {}]   ;;  %s10060_s16 = inlined_call_operand.<no memory space> [shape: f32[1,1], index: 16, kind: input, shape index: {}]   ;;  %s10061_s17 = inlined_call_operand.vmem [shape: f32[2,1,1], index: 17, kind: output, shape index: {}]  }
   0x1   :  { %10065 = sst [smem:[#allocation6_spill]] %s10044_s0  ;;  %v22_v0 = vstv %s10060_s16  ;;  %s8354_s28 = smov 0  }
   0x2   :  { %10066 = sst [smem:[#allocation7_spill]] %s10045_s1  ;;  %23 = vst [vmem:[#allocation5] sm:$0x1] %v22_v0 }
   0x3 LB: > { %s38_s16 = sadd.s32 1, %s8240_s27  ;;  %p6957_p0 = scmp.ge.s32.totalorder %s8244_s28, 1  ;;  %s8244_s28 = sphi %s8354_s28, %s29_s28   ;;  %s8240_s27 = sphi %s8352_s27, %s10071_s27   ;;  %s8236_s26 = sphi %s8350_s26, %s10070_s26  }
   0x4   : > { %p39_p1 = scmp.ge.s32.totalorder %s38_s16, 2  ;;  %p525_p2 = scmp.lt.s32.totalorder %s8244_s28, 3 }
   0x6   : > { %s10073_s16 = smov (%p39_p1, %s38_s16), 0  ;;  %p526_p3 = pnand %p6957_p0, %p525_p2 }
   0x7   : > { %p6958_p4 = scmp.ne.s32.totalorder (!%p526_p3), %s8236_s26, 0 }
   0x8   : > { %529 = sbr.rel (%p526_p3) target bundleno = 4486 (0x1186), region = 88 }
   0xf   : > { %615 = sbr.rel (%p6958_p4) target bundleno = 195 (0xc3), region = 92  ;;  %s10067_s30 = sld [smem:[#allocation6_spill]] (!%p6958_p4)  ;;  %v8246_v3 = vmov (!%p6958_p4), 0   ;;  %vm774_vm0 = vcmask (!%p6958_p4), 261120   ;;  %v8247_v4 = vmov (!%p6958_p4), 0.0   ;;  %vm887_vm1 = vcmask (!%p6958_p4), 523520  }
  0x10   : > { %7955 = vset.pattern.permute.xlu1 (!%p6958_p4), %v8246_v3  ;;  %7954 = vset.pattern.permute.xlu0 (!%p6958_p4), %v8246_v3  ;;  %791 = vst.msk [vmem:[#allocation3] sm:$0xff] (!%p6958_p4), %vm774_vm0, %v8247_v4  ;;  %792 = vst.msk [vmem:[#allocation3 + $0x8] sm:$0xff] (!%p6958_p4), %vm774_vm0, %v8247_v4  ;;  %s10068_s0 = sld [smem:[#allocation7_spill]] (!%p6958_p4)  ;;  %s8248_s1 = smov (!%p6958_p4), 32   ;;  %v8462_v27 = vld [vmem:[%s10047_s3] ss:$0 sm:$0xff] (!%p6958_p4) }
  0x11   : > { %793 = vst.msk [vmem:[#allocation3 + $0x10] sm:$0xff] (!%p6958_p4), %vm774_vm0, %v8247_v4  ;;  %794 = vst.msk [vmem:[#allocation3 + $0x18] sm:$0xff] (!%p6958_p4), %vm774_vm0, %v8247_v4  ;;  %v8467_v28 = vld [vmem:[%s10048_s4] ss:$0 sm:$0xff] (!%p6958_p4) }
  0x12   : > { %795 = vst.msk [vmem:[#allocation3 + $0x20] sm:$0xff] (!%p6958_p4), %vm774_vm0, %v8247_v4  ;;  %796 = vst.msk [vmem:[#allocation3 + $0x28] sm:$0xff] (!%p6958_p4), %vm774_vm0, %v8247_v4 }
  0x13   : > { %797 = vst.msk [vmem:[#allocation3 + $0x30] sm:$0xff] (!%p6958_p4), %vm774_vm0, %v8247_v4  ;;  %798 = vst.msk [vmem:[#allocation3 + $0x38] sm:$0xff] (!%p6958_p4), %vm774_vm0, %v8247_v4 }
  0x14   : > { %799 = vst.msk [vmem:[#allocation3 + $0x40] sm:$0xff] (!%p6958_p4), %vm774_vm0, %v8247_v4  ;;  %800 = vst.msk [vmem:[#allocation3 + $0x48] sm:$0xff] (!%p6958_p4), %vm774_vm0, %v8247_v4 }
  0x15   : > { %v618_v1 = vld [vmem:[%s10067_s30 + $0x10] sm:$0xff] (!%p6958_p4)  ;;  %v616_v2 = vld [vmem:[%s10067_s30] sm:$0xff] (!%p6958_p4)  ;;  %801 = vst.msk [vmem:[#allocation3 + $0x50] sm:$0xff] (!%p6958_p4), %vm774_vm0, %v8247_v4  ;;  %802 = vst.msk [vmem:[#allocation3 + $0x58] sm:$0xff] (!%p6958_p4), %vm774_vm0, %v8247_v4 }
  0x16   : > { %645 = vperm.xlu1 %7955, %v618_v1   ;;  %635 = vperm.xlu0 %7954, %v616_v2   ;;  %803 = vst.msk [vmem:[#allocation3 + $0x60] sm:$0xff] %vm774_vm0, %v8247_v4  ;;  %804 = vst.msk [vmem:[#allocation3 + $0x68] sm:$0xff] %vm774_vm0, %v8247_v4  ;;  %v619_v5 = vld [vmem:[%s10067_s30 + $0x18] sm:$0xff]  ;;  %v617_v6 = vld [vmem:[%s10067_s30 + $0x8] sm:$0xff] }
  0x17   : > { %805 = vst.msk [vmem:[#allocation3 + $0x70] sm:$0xff] %vm774_vm0, %v8247_v4  ;;  %806 = vst.msk [vmem:[#allocation3 + $0x78] sm:$0xff] %vm774_vm0, %v8247_v4  ;;  %v621_v7 = vld [vmem:[%s10067_s30 + $0x28] sm:$0xff]  ;;  %v620_v8 = vld [vmem:[%s10067_s30 + $0x20] sm:$0xff] }
  0x18   : > { %v623_v9 = vld [vmem:[%s10067_s30 + $0x38] sm:$0xff]  ;;  %v622_v10 = vld [vmem:[%s10067_s30 + $0x30] sm:$0xff]  ;;  %v625_v11 = vld [vmem:[%s10067_s30 + $0x48] sm:$0xff] }
  0x19   : > { %v624_v12 = vld [vmem:[%s10067_s30 + $0x40] sm:$0xff]  ;;  %v627_v13 = vld [vmem:[%s10067_s30 + $0x58] sm:$0xff]  ;;  %v626_v14 = vld [vmem:[%s10067_s30 + $0x50] sm:$0xff] }
  0x1a   : > { %650 = vperm.xlu1 %7955, %v619_v5   ;;  %640 = vperm.xlu0 %7954, %v617_v6   ;;  %v629_v15 = vld [vmem:[%s10067_s30 + $0x68] sm:$0xff]  ;;  %v628_v16 = vld [vmem:[%s10067_s30 + $0x60] sm:$0xff]  ;;  %v631_v17 = vld [vmem:[%s10067_s30 + $0x78] sm:$0xff] }
  0x1b   : > { %v630_v18 = vld [vmem:[%s10067_s30 + $0x70] sm:$0xff]  ;;  %v7956_v19 = vld [vmem:[%s10068_s0 + $0x8] sm:$0xff]   ;;  %v7957_v20 = vld [vmem:[%s10068_s0] sm:$0xff]  }
  0x1c   : > { %v7958_v21 = vld [vmem:[%s10068_s0 + $0x18] sm:$0xff]   ;;  %v7959_v22 = vld [vmem:[%s10068_s0 + $0x10] sm:$0xff]   ;;  %v7960_v23 = vld [vmem:[%s10068_s0 + $0x28] sm:$0xff]  }
  0x1d   : > { %v7961_v24 = vld [vmem:[%s10068_s0 + $0x20] sm:$0xff]   ;;  %v7962_v25 = vld [vmem:[%s10068_s0 + $0x38] sm:$0xff]   ;;  %v7963_v26 = vld [vmem:[%s10068_s0 + $0x30] sm:$0xff]  }
  0x1e   : > { %660 = vperm.xlu1 %7955, %v621_v7   ;;  %655 = vperm.xlu0 %7954, %v620_v8  }
  0x22   : > { %670 = vperm.xlu1 %7955, %v623_v9   ;;  %665 = vperm.xlu0 %7954, %v622_v10  }
  0x26   : > { %680 = vperm.xlu1 %7955, %v625_v11   ;;  %675 = vperm.xlu0 %7954, %v624_v12  }
  0x2a   : > { %690 = vperm.xlu1 %7955, %v627_v13   ;;  %685 = vperm.xlu0 %7954, %v626_v14  }
  0x2e   : > { %700 = vperm.xlu1 %7955, %v629_v15   ;;  %695 = vperm.xlu0 %7954, %v628_v16  }
  0x32   : > { %710 = vperm.xlu1 %7955, %v631_v17   ;;  %705 = vperm.xlu0 %7954, %v630_v18  }
  0x36   : > { %865 = vrot.lane.b32.xlu1 %v7956_v19, %s8248_s1  ;;  %863 = vrot.lane.b32.xlu0 %v7957_v20, %s8248_s1 }
  0x3a   : > { %869 = vrot.lane.b32.xlu1 %v7958_v21, %s8248_s1  ;;  %867 = vrot.lane.b32.xlu0 %v7959_v22, %s8248_s1 }
  0x3e   : > { %873 = vrot.lane.b32.xlu1 %v7960_v23, %s8248_s1  ;;  %871 = vrot.lane.b32.xlu0 %v7961_v24, %s8248_s1 }
  0x42   : > { %877 = vrot.lane.b32.xlu1 %v7962_v25, %s8248_s1  ;;  %875 = vrot.lane.b32.xlu0 %v7963_v26, %s8248_s1 }
  0x95   : > { %v646_v29 = vpop.permute.xlu1 %645  ;;  %v636_v30 = vpop.permute.xlu0 %635 }
  0x96   : > { %v721_v31 = vmul.f32 %v8462_v27, %v646_v29  ;;  %v719_v32 = vmul.f32 %v8462_v27, %v636_v30 }
  0x98   : > { %v744_v33 = vadd.f32 %v8467_v28, %v721_v31  ;;  %v742_v34 = vadd.f32 %v8467_v28, %v719_v32 }
  0x99   : > { %v651_v35 = vpop.permute.xlu1 %650  ;;  %v641_v36 = vpop.permute.xlu0 %640 }
  0x9a   : > { %v760_v37 = vmax.f32 %v744_v33, 0.0  ;;  %v758_v38 = vmax.f32 %v742_v34, 0.0  ;;  %v722_v39 = vmul.f32 %v8462_v27, %v651_v35  ;;  %v720_v40 = vmul.f32 %v8462_v27, %v641_v36 }
  0x9c   : > { %777 = vst.msk [vmem:[#allocation2 + $0x10] sm:$0xff] %vm774_vm0, %v760_v37  ;;  %775 = vst.msk [vmem:[#allocation2] sm:$0xff] %vm774_vm0, %v758_v38  ;;  %v745_v41 = vadd.f32 %v8467_v28, %v722_v39  ;;  %v743_v42 = vadd.f32 %v8467_v28, %v720_v40 }
  0x9d   : > { %v661_v43 = vpop.permute.xlu1 %660  ;;  %v656_v44 = vpop.permute.xlu0 %655 }
  0x9e   : > { %v761_v45 = vmax.f32 %v745_v41, 0.0  ;;  %v759_v46 = vmax.f32 %v743_v42, 0.0  ;;  %v724_v47 = vmul.f32 %v8462_v27, %v661_v43  ;;  %v723_v48 = vmul.f32 %v8462_v27, %v656_v44 }
  0xa0   : > { %778 = vst.msk [vmem:[#allocation2 + $0x18] sm:$0xff] %vm774_vm0, %v761_v45  ;;  %776 = vst.msk [vmem:[#allocation2 + $0x8] sm:$0xff] %vm774_vm0, %v759_v46  ;;  %v747_v49 = vadd.f32 %v8467_v28, %v724_v47  ;;  %v746_v50 = vadd.f32 %v8467_v28, %v723_v48 }
  0xa1   : > { %v671_v51 = vpop.permute.xlu1 %670  ;;  %v666_v52 = vpop.permute.xlu0 %665 }
  0xa2   : > { %v763_v53 = vmax.f32 %v747_v49, 0.0  ;;  %v762_v54 = vmax.f32 %v746_v50, 0.0  ;;  %v726_v55 = vmul.f32 %v8462_v27, %v671_v51  ;;  %v725_v56 = vmul.f32 %v8462_v27, %v666_v52 }
  0xa4   : > { %780 = vst.msk [vmem:[#allocation2 + $0x28] sm:$0xff] %vm774_vm0, %v763_v53  ;;  %779 = vst.msk [vmem:[#allocation2 + $0x20] sm:$0xff] %vm774_vm0, %v762_v54  ;;  %v749_v57 = vadd.f32 %v8467_v28, %v726_v55  ;;  %v748_v58 = vadd.f32 %v8467_v28, %v725_v56 }
  0xa5   : > { %v681_v59 = vpop.permute.xlu1 %680  ;;  %v676_v60 = vpop.permute.xlu0 %675 }
  0xa6   : > { %v765_v61 = vmax.f32 %v749_v57, 0.0  ;;  %v764_v62 = vmax.f32 %v748_v58, 0.0  ;;  %v728_v63 = vmul.f32 %v8462_v27, %v681_v59  ;;  %v727_v0 = vmul.f32 %v8462_v27, %v676_v60 }
  0xa8   : > { %782 = vst.msk [vmem:[#allocation2 + $0x38] sm:$0xff] %vm774_vm0, %v765_v61  ;;  %781 = vst.msk [vmem:[#allocation2 + $0x30] sm:$0xff] %vm774_vm0, %v764_v62  ;;  %v751_v1 = vadd.f32 %v8467_v28, %v728_v63  ;;  %v750_v2 = vadd.f32 %v8467_v28, %v727_v0 }
  0xa9   : > { %v691_v3 = vpop.permute.xlu1 %690  ;;  %v686_v4 = vpop.permute.xlu0 %685 }
  0xaa   : > { %v767_v5 = vmax.f32 %v751_v1, 0.0  ;;  %v766_v6 = vmax.f32 %v750_v2, 0.0  ;;  %v730_v7 = vmul.f32 %v8462_v27, %v691_v3  ;;  %v729_v8 = vmul.f32 %v8462_v27, %v686_v4 }
  0xac   : > { %784 = vst.msk [vmem:[#allocation2 + $0x48] sm:$0xff] %vm774_vm0, %v767_v5  ;;  %783 = vst.msk [vmem:[#allocation2 + $0x40] sm:$0xff] %vm774_vm0, %v766_v6  ;;  %v753_v9 = vadd.f32 %v8467_v28, %v730_v7  ;;  %v752_v10 = vadd.f32 %v8467_v28, %v729_v8 }
  0xad   : > { %v701_v11 = vpop.permute.xlu1 %700  ;;  %v696_v12 = vpop.permute.xlu0 %695 }
  0xae   : > { %v769_v13 = vmax.f32 %v753_v9, 0.0  ;;  %v768_v14 = vmax.f32 %v752_v10, 0.0  ;;  %v732_v15 = vmul.f32 %v8462_v27, %v701_v11  ;;  %v731_v16 = vmul.f32 %v8462_v27, %v696_v12 }
  0xb0   : > { %786 = vst.msk [vmem:[#allocation2 + $0x58] sm:$0xff] %vm774_vm0, %v769_v13  ;;  %785 = vst.msk [vmem:[#allocation2 + $0x50] sm:$0xff] %vm774_vm0, %v768_v14  ;;  %v755_v17 = vadd.f32 %v8467_v28, %v732_v15  ;;  %v754_v18 = vadd.f32 %v8467_v28, %v731_v16 }
  0xb1   : > { %v711_v19 = vpop.permute.xlu1 %710  ;;  %v706_v20 = vpop.permute.xlu0 %705 }
  0xb2   : > { %v771_v21 = vmax.f32 %v755_v17, 0.0  ;;  %v770_v22 = vmax.f32 %v754_v18, 0.0  ;;  %v734_v23 = vmul.f32 %v8462_v27, %v711_v19  ;;  %v733_v24 = vmul.f32 %v8462_v27, %v706_v20 }
  0xb4   : > { %788 = vst.msk [vmem:[#allocation2 + $0x68] sm:$0xff] %vm774_vm0, %v771_v21  ;;  %787 = vst.msk [vmem:[#allocation2 + $0x60] sm:$0xff] %vm774_vm0, %v770_v22  ;;  %v757_v25 = vadd.f32 %v8467_v28, %v734_v23  ;;  %v756_v26 = vadd.f32 %v8467_v28, %v733_v24 }
  0xb5   : > { %v866_v29 = vpop.permute.xlu1 %865  ;;  %v864_v30 = vpop.permute.xlu0 %863 }
  0xb6   : > { %v773_v31 = vmax.f32 %v757_v25, 0.0  ;;  %v772_v32 = vmax.f32 %v756_v26, 0.0  ;;  %889 = vst.msk [vmem:[#allocation4 + $0x8] sm:$0xff] %vm887_vm1, %v866_v29  ;;  %888 = vst.msk [vmem:[#allocation4] sm:$0xff] %vm887_vm1, %v864_v30 }
  0xb8   : > { %790 = vst.msk [vmem:[#allocation2 + $0x78] sm:$0xff] %vm774_vm0, %v773_v31  ;;  %789 = vst.msk [vmem:[#allocation2 + $0x70] sm:$0xff] %vm774_vm0, %v772_v32 }
  0xb9   : > { %v870_v27 = vpop.permute.xlu1 %869  ;;  %v868_v33 = vpop.permute.xlu0 %867 }
  0xba   : > { %891 = vst.msk [vmem:[#allocation4 + $0x18] sm:$0xff] %vm887_vm1, %v870_v27  ;;  %890 = vst.msk [vmem:[#allocation4 + $0x10] sm:$0xff] %vm887_vm1, %v868_v33 }
  0xbd   : > { %v874_v34 = vpop.permute.xlu1 %873  ;;  %v872_v28 = vpop.permute.xlu0 %871 }
  0xbe   : > { %893 = vst.msk [vmem:[#allocation4 + $0x28] sm:$0xff] %vm887_vm1, %v874_v34  ;;  %892 = vst.msk [vmem:[#allocation4 + $0x20] sm:$0xff] %vm887_vm1, %v872_v28 }
  0xc1   : > { %v878_v35 = vpop.permute.xlu1 %877  ;;  %v876_v36 = vpop.permute.xlu0 %875 }
  0xc2   : > { %895 = vst.msk [vmem:[#allocation4 + $0x38] sm:$0xff] %vm887_vm1, %v878_v35  ;;  %894 = vst.msk [vmem:[#allocation4 + $0x30] sm:$0xff] %vm887_vm1, %v876_v36 }
  0xc3 PF: > { %s8526_s1 = sshll.u32 %s8236_s26, 4  ;;  %v896_v37 = vld [vmem:[#allocation2] sm:$0xff]  ;;  %v897_v38 = vld [vmem:[#allocation2 + $0x8] sm:$0xff]  ;;  %s6969_s25 = sshll.u32 %s8236_s26, 1  ;;  %v898_v39 = vld [vmem:[#allocation2 + $0x10] sm:$0xff]  ;;  %vm989_vm2 = vcmask 261120  }
  0xc4   : > { %s946_s19 = scalar_lea.vmem %s10049_s5, %s8526_s1  ;;  %s913_s22 = scalar_lea.vmem %s10046_s2, %s6969_s25  ;;  %v899_v40 = vld [vmem:[#allocation2 + $0x18] sm:$0xff]  ;;  %v900_v41 = vld [vmem:[#allocation2 + $0x20] sm:$0xff]  ;;  %v901_v42 = vld [vmem:[#allocation2 + $0x28] sm:$0xff]  ;;  %v8249_v17 = vmov 0.0   ;;  %vm8250_vm3 = vmmov 0   ;;  %vm2109_vm4 = vcmask 1043456  }
  0xc5   : > { %v7964_v43 = vld [vmem:[%s946_s19] sm:$0xff]   ;;  %v7965_v44 = vld [vmem:[%s946_s19 + $0x8] sm:$0xff]   ;;  %v902_v55 = vld [vmem:[#allocation2 + $0x30] sm:$0xff]  ;;  %7387 = vmatprep.subr.bf16.mxu1 %v8249_v17  ;;  %7389 = vmatprep.mubr.msk.bf16.mxu1 %vm8250_vm3, %v8249_v17  ;;  %s8251_s23 = smov 96   ;;  %s8252_s30 = smov 64   ;;  %vm1911_vm5 = vcmask 64512  }
  0xc6   : > { %7367 = vmatprep.subr.bf16.mxu0 %v7964_v43  ;;  %v6970_v45 = vld [vmem:[%s913_s22] ss:$0 sm:$0xff]  ;;  %v903_v56 = vld [vmem:[#allocation2 + $0x38] sm:$0xff]  ;;  %v6971_v57 = vld [vmem:[%s913_s22 + $0x1] ss:$0 sm:$0xff]  ;;  %s952_s29 = scalar_lea.vmem %s10050_s6, %s8526_s1  ;;  %s958_s20 = scalar_lea.vmem %s10051_s7, %s8526_s1  ;;  %vm5699_vm6 = vcmask 523264  }
  0xc7   : > { %7368 = vmatpush3.bf16.msra.mxu0 %v7964_v43  ;;  %v8536_v46 = vadd.f32 %v6970_v45, %v896_v37  ;;  %v8538_v47 = vadd.f32 %v6970_v45, %v897_v38  ;;  %v8540_v48 = vadd.f32 %v6970_v45, %v898_v39  ;;  %v8542_v49 = vadd.f32 %v6970_v45, %v899_v40  ;;  %v904_v58 = vld [vmem:[#allocation2 + $0x40] sm:$0xff]  ;;  %v905_v59 = vld [vmem:[#allocation2 + $0x48] sm:$0xff]  ;;  %v906_v2 = vld [vmem:[#allocation2 + $0x50] sm:$0xff]  ;;  %s7155_s24 = sshll.u32 %s8236_s26, 5  ;;  %s5667_s21 = scalar_lea.vmem %s10054_s10, %s8236_s26 }
  0xc8   : > { %7369 = vmatprep.subr.bf16.mxu0 %v7965_v44  ;;  %v8544_v50 = vadd.f32 %v6970_v45, %v900_v41  ;;  %v8546_v51 = vadd.f32 %v6970_v45, %v901_v42  ;;  %v8556_v60 = vadd.f32 %v6970_v45, %v902_v55  ;;  %v8558_v61 = vadd.f32 %v6970_v45, %v903_v56  ;;  %v907_v3 = vld [vmem:[#allocation2 + $0x58] sm:$0xff]  ;;  %v908_v4 = vld [vmem:[#allocation2 + $0x60] sm:$0xff]  ;;  %v909_v5 = vld [vmem:[#allocation2 + $0x68] sm:$0xff]  ;;  %s5658_s18 = scalar_lea.vmem %s10053_s9, %s7155_s24  ;;  %s6022_s24 = scalar_lea.vmem %s10055_s11, %s8526_s1 }
  0xc9   : > { %v969_v52 = vpack.c.bf16 %v8538_v47, %v8536_v46  ;;  %v970_v53 = vpack.c.bf16 %v8542_v49, %v8540_v48  ;;  %v8561_v62 = vadd.f32 %v6971_v57, %v904_v58  ;;  %v8563_v63 = vadd.f32 %v6971_v57, %v905_v59  ;;  %v910_v12 = vld [vmem:[#allocation2 + $0x70] sm:$0xff]  ;;  %v911_v13 = vld [vmem:[#allocation2 + $0x78] sm:$0xff]  ;;  %p7124_p5 = scmp.ne.s32.totalorder %s8236_s26, 1 }
  0xca   : > { %v971_v54 = vpack.c.bf16 %v8546_v51, %v8544_v50  ;;  %v972_v0 = vpack.c.bf16 %v8558_v61, %v8556_v60  ;;  %v8570_v6 = vadd.f32 %v6971_v57, %v906_v2  ;;  %v8572_v7 = vadd.f32 %v6971_v57, %v907_v3  ;;  %s8255_s25 = smov (!%p7124_p5), 1  }
  0xcb   : > { %7370 = vmatpush3.bf16.msra.mxu0 %v7965_v44  ;;  %7371 = vmatprep.mubr.msk.bf16.mxu0 %vm989_vm2, %v969_v52  ;;  %v973_v1 = vpack.c.bf16 %v8563_v63, %v8561_v62  ;;  %v8575_v8 = vadd.f32 %v6971_v57, %v908_v4  ;;  %v8577_v9 = vadd.f32 %v6971_v57, %v909_v5  ;;  %vm6796_vm7 = vcmask (!%p7124_p5), 15368  }
  0xcc   : > { %v974_v10 = vpack.c.bf16 %v8572_v7, %v8570_v6  ;;  %v8584_v14 = vadd.f32 %v6971_v57, %v910_v12  ;;  %v8586_v15 = vadd.f32 %v6971_v57, %v911_v13  ;;  %7411 = vmatprep.subr.bf16.mxu0 %v8249_v17  ;;  %vm6847_vm8 = vcmask (!%p7124_p5), 0  }
  0xcd   : > { %v975_v11 = vpack.c.bf16 %v8577_v9, %v8575_v8 }
  0xce   : > { %7372 = vmatmul.mubr.msk.bf16.vlgmr.msra.gmra.mrb[0].mxu0 %vm989_vm2, %v970_v53  ;;  %v976_v16 = vpack.c.bf16 %v8586_v15, %v8584_v14 }
  0xcf   : > { %7375 = vmatprep.mubr.msk.bf16.mxu0 %vm989_vm2, %v971_v54 }
  0xd6   : > { %7376 = vmatmul.mubr.msk.bf16.gmra.mrb[4].mxu0 %vm989_vm2, %v972_v0 }
  0xd7   : > { %7379 = vmatprep.mubr.msk.bf16.mxu0 %vm989_vm2, %v973_v1 }
  0xde   : > { %7380 = vmatmul.mubr.msk.bf16.gmra.mrb[8].mxu0 %vm989_vm2, %v974_v10 }
  0xdf   : > { %7383 = vmatprep.mubr.msk.bf16.mxu0 %vm989_vm2, %v975_v11 }
  0xe6   : > { %7384 = vmatmul.mubr.msk.bf16.gmra.mrb[12].mxu0 %vm989_vm2, %v976_v16 }
  0xe7   : > { %7413 = vmatprep.mubr.msk.bf16.mxu0 %vm8250_vm3, %v8249_v17 }
 0x1a1   : > { %v7373_v18 = vpop.f32.mrb[0].mxu0 }
 0x1a2   : > { %v8598_v19 = vpack.c.bf16 %v7373_v18, %v7373_v18  ;;  %v1048_v20 = vpop.f32.mrb[1].mxu0 }
 0x1a3   : > { %v8600_v21 = vpack.c.bf16 %v1048_v20, %v1048_v20  ;;  %v7374_v22 = vpop.f32.mrb[2].mxu0 }
 0x1a4   : > { %1226 = vrot.lane.b32.xlu1 %v8598_v19, %s8251_s23  ;;  %v1051_v23 = vpop.f32.mrb[3].mxu0  ;;  %v8606_v24 = vpack.c.bf16 %v7374_v22, %v7374_v22 }
 0x1a5   : > { %1128 = vrot.lane.b32.xlu0 %v8600_v21, %s8251_s23  ;;  %v8608_v25 = vpack.c.bf16 %v1051_v23, %v1051_v23 }
 0x1a8   : > { %1275 = vrot.lane.b32.xlu1 %v8606_v24, %s8251_s23 }
 0x1a9   : > { %1177 = vrot.lane.b32.xlu0 %v8608_v25, %s8251_s23  ;;  %v7377_v26 = vpop.f32.mrb[4].mxu0 }
 0x1aa   : > { %v1064_v29 = vpop.f32.mrb[5].mxu0  ;;  %v8616_v27 = vpack.c.bf16 %v7377_v26, %v7377_v26 }
 0x1ab   : > { %v8614_v30 = vpack.c.bf16 %v1064_v29, %v1064_v29  ;;  %v7378_v31 = vpop.f32.mrb[6].mxu0 }
 0x1ac   : > { %v1067_v32 = vpop.f32.mrb[7].mxu0  ;;  %v8622_v34 = vpack.c.bf16 %v7378_v31, %v7378_v31 }
 0x1ad   : > { %v8618_v33 = vpack.c.bf16 %v1067_v32, %v1067_v32  ;;  %1324 = vrot.lane.b32.xlu0 %v8614_v30, %s8251_s23 }
 0x1af   : > { %1373 = vrot.lane.b32.xlu1 %v8618_v33, %s8251_s23 }
 0x1b1   : > { %1422 = vrot.lane.b32.xlu0 %v8616_v27, %s8251_s23  ;;  %v7381_v28 = vpop.f32.mrb[8].mxu0 }
 0x1b2   : > { %v1080_v35 = vpop.f32.mrb[9].mxu0  ;;  %v8632_v39 = vpack.c.bf16 %v7381_v28, %v7381_v28 }
 0x1b3   : > { %v8628_v36 = vpack.c.bf16 %v1080_v35, %v1080_v35  ;;  %1471 = vrot.lane.b32.xlu1 %v8622_v34, %s8251_s23  ;;  %v7382_v37 = vpop.f32.mrb[10].mxu0 }
 0x1b4   : > { %v1083_v38 = vpop.f32.mrb[11].mxu0  ;;  %v8638_v41 = vpack.c.bf16 %v7382_v37, %v7382_v37 }
 0x1b5   : > { %v8634_v40 = vpack.c.bf16 %v1083_v38, %v1083_v38  ;;  %1520 = vrot.lane.b32.xlu0 %v8628_v36, %s8251_s23 }
 0x1b7   : > { %1569 = vrot.lane.b32.xlu1 %v8634_v40, %s8251_s23 }
 0x1b9   : > { %1618 = vrot.lane.b32.xlu0 %v8632_v39, %s8251_s23  ;;  %v7385_v42 = vpop.f32.mrb[12].mxu0 }
 0x1ba   : > { %v1096_v43 = vpop.f32.mrb[13].mxu0  ;;  %v8648_v53 = vpack.c.bf16 %v7385_v42, %v7385_v42 }
 0x1bb   : > { %v8644_v44 = vpack.c.bf16 %v1096_v43, %v1096_v43  ;;  %1667 = vrot.lane.b32.xlu1 %v8638_v41, %s8251_s23  ;;  %v7386_v45 = vpop.f32.mrb[14].mxu0 }
 0x1bc   : > { %v1099_v52 = vpop.f32.mrb[15].mxu0  ;;  %v8654_v55 = vpack.c.bf16 %v7386_v45, %v7386_v45 }
 0x1bd   : > { %v8650_v54 = vpack.c.bf16 %v1099_v52, %v1099_v52  ;;  %1716 = vrot.lane.b32.xlu0 %v8644_v44, %s8251_s23 }
 0x1bf   : > { %1765 = vrot.lane.b32.xlu1 %v8650_v54, %s8251_s23 }
 0x1c1   : > { %1814 = vrot.lane.b32.xlu0 %v8648_v53, %s8251_s23 }
 0x1c3   : > { %1863 = vrot.lane.b32.xlu1 %v8654_v55, %s8251_s23 }
 0x1c5   : > { %2153 = vrot.lane.b32.xlu0 %v8608_v25, %s8252_s30 }
 0x1c7   : > { %2104 = vrot.lane.b32.xlu1 %v8600_v21, %s8252_s30 }
 0x1c9   : > { %2249 = vrot.lane.b32.xlu0 %v8606_v24, %s8252_s30 }
 0x1cb   : > { %2201 = vrot.lane.b32.xlu1 %v8598_v19, %s8252_s30 }
 0x1cd   : > { %2345 = vrot.lane.b32.xlu0 %v8618_v33, %s8252_s30 }
 0x1cf   : > { %2297 = vrot.lane.b32.xlu1 %v8614_v30, %s8252_s30 }
 0x1d1   : > { %2441 = vrot.lane.b32.xlu0 %v8622_v34, %s8252_s30 }
 0x1d3   : > { %2393 = vrot.lane.b32.xlu1 %v8616_v27, %s8252_s30 }
 0x1d7   : > { %2489 = vrot.lane.b32.xlu1 %v8628_v36, %s8252_s30 }
 0x216   : > { %v1227_v59 = vpop.permute.xlu1 %1226 }
 0x217   : > { %v1129_v56 = vpop.permute.xlu0 %1128  ;;  %v1232_v10 = vsel %vm989_vm2, %v1227_v59, 0 }
 0x218   : > { %v1134_v57 = vsel %vm989_vm2, %v1129_v56, 0 }
 0x219   : > { %7388 = vmatpush3.bf16.xpose.msra.mxu1 %v1134_v57 }
 0x21a   : > { %7393 = vmatprep.subr.bf16.mxu1 %v8249_v17  ;;  %v1276_v3 = vpop.permute.xlu1 %1275 }
 0x21b   : > { %v1178_v58 = vpop.permute.xlu0 %1177  ;;  %v1281_v18 = vsel %vm989_vm2, %v1276_v3, 0 }
 0x21c   : > { %v1183_v1 = vsel %vm989_vm2, %v1178_v58, 0 }
 0x21f   : > { %v1325_v0 = vpop.permute.xlu0 %1324 }
 0x220   : > { %v1330_v2 = vsel %vm989_vm2, %v1325_v0, 0  ;;  %7390 = vmatmul.mubr.msk.bf16.vlgmr.msra.gmra.mrb[0].mxu1 %vm989_vm2, %v8600_v21 }
 0x221   : > { %7394 = vmatpush3.bf16.xpose.msra.mxu1 %v1183_v1  ;;  %7412 = vmatpush3.bf16.xpose.msra.mxu0 %v1330_v2  ;;  %v1374_v11 = vpop.permute.xlu1 %1373 }
 0x222   : > { %7395 = vmatprep.mubr.msk.bf16.mxu1 %vm8250_vm3, %v8249_v17  ;;  %7399 = vmatprep.subr.bf16.mxu1 %v8249_v17 }
 0x223   : > { %7423 = vmatprep.subr.bf16.mxu0 %v8249_v17  ;;  %v1423_v4 = vpop.permute.xlu0 %1422 }
 0x224   : > { %v1428_v5 = vsel %vm989_vm2, %v1423_v4, 0 }
 0x225   : > { %v1472_v16 = vpop.permute.xlu1 %1471 }
 0x227   : > { %v1521_v12 = vpop.permute.xlu0 %1520 }
 0x228   : > { %7396 = vmatmul.mubr.msk.bf16.vlgmr.msra.gmra.mrb[4].mxu1 %vm989_vm2, %v8608_v25  ;;  %7414 = vmatmul.mubr.msk.bf16.vlgmr.msra.gmra.mrb[16].mxu0 %vm989_vm2, %v8614_v30  ;;  %v1526_v13 = vsel %vm989_vm2, %v1521_v12, 0 }
 0x229   : > { %7400 = vmatpush3.bf16.xpose.msra.mxu1 %v1232_v10  ;;  %7424 = vmatpush3.bf16.xpose.msra.mxu0 %v1428_v5  ;;  %v1570_v20 = vpop.permute.xlu1 %1569 }
 0x22a   : > { %7401 = vmatprep.mubr.msk.bf16.mxu1 %vm8250_vm3, %v8249_v17  ;;  %7425 = vmatprep.mubr.msk.bf16.mxu0 %vm8250_vm3, %v8249_v17 }
 0x22b   : > { %7405 = vmatprep.subr.bf16.mxu1 %v8249_v17  ;;  %7435 = vmatprep.subr.bf16.mxu0 %v8249_v17  ;;  %v1619_v21 = vpop.permute.xlu0 %1618 }
 0x22c   : > { %v1624_v22 = vsel %vm989_vm2, %v1619_v21, 0 }
 0x22d   : > { %v1668_v23 = vpop.permute.xlu1 %1667 }
 0x22e   : > { %v1673_v28 = vsel %vm989_vm2, %v1668_v23, 0 }
 0x22f   : > { %v1717_v25 = vpop.permute.xlu0 %1716 }
 0x230   : > { %7402 = vmatmul.mubr.msk.bf16.vlgmr.msra.gmra.mrb[8].mxu1 %vm989_vm2, %v8598_v19  ;;  %7426 = vmatmul.mubr.msk.bf16.vlgmr.msra.gmra.mrb[20].mxu0 %vm989_vm2, %v8616_v27  ;;  %v1379_v19 = vsel %vm989_vm2, %v1374_v11, 0  ;;  %v1722_v26 = vsel %vm989_vm2, %v1717_v25, 0  ;;  %v1575_v27 = vsel %vm989_vm2, %v1570_v20, 0 }
 0x231   : > { %7406 = vmatpush3.bf16.xpose.msra.mxu1 %v1281_v18  ;;  %7436 = vmatpush3.bf16.xpose.msra.mxu0 %v1526_v13  ;;  %v1766_v29 = vpop.permute.xlu1 %1765 }
 0x232   : > { %7407 = vmatprep.mubr.msk.bf16.mxu1 %vm8250_vm3, %v8249_v17  ;;  %7437 = vmatprep.mubr.msk.bf16.mxu0 %vm8250_vm3, %v8249_v17  ;;  %v1771_v35 = vsel %vm989_vm2, %v1766_v29, 0 }
 0x233   : > { %7417 = vmatprep.subr.bf16.mxu1 %v8249_v17  ;;  %7447 = vmatprep.subr.bf16.mxu0 %v8249_v17  ;;  %v1815_v30 = vpop.permute.xlu0 %1814 }
 0x234   : > { %v1820_v31 = vsel %vm989_vm2, %v1815_v30, 0 }
 0x235   : > { %v1864_v32 = vpop.permute.xlu1 %1863 }
 0x237   : > { %v2154_v37 = vpop.permute.xlu0 %2153 }
 0x238   : > { %7408 = vmatmul.mubr.msk.bf16.vlgmr.msra.gmra.mrb[12].mxu1 %vm989_vm2, %v8606_v24  ;;  %7438 = vmatmul.mubr.msk.bf16.vlgmr.msra.gmra.mrb[24].mxu0 %vm989_vm2, %v8628_v36  ;;  %v1477_v24 = vsel %vm989_vm2, %v1472_v16, 0  ;;  %v1869_v36 = vsel %vm989_vm2, %v1864_v32, 0  ;;  %v2159_v38 = vsel %vm2109_vm4, %v2154_v37, 0 }
 0x239   : > { %7418 = vmatpush3.bf16.xpose.msra.mxu1 %v1379_v19  ;;  %7448 = vmatpush3.bf16.xpose.msra.mxu0 %v1624_v22 }
 0x23a   : > { %7419 = vmatprep.mubr.msk.bf16.mxu1 %vm8250_vm3, %v8249_v17  ;;  %7449 = vmatprep.mubr.msk.bf16.mxu0 %vm8250_vm3, %v8249_v17 }
 0x23b   : > { %7429 = vmatprep.subr.bf16.mxu1 %v8249_v17  ;;  %7459 = vmatprep.subr.bf16.mxu0 %v8249_v17 }
 0x240   : > { %7420 = vmatmul.mubr.msk.bf16.vlgmr.msra.gmra.mrb[16].mxu1 %vm989_vm2, %v8618_v33  ;;  %7450 = vmatmul.mubr.msk.bf16.vlgmr.msra.gmra.mrb[28].mxu0 %vm989_vm2, %v8632_v39  ;;  %v2105_v33 = vpop.permute.xlu1 %2104 }
 0x241   : > { %7430 = vmatpush3.bf16.xpose.msra.mxu1 %v1477_v24  ;;  %7460 = vmatpush3.bf16.xpose.msra.mxu0 %v1722_v26 }
 0x242   : > { %7431 = vmatprep.mubr.msk.bf16.mxu1 %vm8250_vm3, %v8249_v17  ;;  %7461 = vmatprep.mubr.msk.bf16.mxu0 %vm8250_vm3, %v8249_v17 }
 0x243   : > { %7441 = vmatprep.subr.bf16.mxu1 %v8249_v17  ;;  %7471 = vmatprep.subr.bf16.mxu0 %v8249_v17 }
 0x248   : > { %7432 = vmatmul.mubr.msk.bf16.vlgmr.msra.gmra.mrb[20].mxu1 %vm989_vm2, %v8622_v34  ;;  %7462 = vmatmul.mubr.msk.bf16.vlgmr.msra.gmra.mrb[32].mxu0 %vm989_vm2, %v8644_v44  ;;  %v2111_v34 = vsel %vm2109_vm4, %v2105_v33, 0 }
 0x249   : > { %7442 = vmatpush3.bf16.xpose.msra.mxu1 %v1575_v27  ;;  %7472 = vmatpush3.bf16.xpose.msra.mxu0 %v1820_v31 }
 0x24a   : > { %7443 = vmatprep.mubr.msk.bf16.mxu1 %vm8250_vm3, %v8249_v17  ;;  %7473 = vmatprep.mubr.msk.bf16.mxu0 %vm8250_vm3, %v8249_v17 }
 0x24b   : > { %7453 = vmatprep.subr.bf16.mxu1 %v8249_v17  ;;  %7483 = vmatprep.subr.bf16.mxu0 %v8249_v17 }
 0x250   : > { %7444 = vmatmul.mubr.msk.bf16.vlgmr.msra.gmra.mrb[24].mxu1 %vm989_vm2, %v8634_v40  ;;  %7474 = vmatmul.mubr.msk.bf16.vlgmr.msra.gmra.mrb[36].mxu0 %vm989_vm2, %v8648_v53 }
 0x251   : > { %7454 = vmatpush3.bf16.xpose.msra.mxu1 %v1673_v28  ;;  %7484 = vmatpush3.bf16.msra.mxu0 %v2111_v34 }
 0x252   : > { %7455 = vmatprep.mubr.msk.bf16.mxu1 %vm8250_vm3, %v8249_v17  ;;  %7465 = vmatprep.subr.bf16.mxu1 %v8249_v17 }
 0x253   : > { %7485 = vmatprep.mubr.msk.bf16.mxu0 %vm8250_vm3, %v8249_v17  ;;  %7495 = vmatprep.subr.bf16.mxu0 %v8249_v17 }
 0x258   : > { %7456 = vmatmul.mubr.msk.bf16.vlgmr.msra.gmra.mrb[28].mxu1 %vm989_vm2, %v8638_v41 }
 0x259   : > { %7466 = vmatpush3.bf16.xpose.msra.mxu1 %v1771_v35  ;;  %7467 = vmatprep.mubr.msk.bf16.mxu1 %vm8250_vm3, %v8249_v17 }
 0x25a   : > { %7477 = vmatprep.subr.bf16.mxu1 %v8249_v17 }
 0x260   : > { %7468 = vmatmul.mubr.msk.bf16.vlgmr.msra.gmra.mrb[32].mxu1 %vm989_vm2, %v8650_v54 }
 0x261   : > { %7478 = vmatpush3.bf16.xpose.msra.mxu1 %v1869_v36  ;;  %7479 = vmatprep.mubr.msk.bf16.mxu1 %vm8250_vm3, %v8249_v17 }
 0x262   : > { %7489 = vmatprep.subr.bf16.mxu1 %v8249_v17 }
 0x268   : > { %7480 = vmatmul.mubr.msk.bf16.vlgmr.msra.gmra.mrb[36].mxu1 %vm989_vm2, %v8654_v55 }
 0x269   : > { %7490 = vmatpush3.bf16.msra.mxu1 %v2159_v38  ;;  %7491 = vmatprep.mubr.msk.bf16.mxu1 %vm8250_vm3, %v8249_v17 }
 0x26a   : > { %7501 = vmatprep.subr.bf16.mxu1 %v8249_v17 }
 0x2f3   : > { %v8780_v42 = vpop.f32.mrb[0].mxu1 }
 0x2f4   : > { %v7391_v43 = vpop.f32.mrb[1].mxu1  ;;  %v1912_v45 = vsel %vm1911_vm5, %v8780_v42, -inf }
 0x2f5   : > { %v1173_v52 = vpop.f32.mrb[2].mxu1  ;;  %1913 = vmax.xlane.f32.xlu0 %v1912_v45 }
 0x2f6   : > { %v7392_v56 = vpop.f32.mrb[3].mxu1 }
 0x2fb   : > { %v8784_v57 = vpop.f32.mrb[4].mxu1  ;;  %v8786_v58 = vpop.f32.mrb[16].mxu0 }
 0x2fc   : > { %v7397_v59 = vpop.f32.mrb[5].mxu1  ;;  %v7415_v0 = vpop.f32.mrb[17].mxu0  ;;  %v1915_v1 = vsel %vm1911_vm5, %v8784_v57, -inf  ;;  %v1924_v10 = vsel %vm1911_vm5, %v8786_v58, -inf }
 0x2fd   : > { %v1222_v2 = vpop.f32.mrb[6].mxu1  ;;  %v1369_v3 = vpop.f32.mrb[18].mxu0  ;;  %1916 = vmax.xlane.f32.xlu1 %v1915_v1 }
 0x2fe   : > { %v7398_v4 = vpop.f32.mrb[7].mxu1  ;;  %v7416_v5 = vpop.f32.mrb[19].mxu0 }
 0x301   : > { %1925 = vmax.xlane.f32.xlu1 %v1924_v10 }
 0x303   : > { %v8792_v11 = vpop.f32.mrb[8].mxu1  ;;  %v8794_v12 = vpop.f32.mrb[20].mxu0 }
 0x304   : > { %v7403_v13 = vpop.f32.mrb[9].mxu1  ;;  %v7427_v16 = vpop.f32.mrb[21].mxu0  ;;  %v1918_v18 = vsel %vm1911_vm5, %v8792_v11, -inf  ;;  %v1930_v20 = vsel %vm1911_vm5, %v8794_v12, -inf }
 0x305   : > { %v1271_v21 = vpop.f32.mrb[10].mxu1  ;;  %1919 = vmax.xlane.f32.xlu0 %v1918_v18  ;;  %v1467_v22 = vpop.f32.mrb[22].mxu0  ;;  %1931 = vmax.xlane.f32.xlu1 %v1930_v20 }
 0x306   : > { %v7404_v19 = vpop.f32.mrb[11].mxu1  ;;  %v7428_v23 = vpop.f32.mrb[23].mxu0 }
 0x30b   : > { %v8800_v25 = vpop.f32.mrb[12].mxu1  ;;  %v8802_v26 = vpop.f32.mrb[24].mxu0 }
 0x30c   : > { %v7409_v24 = vpop.f32.mrb[13].mxu1  ;;  %v7439_v29 = vpop.f32.mrb[25].mxu0  ;;  %v1921_v30 = vsel %vm1911_vm5, %v8800_v25, -inf  ;;  %v1936_v31 = vsel %vm1911_vm5, %v8802_v26, -inf }
 0x30d   : > { %v1320_v32 = vpop.f32.mrb[14].mxu1  ;;  %1922 = vmax.xlane.f32.xlu0 %v1921_v30  ;;  %v1565_v27 = vpop.f32.mrb[26].mxu0  ;;  %1937 = vmax.xlane.f32.xlu1 %v1936_v31 }
 0x30e   : > { %v7410_v33 = vpop.f32.mrb[15].mxu1  ;;  %v7440_v28 = vpop.f32.mrb[27].mxu0 }
 0x313   : > { %v8808_v34 = vpop.f32.mrb[16].mxu1  ;;  %v8810_v35 = vpop.f32.mrb[28].mxu0 }
 0x314   : > { %v7421_v36 = vpop.f32.mrb[17].mxu1  ;;  %v7451_v37 = vpop.f32.mrb[29].mxu0  ;;  %v1927_v38 = vsel %vm1911_vm5, %v8808_v34, -inf  ;;  %v1942_v43 = vsel %vm1911_vm5, %v8810_v35, -inf }
 0x315   : > { %v1418_v45 = vpop.f32.mrb[18].mxu1  ;;  %1928 = vmax.xlane.f32.xlu0 %v1927_v38  ;;  %v1663_v52 = vpop.f32.mrb[30].mxu0  ;;  %1943 = vmax.xlane.f32.xlu1 %v1942_v43 }
 0x316   : > { %v7422_v56 = vpop.f32.mrb[19].mxu1  ;;  %v7452_v59 = vpop.f32.mrb[31].mxu0 }
 0x31b   : > { %v8816_v0 = vpop.f32.mrb[20].mxu1  ;;  %v8818_v1 = vpop.f32.mrb[32].mxu0 }
 0x31c   : > { %v7433_v2 = vpop.f32.mrb[21].mxu1  ;;  %v7463_v3 = vpop.f32.mrb[33].mxu0  ;;  %v1933_v4 = vsel %vm1911_vm5, %v8816_v0, -inf  ;;  %v1948_v5 = vsel %vm1911_vm5, %v8818_v1, -inf }
 0x31d   : > { %v1516_v10 = vpop.f32.mrb[22].mxu1  ;;  %1934 = vmax.xlane.f32.xlu0 %v1933_v4  ;;  %v1761_v13 = vpop.f32.mrb[34].mxu0  ;;  %1949 = vmax.xlane.f32.xlu1 %v1948_v5 }
 0x31e   : > { %v7434_v16 = vpop.f32.mrb[23].mxu1  ;;  %v7464_v18 = vpop.f32.mrb[35].mxu0 }
 0x31f   : > { %v8848_v10 = vpop.permute.xlu0 %2249  ;;  %v8850_v13 = vpop.permute.xlu1 %2201 }
 0x323   : > { %v8824_v20 = vpop.f32.mrb[24].mxu1  ;;  %v8826_v21 = vpop.f32.mrb[36].mxu0 }
 0x324   : > { %v7445_v22 = vpop.f32.mrb[25].mxu1  ;;  %v7475_v19 = vpop.f32.mrb[37].mxu0  ;;  %v1939_v23 = vsel %vm1911_vm5, %v8824_v20, -inf  ;;  %v1954_v24 = vsel %vm1911_vm5, %v8826_v21, -inf }
 0x325   : > { %v1614_v29 = vpop.f32.mrb[26].mxu1  ;;  %1940 = vmax.xlane.f32.xlu0 %v1939_v23  ;;  %v1859_v30 = vpop.f32.mrb[38].mxu0  ;;  %1955 = vmax.xlane.f32.xlu1 %v1954_v24 }
 0x326   : > { %v7446_v31 = vpop.f32.mrb[27].mxu1  ;;  %v7476_v32 = vpop.f32.mrb[39].mxu0 }
 0x327   : > { %v8852_v16 = vpop.permute.xlu0 %2345 }
 0x32b   : > { %v8832_v27 = vpop.f32.mrb[28].mxu1  ;;  %v8856_v18 = vpop.permute.xlu0 %2441 }
 0x32c   : > { %v7457_v33 = vpop.f32.mrb[29].mxu1  ;;  %v1945_v28 = vsel %vm1911_vm5, %v8832_v27, -inf }
 0x32d   : > { %v1712_v36 = vpop.f32.mrb[30].mxu1  ;;  %1946 = vmax.xlane.f32.xlu0 %v1945_v28 }
 0x32e   : > { %v7458_v37 = vpop.f32.mrb[31].mxu1 }
 0x333   : > { %v8836_v38 = vpop.f32.mrb[32].mxu1 }
 0x334   : > { %v7469_v43 = vpop.f32.mrb[33].mxu1  ;;  %v1951_v45 = vsel %vm1911_vm5, %v8836_v38, -inf }
 0x335   : > { %1952 = vmax.xlane.f32.xlu0 %v1951_v45  ;;  %v1810_v52 = vpop.f32.mrb[34].mxu1 }
 0x336   : > { %2585 = vrot.lane.b32.xlu1 %v8632_v39, %s8252_s30  ;;  %v7470_v56 = vpop.f32.mrb[35].mxu1  ;;  %v8854_v39 = vpop.permute.xlu1 %2297 }
 0x33a   : > { %v8858_v22 = vpop.permute.xlu1 %2393 }
 0x33b   : > { %v8842_v59 = vpop.f32.mrb[36].mxu1 }
 0x33c   : > { %v7481_v2 = vpop.f32.mrb[37].mxu1  ;;  %v1957_v3 = vsel %vm1911_vm5, %v8842_v59, -inf }
 0x33d   : > { %1958 = vmax.xlane.f32.xlu0 %v1957_v3  ;;  %v1908_v4 = vpop.f32.mrb[38].mxu1 }
 0x33e   : > { %v7482_v5 = vpop.f32.mrb[39].mxu1  ;;  %v8861_v29 = vpop.permute.xlu1 %2489 }
 0x353   : > { %2537 = vrot.lane.b32.xlu0 %v8634_v40, %s8252_s30 }
 0x382   : > { %v1914_v19 = vpop.xlane.xlu0 %1913 }
 0x383   : > { %v1960_v23 = vsub.f32 %v8780_v42, %v1914_v19 }
 0x385   : > { %v1976_v24 = vmul.f32 1.442695, %v1960_v23 }
 0x387   : > { %7978 = vpow2.f32 %v1976_v24 }
 0x38a   : > { %v1917_v40 = vpop.xlane.xlu1 %1916 }
 0x38b   : > { %v1961_v30 = vsub.f32 %v8784_v57, %v1917_v40 }
 0x38d   : > { %v1978_v31 = vmul.f32 1.442695, %v1961_v30 }
 0x38e   : > { %v1926_v32 = vpop.xlane.xlu1 %1925 }
 0x38f   : > { %7980 = vpow2.f32 %v1978_v31  ;;  %v1964_v33 = vsub.f32 %v8786_v58, %v1926_v32 }
 0x391   : > { %v8865_v28 = vpop.eup %7978  ;;  %v1984_v36 = vmul.f32 1.442695, %v1964_v33 }
 0x392   : > { %v1920_v37 = vpop.xlane.xlu0 %1919  ;;  %v2008_v43 = vsel %vm1911_vm5, %v8865_v28, 0.0 }
 0x393   : > { %7982 = vpow2.f32 %v1984_v36  ;;  %v1962_v42 = vsub.f32 %v8792_v11, %v1920_v37  ;;  %2009 = vadd.xlane.f32.xlu1 %v2008_v43 }
 0x395   : > { %v1980_v45 = vmul.f32 1.442695, %v1962_v42 }
 0x397   : > { %7984 = vpow2.f32 %v1980_v45 }
 0x399   : > { %v8870_v52 = vpop.eup %7980 }
 0x39a   : > { %v1923_v57 = vpop.xlane.xlu0 %1922  ;;  %v2011_v56 = vsel %vm1911_vm5, %v8870_v52, 0.0 }
 0x39b   : > { %v1963_v58 = vsub.f32 %v8800_v25, %v1923_v57  ;;  %2012 = vadd.xlane.f32.xlu0 %v2011_v56 }
 0x39d   : > { %v8875_v2 = vpop.eup %7982  ;;  %v1982_v3 = vmul.f32 1.442695, %v1963_v58  ;;  %v1932_v58 = vpop.xlane.xlu1 %1931 }
 0x39e   : > { %v2020_v4 = vsel %vm1911_vm5, %v8875_v2, 0.0 }
 0x39f   : > { %7986 = vpow2.f32 %v1982_v3  ;;  %2021 = vadd.xlane.f32.xlu1 %v2020_v4 }
 0x3a1   : > { %v8879_v11 = vpop.eup %7984  ;;  %v1938_v4 = vpop.xlane.xlu1 %1937 }
 0x3a2   : > { %v1929_v5 = vpop.xlane.xlu0 %1928  ;;  %v2014_v19 = vsel %vm1911_vm5, %v8879_v11, 0.0 }
 0x3a3   : > { %v1965_v23 = vsub.f32 %v8808_v34, %v1929_v5  ;;  %2015 = vadd.xlane.f32.xlu1 %v2014_v19  ;;  %v1968_v19 = vsub.f32 %v8802_v26, %v1938_v4 }
 0x3a5   : > { %v1986_v24 = vmul.f32 1.442695, %v1965_v23  ;;  %v1944_v23 = vpop.xlane.xlu1 %1943 }
 0x3a7   : > { %7988 = vpow2.f32 %v1986_v24 }
 0x3a9   : > { %v8884_v25 = vpop.eup %7986 }
 0x3aa   : > { %v1935_v40 = vpop.xlane.xlu0 %1934  ;;  %v2017_v30 = vsel %vm1911_vm5, %v8884_v25, 0.0 }
 0x3ab   : > { %v1967_v31 = vsub.f32 %v8816_v0, %v1935_v40  ;;  %2018 = vadd.xlane.f32.xlu0 %v2017_v30  ;;  %v1970_v40 = vsub.f32 %v8810_v35, %v1944_v23 }
 0x3ad   : > { %v1990_v32 = vmul.f32 1.442695, %v1967_v31  ;;  %v1950_v31 = vpop.xlane.xlu1 %1949 }
 0x3af   : > { %7990 = vpow2.f32 %v1990_v32  ;;  %v1972_v32 = vsub.f32 %v8818_v1, %v1950_v31 }
 0x3b1   : > { %v8889_v33 = vpop.eup %7988 }
 0x3b2   : > { %v1941_v36 = vpop.xlane.xlu0 %1940  ;;  %v2023_v34 = vsel %vm1911_vm5, %v8889_v33, 0.0 }
 0x3b3   : > { %v1969_v37 = vsub.f32 %v8824_v20, %v1941_v36  ;;  %2024 = vadd.xlane.f32.xlu0 %v2023_v34  ;;  %v1966_v20 = vsub.f32 %v8794_v12, %v1932_v58  ;;  %v1996_v12 = vmul.f32 1.442695, %v1970_v40  ;;  %v1956_v36 = vpop.xlane.xlu1 %1955  ;;  %v2000_v34 = vmul.f32 1.442695, %v1972_v32 }
 0x3b4   : > { %2633 = vrot.lane.b32.xlu1 %v8638_v41, %s8252_s30  ;;  %v1974_v26 = vsub.f32 %v8826_v21, %v1956_v36 }
 0x3b5   : > { %v1994_v43 = vmul.f32 1.442695, %v1969_v37  ;;  %v1988_v5 = vmul.f32 1.442695, %v1966_v20 }
 0x3b7   : > { %7992 = vpow2.f32 %v1994_v43  ;;  %v2004_v43 = vmul.f32 1.442695, %v1974_v26  ;;  %v2207_v26 = vsel %vm2109_vm4, %v8850_v13, 0 }
 0x3b9   : > { %v8896_v42 = vpop.eup %7990 }
 0x3ba   : > { %v1947_v0 = vpop.xlane.xlu0 %1946  ;;  %v2029_v45 = vsel %vm1911_vm5, %v8896_v42, 0.0 }
 0x3bb   : > { %v1971_v57 = vsub.f32 %v8832_v27, %v1947_v0  ;;  %2030 = vadd.xlane.f32.xlu0 %v2029_v45  ;;  %v1992_v27 = vmul.f32 1.442695, %v1968_v19 }
 0x3bd   : > { %v1998_v56 = vmul.f32 1.442695, %v1971_v57 }
 0x3bf   : > { %7994 = vpow2.f32 %v1998_v56 }
 0x3c0   : > { %7996 = vpow2.f32 %v1988_v5 }
 0x3c1   : > { %v8901_v3 = vpop.eup %7992  ;;  %7998 = vpow2.f32 %v1992_v27 }
 0x3c2   : > { %v2035_v41 = vsel %vm1911_vm5, %v8901_v3, 0.0  ;;  %8000 = vpow2.f32 %v1996_v12  ;;  %v1953_v20 = vpop.xlane.xlu0 %1952 }
 0x3c3   : > { %2036 = vadd.xlane.f32.xlu0 %v2035_v41  ;;  %8002 = vpow2.f32 %v2000_v34  ;;  %v1973_v4 = vsub.f32 %v8836_v38, %v1953_v20 }
 0x3c4   : > { %8004 = vpow2.f32 %v2004_v43 }
 0x3c5   : > { %v2002_v19 = vmul.f32 1.442695, %v1973_v4 }
 0x3c7   : > { %8006 = vpow2.f32 %v2002_v19 }
 0x3c9   : > { %v8907_v24 = vpop.eup %7994 }
 0x3ca   : > { %v2041_v30 = vsel %vm1911_vm5, %v8907_v24, 0.0  ;;  %v8914_v37 = vpop.eup %7996  ;;  %v1959_v5 = vpop.xlane.xlu0 %1958 }
 0x3cb   : > { %2042 = vadd.xlane.f32.xlu0 %v2041_v30  ;;  %v2026_v35 = vsel %vm1911_vm5, %v8914_v37, 0.0  ;;  %v8918_v0 = vpop.eup %7998  ;;  %v1975_v23 = vsub.f32 %v8842_v59, %v1959_v5  ;;  %v8952_v59 = vpop.permute.xlu1 %2585 }
 0x3cc   : > { %v2032_v45 = vsel %vm1911_vm5, %v8918_v0, 0.0  ;;  %v8922_v1 = vpop.eup %8000 }
 0x3cd   : > { %v2038_v21 = vsel %vm1911_vm5, %v8922_v1, 0.0  ;;  %v8926_v57 = vpop.eup %8002  ;;  %v2006_v27 = vmul.f32 1.442695, %v1975_v23 }
 0x3ce   : > { %v2044_v56 = vsel %vm1911_vm5, %v8926_v57, 0.0  ;;  %v8932_v58 = vpop.eup %8004  ;;  %v8954_v31 = vpop.permute.xlu0 %2537 }
 0x3cf   : > { %v2050_v41 = vsel %vm1911_vm5, %v8932_v58, 0.0  ;;  %8008 = vpow2.f32 %v2006_v27  ;;  %v2399_v27 = vsel %vm2109_vm4, %v8858_v22, 0 }
 0x3d8   : > { %2027 = vadd.xlane.f32.xlu1 %v2026_v35 }
 0x3dc   : > { %2033 = vadd.xlane.f32.xlu1 %v2032_v45 }
 0x3e0   : > { %2039 = vadd.xlane.f32.xlu1 %v2038_v21 }
 0x3e1   : > { %2681 = vrot.lane.b32.xlu0 %v8644_v44, %s8252_s30  ;;  %v8940_v44 = vpop.eup %8006 }
 0x3e2   : > { %v2047_v40 = vsel %vm1911_vm5, %v8940_v44, 0.0  ;;  %v8946_v30 = vpop.eup %8008 }
 0x3e3   : > { %v2053_v38 = vsel %vm1911_vm5, %v8946_v30, 0.0 }
 0x3e4   : > { %2045 = vadd.xlane.f32.xlu1 %v2044_v56 }
 0x3e8   : > { %2051 = vadd.xlane.f32.xlu1 %v2050_v41  ;;  %v2303_v41 = vsel %vm2109_vm4, %v8854_v39, 0  ;;  %v2351_v39 = vsel %vm2109_vm4, %v8852_v16, 0 }
 0x3f9   : > { %2729 = vrot.lane.b32.xlu1 %v8650_v54, %s8252_s30 }
 0x3fd   : > { %2825 = vrot.lane.b32.xlu1 %v8654_v55, %s8252_s30 }
 0x400   : > { %2048 = vadd.xlane.f32.xlu0 %v2047_v40 }
 0x404   : > { %2054 = vadd.xlane.f32.xlu0 %v2053_v38 }
 0x41a   : > { %2777 = vrot.lane.b32.xlu0 %v8648_v53, %s8252_s30 }
 0x420   : > { %v2010_v54 = vpop.xlane.xlu1 %2009 }
 0x421   : > { %8010 = vrcp.f32 %v2010_v54 }
 0x428   : > { %v2013_v55 = vpop.xlane.xlu0 %2012 }
 0x429   : > { %8012 = vrcp.f32 %v2013_v55 }
 0x42b   : > { %v8011_v12 = vpop.eup %8010 }
 0x42c   : > { %v2022_v32 = vpop.xlane.xlu1 %2021  ;;  %v2072_v36 = vmul.f32 %v8011_v12, %v8865_v28  ;;  %v2255_v28 = vsel %vm2109_vm4, %v8848_v10, 0 }
 0x42e   : > { %v2088_v34 = vpack.c.bf16 %v2072_v36, %v2072_v36 }
 0x430   : > { %7486 = vmatmul.mubr.msk.bf16.vlgmr.msra.gmra.mrb[40].mxu0 %vm1911_vm5, %v2088_v34  ;;  %v2016_v43 = vpop.xlane.xlu1 %2015 }
 0x431   : > { %7496 = vmatpush3.bf16.msra.mxu0 %v2207_v26  ;;  %8014 = vrcp.f32 %v2016_v43  ;;  %7497 = vmatprep.mubr.msk.bf16.mxu0 %vm8250_vm3, %v8249_v17 }
 0x432   : > { %7507 = vmatprep.subr.bf16.mxu0 %v8249_v17  ;;  %8016 = vrcp.f32 %v2022_v32 }
 0x433   : > { %v8013_v53 = vpop.eup %8012 }
 0x434   : > { %v2073_v35 = vmul.f32 %v8013_v53, %v8870_v52  ;;  %v2634_v34 = vpop.permute.xlu1 %2633 }
 0x436   : > { %v2089_v45 = vpack.c.bf16 %v2073_v35, %v2073_v35 }
 0x438   : > { %7492 = vmatmul.mubr.msk.bf16.vlgmr.msra.gmra.mrb[40].mxu1 %vm1911_vm5, %v2089_v45  ;;  %v2019_v13 = vpop.xlane.xlu0 %2018 }
 0x439   : > { %7502 = vmatpush3.bf16.msra.mxu1 %v2255_v28  ;;  %8018 = vrcp.f32 %v2019_v13  ;;  %7503 = vmatprep.mubr.msk.bf16.mxu1 %vm8250_vm3, %v8249_v17 }
 0x43a   : > { %7513 = vmatprep.subr.bf16.mxu1 %v8249_v17 }
 0x43b   : > { %v8015_v21 = vpop.eup %8014 }
 0x43c   : > { %v2074_v56 = vmul.f32 %v8015_v21, %v8879_v11  ;;  %v8017_v52 = vpop.eup %8016 }
 0x43d   : > { %v2076_v10 = vmul.f32 %v8017_v52, %v8875_v2 }
 0x43e   : > { %v2090_v20 = vpack.c.bf16 %v2074_v56, %v2074_v56 }
 0x43f   : > { %v2092_v23 = vpack.c.bf16 %v2076_v10, %v2076_v10 }
 0x440   : > { %v2025_v4 = vpop.xlane.xlu0 %2024  ;;  %7498 = vmatmul.mubr.msk.bf16.vlgmr.msra.gmra.mrb[44].mxu0 %vm1911_vm5, %v2090_v20 }
 0x441   : > { %8020 = vrcp.f32 %v2025_v4  ;;  %7508 = vmatpush3.bf16.msra.mxu0 %v2303_v41  ;;  %7509 = vmatprep.mubr.msk.bf16.mxu0 %vm8250_vm3, %v8249_v17 }
 0x442   : > { %7519 = vmatprep.subr.bf16.mxu0 %v8249_v17 }
 0x443   : > { %v8019_v5 = vpop.eup %8018 }
 0x444   : > { %v2075_v11 = vmul.f32 %v8019_v5, %v8884_v25  ;;  %v2447_v25 = vsel %vm2109_vm4, %v8856_v18, 0 }
 0x446   : > { %v2091_v19 = vpack.c.bf16 %v2075_v11, %v2075_v11 }
 0x448   : > { %7504 = vmatmul.mubr.msk.bf16.vlgmr.msra.gmra.mrb[44].mxu1 %vm1911_vm5, %v2091_v19  ;;  %v2031_v40 = vpop.xlane.xlu0 %2030  ;;  %7510 = vmatmul.mubr.msk.bf16.vlgmr.msra.gmra.mrb[48].mxu0 %vm1911_vm5, %v2092_v23 }
 0x449   : > { %7514 = vmatpush3.bf16.msra.mxu1 %v2351_v39  ;;  %8022 = vrcp.f32 %v2031_v40  ;;  %7520 = vmatpush3.bf16.msra.mxu0 %v2399_v27 }
 0x44a   : > { %7515 = vmatprep.mubr.msk.bf16.mxu1 %vm8250_vm3, %v8249_v17  ;;  %7525 = vmatprep.subr.bf16.mxu1 %v8249_v17 }
 0x44b   : > { %v8021_v2 = vpop.eup %8020  ;;  %7521 = vmatprep.mubr.msk.bf16.mxu0 %vm8250_vm3, %v8249_v17  ;;  %7531 = vmatprep.subr.bf16.mxu0 %v8249_v17 }
 0x44c   : > { %v2077_v16 = vmul.f32 %v8021_v2, %v8889_v33  ;;  %v2543_v33 = vsel %vm2109_vm4, %v8954_v31, 0 }
 0x44e   : > { %v2093_v22 = vpack.c.bf16 %v2077_v16, %v2077_v16 }
 0x450   : > { %7516 = vmatmul.mubr.msk.bf16.vlgmr.msra.gmra.mrb[48].mxu1 %vm1911_vm5, %v2093_v22  ;;  %v2037_v38 = vpop.xlane.xlu0 %2036  ;;  %v7966_v22 = vld [vmem:[%s952_s29] sm:$0xff]  }
 0x451   : > { %7526 = vmatpush3.bf16.msra.mxu1 %v2447_v25  ;;  %8024 = vrcp.f32 %v2037_v38  ;;  %7527 = vmatprep.mubr.msk.bf16.mxu1 %vm8250_vm3, %v8249_v17 }
 0x452   : > { %7537 = vmatprep.subr.bf16.mxu1 %v8249_v17 }
 0x453   : > { %v8023_v54 = vpop.eup %8022 }
 0x454   : > { %v2079_v55 = vmul.f32 %v8023_v54, %v8896_v42  ;;  %v2639_v42 = vsel %vm2109_vm4, %v2634_v34, 0 }
 0x456   : > { %v2095_v12 = vpack.c.bf16 %v2079_v55, %v2079_v55  ;;  %v7967_v55 = vld [vmem:[%s952_s29 + $0x8] sm:$0xff]   ;;  %s6027_s29 = scalar_lea.vmem %s10056_s12, %s8236_s26 }
 0x458   : > { %7528 = vmatmul.mubr.msk.bf16.vlgmr.msra.gmra.mrb[52].mxu1 %vm1911_vm5, %v2095_v12  ;;  %v2043_v18 = vpop.xlane.xlu0 %2042 }
 0x459   : > { %7538 = vmatpush3.bf16.msra.mxu1 %v2543_v33  ;;  %8026 = vrcp.f32 %v2043_v18  ;;  %7539 = vmatprep.mubr.msk.bf16.mxu1 %vm8250_vm3, %v8249_v17 }
 0x45a   : > { %7549 = vmatprep.subr.bf16.mxu1 %v8249_v17 }
 0x45b   : > { %v8025_v32 = vpop.eup %8024 }
 0x45c   : > { %v2081_v36 = vmul.f32 %v8025_v32, %v8901_v3  ;;  %v2682_v11 = vpop.permute.xlu0 %2681 }
 0x45d   : > { %v2687_v39 = vsel %vm2109_vm4, %v2682_v11, 0 }
 0x45e   : > { %v2097_v26 = vpack.c.bf16 %v2081_v36, %v2081_v36 }
 0x460   : > { %7540 = vmatmul.mubr.msk.bf16.vlgmr.msra.gmra.mrb[56].mxu1 %vm1911_vm5, %v2097_v26 }
 0x461   : > { %7550 = vmatpush3.bf16.msra.mxu1 %v2639_v42  ;;  %7551 = vmatprep.mubr.msk.bf16.mxu1 %vm8250_vm3, %v8249_v17 }
 0x462   : > { %7561 = vmatprep.subr.bf16.mxu1 %v8249_v17 }
 0x463   : > { %v8027_v31 = vpop.eup %8026 }
 0x464   : > { %v2083_v43 = vmul.f32 %v8027_v31, %v8907_v24  ;;  %v2495_v24 = vsel %vm2109_vm4, %v8861_v29, 0  ;;  %v2591_v29 = vsel %vm2109_vm4, %v8952_v59, 0 }
 0x465   : > { %v2028_v53 = vpop.xlane.xlu1 %2027 }
 0x466   : > { %8028 = vrcp.f32 %v2028_v53  ;;  %v2099_v35 = vpack.c.bf16 %v2083_v43, %v2083_v43 }
 0x468   : > { %7552 = vmatmul.mubr.msk.bf16.vlgmr.msra.gmra.mrb[60].mxu1 %vm1911_vm5, %v2099_v35 }
 0x469   : > { %v2034_v3 = vpop.xlane.xlu1 %2033  ;;  %7563 = vmatprep.mubr.msk.bf16.mxu1 %vm8250_vm3, %v8249_v17 }
 0x46a   : > { %8030 = vrcp.f32 %v2034_v3 }
 0x46d   : > { %v2040_v45 = vpop.xlane.xlu1 %2039 }
 0x46e   : > { %8032 = vrcp.f32 %v2040_v45 }
 0x470   : > { %v8029_v28 = vpop.eup %8028 }
 0x471   : > { %v2046_v13 = vpop.xlane.xlu1 %2045  ;;  %v2078_v21 = vmul.f32 %v8029_v28, %v8914_v37 }
 0x472   : > { %8034 = vrcp.f32 %v2046_v13 }
 0x473   : > { %v2094_v56 = vpack.c.bf16 %v2078_v21, %v2078_v21 }
 0x474   : > { %v8031_v20 = vpop.eup %8030 }
 0x475   : > { %7522 = vmatmul.mubr.msk.bf16.vlgmr.msra.gmra.mrb[52].mxu0 %vm1911_vm5, %v2094_v56  ;;  %v2052_v52 = vpop.xlane.xlu1 %2051  ;;  %v2080_v41 = vmul.f32 %v8031_v20, %v8918_v0 }
 0x476   : > { %7532 = vmatpush3.bf16.msra.mxu0 %v2495_v24  ;;  %7533 = vmatprep.mubr.msk.bf16.mxu0 %vm8250_vm3, %v8249_v17  ;;  %8036 = vrcp.f32 %v2052_v52 }
 0x477   : > { %7543 = vmatprep.subr.bf16.mxu0 %v8249_v17  ;;  %v2096_v10 = vpack.c.bf16 %v2080_v41, %v2080_v41 }
 0x478   : > { %v8033_v5 = vpop.eup %8032 }
 0x479   : > { %v2730_v4 = vpop.permute.xlu1 %2729  ;;  %v2082_v0 = vmul.f32 %v8033_v5, %v8922_v1 }
 0x47a   : > { %v2735_v37 = vsel %vm2109_vm4, %v2730_v4, 0 }
 0x47b   : > { %7562 = vmatpush3.bf16.msra.mxu1 %v2735_v37  ;;  %v2098_v19 = vpack.c.bf16 %v2082_v0, %v2082_v0 }
 0x47c   : > { %7573 = vmatprep.subr.bf16.mxu1 %v8249_v17  ;;  %v8035_v23 = vpop.eup %8034 }
 0x47d   : > { %7534 = vmatmul.mubr.msk.bf16.vlgmr.msra.gmra.mrb[56].mxu0 %vm1911_vm5, %v2096_v10  ;;  %v2084_v59 = vmul.f32 %v8035_v23, %v8926_v57  ;;  %v2826_v33 = vpop.permute.xlu1 %2825 }
 0x47e   : > { %7544 = vmatpush3.bf16.msra.mxu0 %v2591_v29  ;;  %7545 = vmatprep.mubr.msk.bf16.mxu0 %vm8250_vm3, %v8249_v17  ;;  %v2831_v32 = vsel %vm2109_vm4, %v2826_v33, 0 }
 0x47f   : > { %7555 = vmatprep.subr.bf16.mxu0 %v8249_v17  ;;  %v2100_v27 = vpack.c.bf16 %v2084_v59, %v2084_v59 }
 0x480   : > { %v8037_v1 = vpop.eup %8036 }
 0x481   : > { %v2086_v16 = vmul.f32 %v8037_v1, %v8932_v58 }
 0x483   : > { %v2102_v54 = vpack.c.bf16 %v2086_v16, %v2086_v16 }
 0x485   : > { %7546 = vmatmul.mubr.msk.bf16.vlgmr.msra.gmra.mrb[60].mxu0 %vm1911_vm5, %v2098_v19 }
 0x486   : > { %7556 = vmatpush3.bf16.msra.mxu0 %v2687_v39  ;;  %7557 = vmatprep.mubr.msk.bf16.mxu0 %vm8250_vm3, %v8249_v17 }
 0x487   : > { %7567 = vmatprep.subr.bf16.mxu0 %v8249_v17 }
 0x48d   : > { %v2049_v40 = vpop.xlane.xlu0 %2048  ;;  %7558 = vmatmul.mubr.msk.bf16.vlgmr.msra.gmra.mrb[64].mxu0 %vm1911_vm5, %v2100_v27 }
 0x48e   : > { %8038 = vrcp.f32 %v2049_v40  ;;  %7569 = vmatprep.mubr.msk.bf16.mxu0 %vm8250_vm3, %v8249_v17 }
 0x491   : > { %v2055_v2 = vpop.xlane.xlu0 %2054 }
 0x492   : > { %8040 = vrcp.f32 %v2055_v2 }
 0x495   : > { %v2778_v57 = vpop.permute.xlu0 %2777 }
 0x496   : > { %v2783_v25 = vsel %vm2109_vm4, %v2778_v57, 0 }
 0x497   : > { %7568 = vmatpush3.bf16.msra.mxu0 %v2783_v25 }
 0x498   : > { %v8039_v38 = vpop.eup %8038  ;;  %7579 = vmatprep.subr.bf16.mxu0 %v7966_v22 }
 0x499   : > { %v2085_v12 = vmul.f32 %v8039_v38, %v8940_v44 }
 0x49a   : > { %7570 = vmatmul.mubr.msk.bf16.vlgmr.msra.gmra.mrb[68].mxu0 %vm1911_vm5, %v2102_v54 }
 0x49b   : > { %v2101_v18 = vpack.c.bf16 %v2085_v12, %v2085_v12  ;;  %7580 = vmatpush3.bf16.msra.mxu0 %v7966_v22 }
 0x49c   : > { %v8041_v58 = vpop.eup %8040  ;;  %7581 = vmatprep.subr.bf16.mxu0 %v7967_v55 }
 0x49d   : > { %7564 = vmatmul.mubr.msk.bf16.vlgmr.msra.gmra.mrb[64].mxu1 %vm1911_vm5, %v2101_v18  ;;  %v2087_v36 = vmul.f32 %v8041_v58, %v8946_v30 }
 0x49e   : > { %7574 = vmatpush3.bf16.msra.mxu1 %v2831_v32  ;;  %7575 = vmatprep.mubr.msk.bf16.mxu1 %vm8250_vm3, %v8249_v17 }
 0x49f   : > { %7582 = vmatpush3.bf16.msra.mxu0 %v7967_v55  ;;  %v2103_v44 = vpack.c.bf16 %v2087_v36, %v2087_v36 }
 0x4a0   : > { %7619 = vmatprep.subr.bf16.mxu0 %v8249_v17 }
 0x4a5   : > { %7576 = vmatmul.mubr.msk.bf16.vlgmr.msra.gmra.mrb[68].mxu1 %vm1911_vm5, %v2103_v44 }
 0x503   : > { %v2147_v34 = vpop.f32.mrb[40].mxu0 }
 0x504   : > { %v7487_v26 = vpop.f32.mrb[41].mxu0 }
 0x505   : > { %v2150_v42 = vpop.f32.mrb[42].mxu0 }
 0x506   : > { %v7488_v31 = vpop.f32.mrb[43].mxu0 }
 0x50b   : > { %v2195_v43 = vpop.f32.mrb[40].mxu1 }
 0x50c   : > { %v2873_v53 = vpack.c.bf16 %v2195_v43, %v2147_v34  ;;  %v7493_v35 = vpop.f32.mrb[41].mxu1 }
 0x50d   : > { %v2198_v3 = vpop.f32.mrb[42].mxu1 }
 0x50e   : > { %v7494_v45 = vpop.f32.mrb[43].mxu1  ;;  %7583 = vmatprep.mubr.msk.bf16.mxu0 %vm989_vm2, %v2873_v53 }
 0x513   : > { %v2243_v28 = vpop.f32.mrb[44].mxu0 }
 0x514   : > { %v7499_v13 = vpop.f32.mrb[45].mxu0 }
 0x515   : > { %v2246_v30 = vpop.f32.mrb[46].mxu0 }
 0x516   : > { %v7500_v21 = vpop.f32.mrb[47].mxu0 }
 0x51b   : > { %v2291_v56 = vpop.f32.mrb[44].mxu1  ;;  %v2339_v20 = vpop.f32.mrb[48].mxu0 }
 0x51c   : > { %v2874_v24 = vpack.c.bf16 %v2291_v56, %v2243_v28  ;;  %v7505_v52 = vpop.f32.mrb[45].mxu1  ;;  %v7511_v41 = vpop.f32.mrb[49].mxu0 }
 0x51d   : > { %v2294_v4 = vpop.f32.mrb[46].mxu1  ;;  %v2342_v37 = vpop.f32.mrb[50].mxu0 }
 0x51e   : > { %v7506_v10 = vpop.f32.mrb[47].mxu1  ;;  %v7512_v5 = vpop.f32.mrb[51].mxu0  ;;  %7584 = vmatmul.mubr.msk.bf16.vlgmr.msra.gmra.mrb[72].mxu0 %vm989_vm2, %v2874_v24 }
 0x523   : > { %v2387_v29 = vpop.f32.mrb[48].mxu1 }
 0x524   : > { %v2875_v0 = vpack.c.bf16 %v2387_v29, %v2339_v20  ;;  %v7517_v11 = vpop.f32.mrb[49].mxu1 }
 0x525   : > { %v2390_v19 = vpop.f32.mrb[50].mxu1 }
 0x526   : > { %v7518_v23 = vpop.f32.mrb[51].mxu1  ;;  %7587 = vmatprep.mubr.msk.bf16.mxu0 %vm989_vm2, %v2875_v0  ;;  %v7968_v19 = vld [vmem:[%s958_s20] sm:$0xff]  }
 0x527   : > { %7599 = vmatprep.subr.bf16.mxu1 %v7968_v19  ;;  %v7969_v23 = vld [vmem:[%s958_s20 + $0x8] sm:$0xff]  }
 0x528   : > { %7600 = vmatpush3.bf16.msra.mxu1 %v7968_v19 }
 0x529   : > { %7601 = vmatprep.subr.bf16.mxu1 %v7969_v23 }
 0x52b   : > { %v2483_v39 = vpop.f32.mrb[52].mxu1 }
 0x52c   : > { %v7529_v59 = vpop.f32.mrb[53].mxu1  ;;  %7602 = vmatpush3.bf16.msra.mxu1 %v7969_v23 }
 0x52d   : > { %v2486_v27 = vpop.f32.mrb[54].mxu1  ;;  %7625 = vmatprep.subr.bf16.mxu1 %v8249_v17 }
 0x52e   : > { %v7530_v40 = vpop.f32.mrb[55].mxu1 }
 0x533   : > { %v2579_v1 = vpop.f32.mrb[56].mxu1 }
 0x534   : > { %v7541_v2 = vpop.f32.mrb[57].mxu1 }
 0x535   : > { %v2582_v16 = vpop.f32.mrb[58].mxu1 }
 0x536   : > { %v7542_v57 = vpop.f32.mrb[59].mxu1 }
 0x53b   : > { %v2675_v22 = vpop.f32.mrb[60].mxu1 }
 0x53c   : > { %v7553_v25 = vpop.f32.mrb[61].mxu1 }
 0x53d   : > { %v2678_v38 = vpop.f32.mrb[62].mxu1 }
 0x53e   : > { %v7554_v54 = vpop.f32.mrb[63].mxu1 }
 0x548   : > { %v2435_v55 = vpop.f32.mrb[52].mxu0 }
 0x549   : > { %v2876_v12 = vpack.c.bf16 %v2483_v39, %v2435_v55  ;;  %v7523_v33 = vpop.f32.mrb[53].mxu0  ;;  %v8253_v55 = vmov 1983009808  }
 0x54a   : > { %v2438_v18 = vpop.f32.mrb[54].mxu0  ;;  %v3035_v33 = vlaneseq }
 0x54b   : > { %v7524_v58 = vpop.f32.mrb[55].mxu0  ;;  %7588 = vmatmul.mubr.msk.bf16.gmra.mrb[76].mxu0 %vm989_vm2, %v2876_v12  ;;  %v3033_v12 = vunpack.c.l.s4 %v8253_v55 }
 0x550   : > { %v2531_v32 = vpop.f32.mrb[56].mxu0 }
 0x551   : > { %v2877_v36 = vpack.c.bf16 %v2579_v1, %v2531_v32  ;;  %v7535_v44 = vpop.f32.mrb[57].mxu0 }
 0x552   : > { %v2534_v34 = vpop.f32.mrb[58].mxu0 }
 0x553   : > { %v7536_v26 = vpop.f32.mrb[59].mxu0  ;;  %7591 = vmatprep.mubr.msk.bf16.mxu0 %vm989_vm2, %v2877_v36 }
 0x554   : > { %v3034_v26 = vunpack.c.0.s8 %v3033_v12 }
 0x558   : > { %v2627_v42 = vpop.f32.mrb[60].mxu0 }
 0x559   : > { %v2878_v31 = vpack.c.bf16 %v2675_v22, %v2627_v42  ;;  %v7547_v43 = vpop.f32.mrb[61].mxu0  ;;  %v3036_v42 = vshrl.u32 %v3035_v33, 7 }
 0x55a   : > { %v2630_v53 = vpop.f32.mrb[62].mxu0 }
 0x55b   : > { %v7548_v35 = vpop.f32.mrb[63].mxu0  ;;  %7592 = vmatmul.mubr.msk.bf16.gmra.mrb[80].mxu0 %vm989_vm2, %v2878_v31  ;;  %v8254_v31 = vmov 1934713408   ;;  %v9113_v53 = vsub.s32 %v3034_v26, %v3036_v42 }
 0x560   : > { %v2723_v3 = vpop.f32.mrb[64].mxu0 }
 0x561   : > { %v7559_v45 = vpop.f32.mrb[65].mxu0 }
 0x562   : > { %v2726_v28 = vpop.f32.mrb[66].mxu0 }
 0x563   : > { %v7560_v13 = vpop.f32.mrb[67].mxu0 }
 0x56d   : > { %v2819_v30 = vpop.f32.mrb[68].mxu0 }
 0x56e   : > { %v7571_v21 = vpop.f32.mrb[69].mxu0 }
 0x56f   : > { %v2822_v56 = vpop.f32.mrb[70].mxu0 }
 0x570   : > { %v2771_v20 = vpop.f32.mrb[64].mxu1  ;;  %v7572_v24 = vpop.f32.mrb[71].mxu0 }
 0x571   : > { %v2879_v52 = vpack.c.bf16 %v2771_v20, %v2723_v3  ;;  %v7565_v41 = vpop.f32.mrb[65].mxu1 }
 0x572   : > { %v2774_v4 = vpop.f32.mrb[66].mxu1 }
 0x573   : > { %v7566_v37 = vpop.f32.mrb[67].mxu1  ;;  %7595 = vmatprep.mubr.msk.bf16.mxu0 %vm989_vm2, %v2879_v52 }
 0x578   : > { %v2867_v10 = vpop.f32.mrb[68].mxu1 }
 0x579   : > { %v2880_v5 = vpack.c.bf16 %v2867_v10, %v2819_v30  ;;  %v7577_v29 = vpop.f32.mrb[69].mxu1 }
 0x57a   : > { %v2870_v0 = vpop.f32.mrb[70].mxu1 }
 0x57b   : > { %v7578_v11 = vpop.f32.mrb[71].mxu1  ;;  %7596 = vmatmul.mubr.msk.bf16.gmra.mrb[84].mxu0 %vm989_vm2, %v2880_v5 }
 0x57c   : > { %7621 = vmatprep.mubr.msk.bf16.mxu0 %vm8250_vm3, %v8249_v17 }
 0x5f1   : > { %v7585_v39 = vpop.f32.mrb[72].mxu0 }
 0x5f2   : > { %v2951_v59 = vpop.f32.mrb[73].mxu0  ;;  %v9084_v44 = vadd.f32 %v7585_v39, %v8540_v48  ;;  %v3097_v48 = vunpack.c.l.s4 %v8254_v31 }
 0x5f3   : > { %v7586_v27 = vpop.f32.mrb[74].mxu0  ;;  %v9087_v34 = vadd.f32 %v2951_v59, %v8536_v46 }
 0x5f4   : > { %v2954_v40 = vpop.f32.mrb[75].mxu0  ;;  %v9072_v18 = vadd.f32 %v7586_v27, %v8542_v49  ;;  %v3098_v3 = vunpack.c.0.s8 %v3097_v48 }
 0x5f5   : > { %v9075_v58 = vadd.f32 %v2954_v40, %v8538_v47 }
 0x5f7   : > { %v3046_v46 = vcombine.low %v9075_v58, %v9072_v18  ;;  %v3047_v21 = vcombine.high %v9075_v58, %v9072_v18 }
 0x5f9   : > { %v3054_v28 = vrot.slane %v3046_v46, %v9113_v53  ;;  %v9148_v19 = vrot.slane %v3047_v21, %v9113_v53 }
 0x61e   : > { %v7589_v1 = vpop.f32.mrb[76].mxu0 }
 0x61f   : > { %v2967_v2 = vpop.f32.mrb[77].mxu0  ;;  %v9090_v49 = vadd.f32 %v7589_v1, %v8556_v60 }
 0x620   : > { %v7590_v16 = vpop.f32.mrb[78].mxu0  ;;  %v9093_v47 = vadd.f32 %v2967_v2, %v8544_v50 }
 0x621   : > { %v2970_v57 = vpop.f32.mrb[79].mxu0  ;;  %v9078_v32 = vadd.f32 %v7590_v16, %v8558_v61 }
 0x622   : > { %v9081_v36 = vadd.f32 %v2970_v57, %v8546_v51 }
 0x624   : > { %v3078_v43 = vcombine.low %v9081_v36, %v9078_v32 }
 0x62e   : > { %v7593_v22 = vpop.f32.mrb[80].mxu0 }
 0x62f   : > { %v2983_v25 = vpop.f32.mrb[81].mxu0  ;;  %v9106_v60 = vadd.f32 %v7593_v22, %v8570_v6  ;;  %v3086_v6 = vrot.slane %v3078_v43, %v9113_v53 }
 0x630   : > { %v7594_v38 = vpop.f32.mrb[82].mxu0  ;;  %v9109_v50 = vadd.f32 %v2983_v25, %v8561_v62  ;;  %v3063_v25 = vcombine.high %v9093_v47, %v9090_v49 }
 0x631   : > { %v2986_v54 = vpop.f32.mrb[83].mxu0  ;;  %v9096_v61 = vadd.f32 %v7594_v38, %v8572_v7  ;;  %v3030_v7 = vcombine.low %v9087_v34, %v9084_v44 }
 0x632   : > { %v9099_v51 = vadd.f32 %v2986_v54, %v8563_v63  ;;  %v3062_v63 = vcombine.low %v9093_v47, %v9090_v49  ;;  %v3166_v62 = vcombine.low %v9109_v50, %v9106_v60  ;;  %v3167_v54 = vcombine.high %v9109_v50, %v9106_v60 }
 0x633   : > { %v3038_v24 = vrot.slane %v3030_v7, %v9113_v53 }
 0x634   : > { %v3182_v35 = vcombine.low %v9099_v51, %v9096_v61  ;;  %v3070_v52 = vrot.slane %v3062_v63, %v9113_v53  ;;  %v3174_v11 = vrot.slane %v3166_v62, %v9113_v53  ;;  %v3183_v27 = vcombine.high %v9099_v51, %v9096_v61 }
 0x635   : > { %v3094_v29 = vcombine.low %v3038_v24, %v3054_v28 }
 0x636   : > { %v3190_v41 = vrot.slane %v3182_v35, %v9113_v53  ;;  %v3126_v0 = vcombine.low %v3070_v52, %v3086_v6  ;;  %v3127_v59 = vcombine.high %v3070_v52, %v3086_v6  ;;  %v3197_v48 = vrot.slane %v3183_v27, %v9113_v53 }
 0x638   : > { %v3230_v40 = vcombine.low %v3174_v11, %v3190_v41  ;;  %v3231_v1 = vcombine.high %v3174_v11, %v3190_v41 }
 0x64e   : > { %v7597_v45 = vpop.f32.mrb[84].mxu0 }
 0x64f   : > { %v9124_v13 = vadd.f32 %v7597_v45, %v8584_v14  ;;  %v2999_v30 = vpop.f32.mrb[85].mxu0  ;;  %v9137_v14 = vsub.s32 %v3098_v3, %v3036_v42  ;;  %v3077_v3 = vrot.slane %v3063_v25, %v9113_v53 }
 0x650   : > { %v9129_v56 = vadd.f32 %v2999_v30, %v8575_v8  ;;  %v7598_v20 = vpop.f32.mrb[86].mxu0  ;;  %v3031_v8 = vcombine.high %v9087_v34, %v9084_v44 }
 0x651   : > { %v9135_v4 = vadd.f32 %v7598_v20, %v8586_v15  ;;  %v3002_v37 = vpop.f32.mrb[87].mxu0  ;;  %v3095_v15 = vcombine.high %v3038_v24, %v3054_v28  ;;  %v3102_v22 = vrot.slane %v3094_v29, %v9137_v14  ;;  %v3134_v38 = vrot.slane %v3126_v0, %v9137_v14 }
 0x652   : > { %v3198_v10 = vcombine.low %v9129_v56, %v9124_v13  ;;  %v9142_v5 = vadd.f32 %v3002_v37, %v8577_v9  ;;  %v3079_v9 = vcombine.high %v9081_v36, %v9078_v32  ;;  %v3199_v2 = vcombine.high %v9129_v56, %v9124_v13 }
 0x653   : > { %v3109_v55 = vrot.slane %v3095_v15, %v9137_v14  ;;  %v3141_v31 = vrot.slane %v3127_v59, %v9137_v14  ;;  %v3238_v46 = vrot.slane %v3230_v40, %v9137_v14  ;;  %v3245_v43 = vrot.slane %v3231_v1, %v9137_v14 }
 0x654   : > { %v3214_v23 = vcombine.low %v9142_v5, %v9135_v4  ;;  %v3215_v39 = vcombine.high %v9142_v5, %v9135_v4  ;;  %v3206_v16 = vrot.slane %v3198_v10, %v9113_v53  ;;  %v3093_v42 = vrot.slane %v3079_v9, %v9113_v53 }
 0x655   : > { %v3213_v7 = vrot.slane %v3199_v2, %v9113_v53  ;;  %v3159_v45 = vcombine.high %v3102_v22, %v3134_v38  ;;  %v3181_v28 = vrot.slane %v3167_v54, %v9113_v53  ;;  %v3158_v6 = vcombine.low %v3102_v22, %v3134_v38 }
 0x656   : > { %v3222_v57 = vrot.slane %v3214_v23, %v9113_v53  ;;  %v3229_v12 = vrot.slane %v3215_v39, %v9113_v53  ;;  %v3045_v24 = vrot.slane %v3031_v8, %v9113_v53  ;;  %v3142_v52 = vcombine.low %v3077_v3, %v3093_v42 }
 0x657   : > { %v3246_v41 = vcombine.low %v3181_v28, %v3197_v48  ;;  %v3160_v29 = vcombine.low %v3109_v55, %v3141_v31  ;;  %v3161_v40 = vcombine.high %v3109_v55, %v3141_v31  ;;  %v3143_v1 = vcombine.high %v3077_v3, %v3093_v42 }
 0x658   : > { %v3262_v33 = vcombine.low %v3206_v16, %v3222_v57  ;;  %v3263_v26 = vcombine.high %v3206_v16, %v3222_v57  ;;  %v3278_v62 = vcombine.low %v3213_v7, %v3229_v12  ;;  %v3110_v0 = vcombine.low %v3045_v24, %v9148_v19 }
 0x659   : > { %v3150_v23 = vrot.slane %v3142_v52, %v9137_v14  ;;  %v3254_v39 = vrot.slane %v3246_v41, %v9137_v14  ;;  %v3279_v59 = vcombine.high %v3213_v7, %v3229_v12  ;;  %v3247_v2 = vcombine.high %v3181_v28, %v3197_v48 }
 0x65a   : > { %v3270_v63 = vrot.slane %v3262_v33, %v9137_v14  ;;  %v3277_v35 = vrot.slane %v3263_v26, %v9137_v14  ;;  %v3286_v11 = vrot.slane %v3278_v62, %v9137_v14  ;;  %v3118_v9 = vrot.slane %v3110_v0, %v9137_v14 }
 0x65b   : > { %v3111_v22 = vcombine.high %v3045_v24, %v9148_v19  ;;  %v3293_v25 = vrot.slane %v3279_v59, %v9137_v14  ;;  %v3157_v54 = vrot.slane %v3143_v1, %v9137_v14  ;;  %v3261_v33 = vrot.slane %v3247_v2, %v9137_v14 }
 0x65c   : > { %v3295_v30 = vcombine.high %v3238_v46, %v3270_v63  ;;  %v3294_v21 = vcombine.low %v3238_v46, %v3270_v63  ;;  %v3296_v20 = vcombine.low %v3245_v43, %v3277_v35  ;;  %v3297_v8 = vcombine.high %v3245_v43, %v3277_v35 }
 0x65d   : > { %v3298_v27 = vcombine.low %v3254_v39, %v3286_v11  ;;  %v3162_v16 = vcombine.low %v3118_v9, %v3150_v23  ;;  %v3299_v12 = vcombine.high %v3254_v39, %v3286_v11  ;;  %v3125_v55 = vrot.slane %v3111_v22, %v9137_v14 }
 0x65e   : > { %v3302_v37 = vpack.c.bf16 %v3294_v21, %v3158_v6  ;;  %v3303_v10 = vpack.c.bf16 %v3295_v30, %v3159_v45  ;;  %v3304_v15 = vpack.c.bf16 %v3296_v20, %v3160_v29  ;;  %v3305_v57 = vpack.c.bf16 %v3297_v8, %v3161_v40 }
 0x65f   : > { %v3306_v38 = vpack.c.bf16 %v3298_v27, %v3162_v16  ;;  %v3300_v26 = vcombine.low %v3261_v33, %v3293_v25  ;;  %v3163_v42 = vcombine.high %v3118_v9, %v3150_v23  ;;  %v3164_v31 = vcombine.low %v3125_v55, %v3157_v54 }
 0x660   : > { %7603 = vmatprep.mubr.msk.bf16.mxu1 %vm989_vm2, %v3302_v37  ;;  %v3301_v19 = vcombine.high %v3261_v33, %v3293_v25  ;;  %v3165_v43 = vcombine.high %v3125_v55, %v3157_v54 }
 0x661   : > { %7604 = vmatmul.mubr.msk.bf16.vlgmr.msra.gmra.mrb[72].mxu1 %vm989_vm2, %v3303_v10  ;;  %v3307_v48 = vpack.c.bf16 %v3299_v12, %v3163_v42  ;;  %v3308_v46 = vpack.c.bf16 %v3300_v26, %v3164_v31 }
 0x662   : > { %7607 = vmatprep.mubr.msk.bf16.mxu1 %vm989_vm2, %v3304_v15  ;;  %v3309_v7 = vpack.c.bf16 %v3301_v19, %v3165_v43 }
 0x669   : > { %7608 = vmatmul.mubr.msk.bf16.gmra.mrb[76].mxu1 %vm989_vm2, %v3305_v57 }
 0x66a   : > { %7611 = vmatprep.mubr.msk.bf16.mxu1 %vm989_vm2, %v3306_v38 }
 0x671   : > { %7612 = vmatmul.mubr.msk.bf16.gmra.mrb[80].mxu1 %vm989_vm2, %v3307_v48 }
 0x672   : > { %7615 = vmatprep.mubr.msk.bf16.mxu1 %vm989_vm2, %v3308_v46 }
 0x679   : > { %7616 = vmatmul.mubr.msk.bf16.gmra.mrb[84].mxu1 %vm989_vm2, %v3309_v7 }
 0x67a   : > { %7627 = vmatprep.mubr.msk.bf16.mxu1 %vm8250_vm3, %v8249_v17 }
 0x734   : > { %v7605_v63 = vpop.f32.mrb[72].mxu1 }
 0x735   : > { %v3380_v35 = vpop.f32.mrb[73].mxu1  ;;  %v9207_v62 = vpack.c.bf16 %v7605_v63, %v7605_v63 }
 0x736   : > { %v9201_v3 = vpack.c.bf16 %v3380_v35, %v3380_v35  ;;  %v7606_v45 = vpop.f32.mrb[74].mxu1 }
 0x737   : > { %v3383_v28 = vpop.f32.mrb[75].mxu1  ;;  %v9211_v30 = vpack.c.bf16 %v7606_v45, %v7606_v45 }
 0x738   : > { %v9203_v6 = vpack.c.bf16 %v3383_v28, %v3383_v28  ;;  %3460 = vrot.lane.b32.xlu0 %v9201_v3, %s8251_s23 }
 0x73a   : > { %3509 = vrot.lane.b32.xlu1 %v9203_v6, %s8251_s23 }
 0x73c   : > { %3558 = vrot.lane.b32.xlu0 %v9207_v62, %s8251_s23  ;;  %v7609_v21 = vpop.f32.mrb[76].mxu1 }
 0x73d   : > { %v3396_v20 = vpop.f32.mrb[77].mxu1  ;;  %v9223_v10 = vpack.c.bf16 %v7609_v21, %v7609_v21 }
 0x73e   : > { %v9215_v24 = vpack.c.bf16 %v3396_v20, %v3396_v20  ;;  %3607 = vrot.lane.b32.xlu1 %v9211_v30, %s8251_s23  ;;  %v7610_v52 = vpop.f32.mrb[78].mxu1 }
 0x73f   : > { %v3399_v41 = vpop.f32.mrb[79].mxu1  ;;  %v9227_v29 = vpack.c.bf16 %v7610_v52, %v7610_v52 }
 0x740   : > { %v9219_v37 = vpack.c.bf16 %v3399_v41, %v3399_v41  ;;  %3656 = vrot.lane.b32.xlu0 %v9215_v24, %s8251_s23 }
 0x742   : > { %3705 = vrot.lane.b32.xlu1 %v9219_v37, %s8251_s23 }
 0x744   : > { %3754 = vrot.lane.b32.xlu0 %v9223_v10, %s8251_s23  ;;  %v7613_v0 = vpop.f32.mrb[80].mxu1 }
 0x745   : > { %v3412_v11 = vpop.f32.mrb[81].mxu1  ;;  %v9239_v9 = vpack.c.bf16 %v7613_v0, %v7613_v0 }
 0x746   : > { %v9231_v15 = vpack.c.bf16 %v3412_v11, %v3412_v11  ;;  %3803 = vrot.lane.b32.xlu1 %v9227_v29, %s8251_s23  ;;  %v7614_v23 = vpop.f32.mrb[82].mxu1 }
 0x747   : > { %v3415_v39 = vpop.f32.mrb[83].mxu1  ;;  %v9243_v59 = vpack.c.bf16 %v7614_v23, %v7614_v23 }
 0x748   : > { %v9235_v8 = vpack.c.bf16 %v3415_v39, %v3415_v39  ;;  %3852 = vrot.lane.b32.xlu0 %v9231_v15, %s8251_s23 }
 0x74a   : > { %3901 = vrot.lane.b32.xlu1 %v9235_v8, %s8251_s23 }
 0x74c   : > { %3950 = vrot.lane.b32.xlu0 %v9239_v9, %s8251_s23  ;;  %v7617_v27 = vpop.f32.mrb[84].mxu1 }
 0x74d   : > { %v3428_v40 = vpop.f32.mrb[85].mxu1  ;;  %v9255_v22 = vpack.c.bf16 %v7617_v27, %v7617_v27 }
 0x74e   : > { %v9247_v1 = vpack.c.bf16 %v3428_v40, %v3428_v40  ;;  %3999 = vrot.lane.b32.xlu1 %v9243_v59, %s8251_s23  ;;  %v7618_v2 = vpop.f32.mrb[86].mxu1 }
 0x74f   : > { %v3431_v16 = vpop.f32.mrb[87].mxu1  ;;  %v9259_v25 = vpack.c.bf16 %v7618_v2, %v7618_v2 }
 0x750   : > { %v9251_v57 = vpack.c.bf16 %v3431_v16, %v3431_v16  ;;  %4048 = vrot.lane.b32.xlu0 %v9247_v1, %s8251_s23 }
 0x752   : > { %4097 = vrot.lane.b32.xlu1 %v9251_v57, %s8251_s23 }
 0x754   : > { %4146 = vrot.lane.b32.xlu0 %v9255_v22, %s8251_s23 }
 0x756   : > { %4195 = vrot.lane.b32.xlu1 %v9259_v25, %s8251_s23 }
 0x758   : > { %4483 = vrot.lane.b32.xlu0 %v9203_v6, %s8252_s30 }
 0x75a   : > { %4435 = vrot.lane.b32.xlu1 %v9201_v3, %s8252_s30 }
 0x75c   : > { %4579 = vrot.lane.b32.xlu0 %v9211_v30, %s8252_s30 }
 0x75e   : > { %4531 = vrot.lane.b32.xlu1 %v9207_v62, %s8252_s30 }
 0x760   : > { %4675 = vrot.lane.b32.xlu0 %v9219_v37, %s8252_s30 }
 0x762   : > { %4627 = vrot.lane.b32.xlu1 %v9215_v24, %s8252_s30 }
 0x764   : > { %4771 = vrot.lane.b32.xlu0 %v9227_v29, %s8252_s30 }
 0x766   : > { %4723 = vrot.lane.b32.xlu1 %v9223_v10, %s8252_s30 }
 0x76a   : > { %4819 = vrot.lane.b32.xlu1 %v9231_v15, %s8252_s30 }
 0x7aa   : > { %v3461_v38 = vpop.permute.xlu0 %3460 }
 0x7ab   : > { %v3466_v54 = vsel %vm989_vm2, %v3461_v38, 0 }
 0x7ac   : > { %7620 = vmatpush3.bf16.xpose.msra.mxu0 %v3466_v54  ;;  %v3510_v33 = vpop.permute.xlu1 %3509 }
 0x7ad   : > { %v3515_v12 = vsel %vm989_vm2, %v3510_v33, 0  ;;  %7631 = vmatprep.subr.bf16.mxu0 %v8249_v17 }
 0x7ae   : > { %7626 = vmatpush3.bf16.xpose.msra.mxu1 %v3515_v12  ;;  %v3559_v55 = vpop.permute.xlu0 %3558 }
 0x7af   : > { %7637 = vmatprep.subr.bf16.mxu1 %v8249_v17  ;;  %v3564_v42 = vsel %vm989_vm2, %v3559_v55, 0 }
 0x7b0   : > { %v3608_v26 = vpop.permute.xlu1 %3607 }
 0x7b1   : > { %v3613_v31 = vsel %vm989_vm2, %v3608_v26, 0 }
 0x7b2   : > { %v3657_v48 = vpop.permute.xlu0 %3656 }
 0x7b3   : > { %7622 = vmatmul.mubr.msk.bf16.vlgmr.msra.gmra.mrb[88].mxu0 %vm989_vm2, %v9201_v3  ;;  %v3662_v19 = vsel %vm989_vm2, %v3657_v48, 0 }
 0x7b4   : > { %7632 = vmatpush3.bf16.xpose.msra.mxu0 %v3564_v42  ;;  %7633 = vmatprep.mubr.msk.bf16.mxu0 %vm8250_vm3, %v8249_v17  ;;  %v3706_v46 = vpop.permute.xlu1 %3705 }
 0x7b5   : > { %7628 = vmatmul.mubr.msk.bf16.vlgmr.msra.gmra.mrb[88].mxu1 %vm989_vm2, %v9203_v6  ;;  %7643 = vmatprep.subr.bf16.mxu0 %v8249_v17  ;;  %v3711_v43 = vsel %vm989_vm2, %v3706_v46, 0 }
 0x7b6   : > { %7638 = vmatpush3.bf16.xpose.msra.mxu1 %v3613_v31  ;;  %7639 = vmatprep.mubr.msk.bf16.mxu1 %vm8250_vm3, %v8249_v17  ;;  %v3755_v7 = vpop.permute.xlu0 %3754 }
 0x7b7   : > { %7649 = vmatprep.subr.bf16.mxu1 %v8249_v17  ;;  %v3760_v35 = vsel %vm989_vm2, %v3755_v7, 0 }
 0x7b8   : > { %v3804_v63 = vpop.permute.xlu1 %3803 }
 0x7b9   : > { %v3809_v3 = vsel %vm989_vm2, %v3804_v63, 0 }
 0x7ba   : > { %v3853_v45 = vpop.permute.xlu0 %3852 }
 0x7bb   : > { %7634 = vmatmul.mubr.msk.bf16.vlgmr.msra.gmra.mrb[92].mxu0 %vm989_vm2, %v9207_v62  ;;  %v3858_v6 = vsel %vm989_vm2, %v3853_v45, 0 }
 0x7bc   : > { %7644 = vmatpush3.bf16.xpose.msra.mxu0 %v3662_v19  ;;  %7645 = vmatprep.mubr.msk.bf16.mxu0 %vm8250_vm3, %v8249_v17  ;;  %v3902_v28 = vpop.permute.xlu1 %3901 }
 0x7bd   : > { %7640 = vmatmul.mubr.msk.bf16.vlgmr.msra.gmra.mrb[92].mxu1 %vm989_vm2, %v9211_v30  ;;  %7655 = vmatprep.subr.bf16.mxu0 %v8249_v17  ;;  %v3907_v62 = vsel %vm989_vm2, %v3902_v28, 0 }
 0x7be   : > { %7650 = vmatpush3.bf16.xpose.msra.mxu1 %v3711_v43  ;;  %7651 = vmatprep.mubr.msk.bf16.mxu1 %vm8250_vm3, %v8249_v17  ;;  %v3951_v30 = vpop.permute.xlu0 %3950 }
 0x7bf   : > { %7661 = vmatprep.subr.bf16.mxu1 %v8249_v17  ;;  %v3956_v20 = vsel %vm989_vm2, %v3951_v30, 0 }
 0x7c0   : > { %v4000_v21 = vpop.permute.xlu1 %3999 }
 0x7c2   : > { %v4049_v52 = vpop.permute.xlu0 %4048 }
 0x7c3   : > { %7646 = vmatmul.mubr.msk.bf16.vlgmr.msra.gmra.mrb[96].mxu0 %vm989_vm2, %v9215_v24  ;;  %v4005_v24 = vsel %vm989_vm2, %v4000_v21, 0 }
 0x7c4   : > { %7656 = vmatpush3.bf16.xpose.msra.mxu0 %v3760_v35  ;;  %7657 = vmatprep.mubr.msk.bf16.mxu0 %vm8250_vm3, %v8249_v17  ;;  %v4098_v41 = vpop.permute.xlu1 %4097 }
 0x7c5   : > { %7652 = vmatmul.mubr.msk.bf16.vlgmr.msra.gmra.mrb[96].mxu1 %vm989_vm2, %v9219_v37  ;;  %7667 = vmatprep.subr.bf16.mxu0 %v8249_v17  ;;  %v4054_v37 = vsel %vm989_vm2, %v4049_v52, 0 }
 0x7c6   : > { %7662 = vmatpush3.bf16.xpose.msra.mxu1 %v3809_v3  ;;  %7663 = vmatprep.mubr.msk.bf16.mxu1 %vm8250_vm3, %v8249_v17 }
 0x7c7   : > { %7673 = vmatprep.subr.bf16.mxu1 %v8249_v17 }
 0x7c8   : > { %v4196_v0 = vpop.permute.xlu1 %4195 }
 0x7cb   : > { %7658 = vmatmul.mubr.msk.bf16.vlgmr.msra.gmra.mrb[100].mxu0 %vm989_vm2, %v9223_v10  ;;  %v4103_v10 = vsel %vm989_vm2, %v4098_v41, 0 }
 0x7cc   : > { %7668 = vmatpush3.bf16.xpose.msra.mxu0 %v3858_v6  ;;  %7669 = vmatprep.mubr.msk.bf16.mxu0 %vm8250_vm3, %v8249_v17  ;;  %v4436_v23 = vpop.permute.xlu1 %4435 }
 0x7cd   : > { %7664 = vmatmul.mubr.msk.bf16.vlgmr.msra.gmra.mrb[100].mxu1 %vm989_vm2, %v9227_v29  ;;  %7679 = vmatprep.subr.bf16.mxu0 %v8249_v17  ;;  %v4147_v29 = vpop.permute.xlu0 %4146  ;;  %v4441_v27 = vsel %vm2109_vm4, %v4436_v23, 0 }
 0x7ce   : > { %7674 = vmatpush3.bf16.xpose.msra.mxu1 %v3907_v62  ;;  %7675 = vmatprep.mubr.msk.bf16.mxu1 %vm8250_vm3, %v8249_v17  ;;  %v4152_v11 = vsel %vm989_vm2, %v4147_v29, 0 }
 0x7cf   : > { %7685 = vmatprep.subr.bf16.mxu1 %v8249_v17 }
 0x7d1   : > { %v4484_v39 = vpop.permute.xlu0 %4483 }
 0x7d2   : > { %v4489_v40 = vsel %vm2109_vm4, %v4484_v39, 0 }
 0x7d3   : > { %7670 = vmatmul.mubr.msk.bf16.vlgmr.msra.gmra.mrb[104].mxu0 %vm989_vm2, %v9231_v15  ;;  %v4201_v15 = vsel %vm989_vm2, %v4196_v0, 0 }
 0x7d4   : > { %7680 = vmatpush3.bf16.xpose.msra.mxu0 %v3956_v20  ;;  %7681 = vmatprep.mubr.msk.bf16.mxu0 %vm8250_vm3, %v8249_v17 }
 0x7d5   : > { %7676 = vmatmul.mubr.msk.bf16.vlgmr.msra.gmra.mrb[104].mxu1 %vm989_vm2, %v9235_v8  ;;  %7691 = vmatprep.subr.bf16.mxu0 %v8249_v17 }
 0x7d6   : > { %7686 = vmatpush3.bf16.xpose.msra.mxu1 %v4005_v24  ;;  %7687 = vmatprep.mubr.msk.bf16.mxu1 %vm8250_vm3, %v8249_v17 }
 0x7d7   : > { %7697 = vmatprep.subr.bf16.mxu1 %v8249_v17 }
 0x7db   : > { %7682 = vmatmul.mubr.msk.bf16.vlgmr.msra.gmra.mrb[108].mxu0 %vm989_vm2, %v9239_v9 }
 0x7dc   : > { %7692 = vmatpush3.bf16.xpose.msra.mxu0 %v4054_v37  ;;  %7693 = vmatprep.mubr.msk.bf16.mxu0 %vm8250_vm3, %v8249_v17 }
 0x7dd   : > { %7688 = vmatmul.mubr.msk.bf16.vlgmr.msra.gmra.mrb[108].mxu1 %vm989_vm2, %v9243_v59  ;;  %7703 = vmatprep.subr.bf16.mxu0 %v8249_v17 }
 0x7de   : > { %7698 = vmatpush3.bf16.xpose.msra.mxu1 %v4103_v10  ;;  %7699 = vmatprep.mubr.msk.bf16.mxu1 %vm8250_vm3, %v8249_v17 }
 0x7df   : > { %7709 = vmatprep.subr.bf16.mxu1 %v8249_v17 }
 0x7e3   : > { %7694 = vmatmul.mubr.msk.bf16.vlgmr.msra.gmra.mrb[112].mxu0 %vm989_vm2, %v9247_v1 }
 0x7e4   : > { %7704 = vmatpush3.bf16.xpose.msra.mxu0 %v4152_v11  ;;  %7705 = vmatprep.mubr.msk.bf16.mxu0 %vm8250_vm3, %v8249_v17 }
 0x7e5   : > { %7700 = vmatmul.mubr.msk.bf16.vlgmr.msra.gmra.mrb[112].mxu1 %vm989_vm2, %v9251_v57  ;;  %7715 = vmatprep.subr.bf16.mxu0 %v8249_v17 }
 0x7e6   : > { %7710 = vmatpush3.bf16.xpose.msra.mxu1 %v4201_v15  ;;  %7711 = vmatprep.mubr.msk.bf16.mxu1 %vm8250_vm3, %v8249_v17 }
 0x7e7   : > { %7721 = vmatprep.subr.bf16.mxu1 %v8249_v17 }
 0x7eb   : > { %7706 = vmatmul.mubr.msk.bf16.vlgmr.msra.gmra.mrb[116].mxu0 %vm989_vm2, %v9255_v22 }
 0x7ec   : > { %7716 = vmatpush3.bf16.msra.mxu0 %v4441_v27  ;;  %7717 = vmatprep.mubr.msk.bf16.mxu0 %vm8250_vm3, %v8249_v17 }
 0x7ed   : > { %7712 = vmatmul.mubr.msk.bf16.vlgmr.msra.gmra.mrb[116].mxu1 %vm989_vm2, %v9259_v25  ;;  %7727 = vmatprep.subr.bf16.mxu0 %v8249_v17 }
 0x7ee   : > { %7722 = vmatpush3.bf16.msra.mxu1 %v4489_v40  ;;  %7723 = vmatprep.mubr.msk.bf16.mxu1 %vm8250_vm3, %v8249_v17 }
 0x7ef   : > { %7733 = vmatprep.subr.bf16.mxu1 %v8249_v17 }
 0x886   : > { %v9383_v2 = vpop.f32.mrb[88].mxu0 }
 0x887   : > { %v7623_v16 = vpop.f32.mrb[89].mxu0  ;;  %v4243_v38 = vsel %vm1911_vm5, %v9383_v2, -inf }
 0x888   : > { %v3505_v54 = vpop.f32.mrb[90].mxu0  ;;  %4244 = vmax.xlane.f32.xlu0 %v4243_v38  ;;  %v9387_v33 = vpop.f32.mrb[88].mxu1 }
 0x889   : > { %v7624_v12 = vpop.f32.mrb[91].mxu0  ;;  %v7629_v55 = vpop.f32.mrb[89].mxu1  ;;  %v4246_v26 = vsel %vm1911_vm5, %v9387_v33, -inf }
 0x88a   : > { %v3554_v42 = vpop.f32.mrb[90].mxu1  ;;  %4247 = vmax.xlane.f32.xlu1 %v4246_v26 }
 0x88b   : > { %v7630_v31 = vpop.f32.mrb[91].mxu1 }
 0x88e   : > { %v9391_v48 = vpop.f32.mrb[92].mxu0 }
 0x88f   : > { %v7635_v46 = vpop.f32.mrb[93].mxu0  ;;  %v4249_v19 = vsel %vm1911_vm5, %v9391_v48, -inf }
 0x890   : > { %v3603_v43 = vpop.f32.mrb[94].mxu0  ;;  %4250 = vmax.xlane.f32.xlu0 %v4249_v19  ;;  %v9395_v7 = vpop.f32.mrb[92].mxu1 }
 0x891   : > { %v7636_v63 = vpop.f32.mrb[95].mxu0  ;;  %v7641_v35 = vpop.f32.mrb[93].mxu1  ;;  %v4252_v28 = vsel %vm1911_vm5, %v9395_v7, -inf }
 0x892   : > { %v3652_v3 = vpop.f32.mrb[94].mxu1 }
 0x893   : > { %v7642_v45 = vpop.f32.mrb[95].mxu1 }
 0x894   : > { %4253 = vmax.xlane.f32.xlu0 %v4252_v28 }
 0x896   : > { %v9399_v6 = vpop.f32.mrb[96].mxu0 }
 0x897   : > { %v7647_v62 = vpop.f32.mrb[97].mxu0  ;;  %v4255_v30 = vsel %vm1911_vm5, %v9399_v6, -inf }
 0x898   : > { %v3701_v21 = vpop.f32.mrb[98].mxu0  ;;  %v9403_v20 = vpop.f32.mrb[96].mxu1  ;;  %4256 = vmax.xlane.f32.xlu1 %v4255_v30 }
 0x899   : > { %v7648_v24 = vpop.f32.mrb[99].mxu0  ;;  %v7653_v52 = vpop.f32.mrb[97].mxu1  ;;  %v4258_v41 = vsel %vm1911_vm5, %v9403_v20, -inf }
 0x89a   : > { %4259 = vmax.xlane.f32.xlu0 %v4258_v41  ;;  %v3750_v37 = vpop.f32.mrb[98].mxu1 }
 0x89b   : > { %v7654_v10 = vpop.f32.mrb[99].mxu1 }
 0x89e   : > { %v9407_v29 = vpop.f32.mrb[100].mxu0 }
 0x89f   : > { %v7659_v0 = vpop.f32.mrb[101].mxu0  ;;  %v4261_v11 = vsel %vm1911_vm5, %v9407_v29, -inf }
 0x8a0   : > { %v3799_v15 = vpop.f32.mrb[102].mxu0  ;;  %v9411_v23 = vpop.f32.mrb[100].mxu1  ;;  %4262 = vmax.xlane.f32.xlu1 %v4261_v11 }
 0x8a1   : > { %v7660_v39 = vpop.f32.mrb[103].mxu0  ;;  %v7665_v27 = vpop.f32.mrb[101].mxu1  ;;  %v4264_v40 = vsel %vm1911_vm5, %v9411_v23, -inf }
 0x8a2   : > { %4265 = vmax.xlane.f32.xlu0 %v4264_v40  ;;  %v3848_v16 = vpop.f32.mrb[102].mxu1 }
 0x8a3   : > { %v7666_v38 = vpop.f32.mrb[103].mxu1 }
 0x8a6   : > { %v9415_v54 = vpop.f32.mrb[104].mxu0 }
 0x8a7   : > { %v7671_v12 = vpop.f32.mrb[105].mxu0  ;;  %v4267_v55 = vsel %vm1911_vm5, %v9415_v54, -inf }
 0x8a8   : > { %v3897_v26 = vpop.f32.mrb[106].mxu0  ;;  %v9419_v42 = vpop.f32.mrb[104].mxu1  ;;  %4268 = vmax.xlane.f32.xlu1 %v4267_v55 }
 0x8a9   : > { %v7672_v31 = vpop.f32.mrb[107].mxu0  ;;  %v7677_v46 = vpop.f32.mrb[105].mxu1  ;;  %v4270_v19 = vsel %vm1911_vm5, %v9419_v42, -inf }
 0x8aa   : > { %4271 = vmax.xlane.f32.xlu0 %v4270_v19  ;;  %v3946_v43 = vpop.f32.mrb[106].mxu1 }
 0x8ab   : > { %v7678_v63 = vpop.f32.mrb[107].mxu1 }
 0x8ae   : > { %v9423_v35 = vpop.f32.mrb[108].mxu0 }
 0x8af   : > { %v7683_v3 = vpop.f32.mrb[109].mxu0  ;;  %v4273_v45 = vsel %vm1911_vm5, %v9423_v35, -inf }
 0x8b0   : > { %v3995_v28 = vpop.f32.mrb[110].mxu0  ;;  %v9427_v62 = vpop.f32.mrb[108].mxu1  ;;  %4274 = vmax.xlane.f32.xlu1 %v4273_v45 }
 0x8b1   : > { %v7684_v30 = vpop.f32.mrb[111].mxu0  ;;  %v7689_v21 = vpop.f32.mrb[109].mxu1  ;;  %v4276_v24 = vsel %vm1911_vm5, %v9427_v62, -inf }
 0x8b2   : > { %4277 = vmax.xlane.f32.xlu0 %v4276_v24  ;;  %v4044_v52 = vpop.f32.mrb[110].mxu1  ;;  %v9453_v28 = vpop.permute.xlu1 %4531 }
 0x8b3   : > { %v7690_v41 = vpop.f32.mrb[111].mxu1  ;;  %v9455_v30 = vpop.permute.xlu0 %4579 }
 0x8b6   : > { %v9431_v37 = vpop.f32.mrb[112].mxu0  ;;  %v9457_v21 = vpop.permute.xlu1 %4627 }
 0x8b7   : > { %v7695_v10 = vpop.f32.mrb[113].mxu0  ;;  %v4279_v0 = vsel %vm1911_vm5, %v9431_v37, -inf  ;;  %v9459_v24 = vpop.permute.xlu0 %4675 }
 0x8b8   : > { %v4093_v11 = vpop.f32.mrb[114].mxu0  ;;  %4280 = vmax.xlane.f32.xlu1 %v4279_v0  ;;  %v9435_v15 = vpop.f32.mrb[112].mxu1 }
 0x8b9   : > { %v7696_v39 = vpop.f32.mrb[115].mxu0  ;;  %v7701_v27 = vpop.f32.mrb[113].mxu1  ;;  %v4282_v40 = vsel %vm1911_vm5, %v9435_v15, -inf }
 0x8ba   : > { %4283 = vmax.xlane.f32.xlu0 %v4282_v40  ;;  %v4142_v16 = vpop.f32.mrb[114].mxu1  ;;  %v9461_v52 = vpop.permute.xlu1 %4723 }
 0x8bb   : > { %v7702_v38 = vpop.f32.mrb[115].mxu1  ;;  %v9463_v41 = vpop.permute.xlu0 %4771 }
 0x8be   : > { %v9439_v12 = vpop.f32.mrb[116].mxu0  ;;  %v9465_v10 = vpop.permute.xlu1 %4819 }
 0x8bf   : > { %v7707_v55 = vpop.f32.mrb[117].mxu0  ;;  %v4285_v26 = vsel %vm1911_vm5, %v9439_v12, -inf }
 0x8c0   : > { %v4191_v31 = vpop.f32.mrb[118].mxu0  ;;  %4286 = vmax.xlane.f32.xlu1 %v4285_v26  ;;  %v9443_v46 = vpop.f32.mrb[116].mxu1 }
 0x8c1   : > { %v7708_v19 = vpop.f32.mrb[119].mxu0  ;;  %v7713_v43 = vpop.f32.mrb[117].mxu1  ;;  %v4288_v63 = vsel %vm1911_vm5, %v9443_v46, -inf }
 0x8c2   : > { %4289 = vmax.xlane.f32.xlu0 %v4288_v63  ;;  %v4240_v3 = vpop.f32.mrb[118].mxu1 }
 0x8c3   : > { %v7714_v45 = vpop.f32.mrb[119].mxu1 }
 0x8d1   : > { %4915 = vrot.lane.b32.xlu1 %v9239_v9, %s8252_s30 }
 0x8d5   : > { %4963 = vrot.lane.b32.xlu1 %v9243_v59, %s8252_s30 }
 0x8d8   : > { %4867 = vrot.lane.b32.xlu0 %v9235_v8, %s8252_s30 }
 0x915   : > { %v4245_v9 = vpop.xlane.xlu0 %4244 }
 0x916   : > { %v4291_v59 = vsub.f32 %v9383_v2, %v4245_v9 }
 0x917   : > { %v4248_v0 = vpop.xlane.xlu1 %4247 }
 0x918   : > { %v4307_v11 = vmul.f32 1.442695, %v4291_v59  ;;  %v4292_v8 = vsub.f32 %v9387_v33, %v4248_v0 }
 0x91a   : > { %8042 = vpow2.f32 %v4307_v11  ;;  %v4309_v39 = vmul.f32 1.442695, %v4292_v8 }
 0x91c   : > { %8044 = vpow2.f32 %v4309_v39 }
 0x91d   : > { %v4251_v27 = vpop.xlane.xlu0 %4250 }
 0x91e   : > { %v4293_v40 = vsub.f32 %v9391_v48, %v4251_v27 }
 0x920   : > { %v4311_v16 = vmul.f32 1.442695, %v4293_v40 }
 0x921   : > { %v4254_v38 = vpop.xlane.xlu0 %4253 }
 0x922   : > { %8046 = vpow2.f32 %v4311_v16  ;;  %v4294_v55 = vsub.f32 %v9395_v7, %v4254_v38 }
 0x924   : > { %v9471_v26 = vpop.eup %8042  ;;  %v4313_v31 = vmul.f32 1.442695, %v4294_v55 }
 0x925   : > { %v4257_v19 = vpop.xlane.xlu1 %4256  ;;  %v4339_v2 = vsel %vm1911_vm5, %v9471_v26, 0.0 }
 0x926   : > { %v9475_v43 = vpop.eup %8044  ;;  %8048 = vpow2.f32 %v4313_v31  ;;  %v4295_v33 = vsub.f32 %v9399_v6, %v4257_v19  ;;  %4340 = vadd.xlane.f32.xlu1 %v4339_v2 }
 0x927   : > { %v4260_v63 = vpop.xlane.xlu0 %4259  ;;  %v4342_v48 = vsel %vm1911_vm5, %v9475_v43, 0.0 }
 0x928   : > { %v4315_v3 = vmul.f32 1.442695, %v4295_v33  ;;  %v4296_v7 = vsub.f32 %v9403_v20, %v4260_v63  ;;  %4343 = vadd.xlane.f32.xlu0 %v4342_v48 }
 0x92a   : > { %8050 = vpow2.f32 %v4315_v3  ;;  %v4317_v45 = vmul.f32 1.442695, %v4296_v7 }
 0x92c   : > { %v9481_v9 = vpop.eup %8046  ;;  %8052 = vpow2.f32 %v4317_v45 }
 0x92d   : > { %v4263_v59 = vpop.xlane.xlu1 %4262  ;;  %v4345_v0 = vsel %vm1911_vm5, %v9481_v9, 0.0 }
 0x92e   : > { %v4297_v6 = vsub.f32 %v9407_v29, %v4263_v59  ;;  %4346 = vadd.xlane.f32.xlu1 %v4345_v0 }
 0x92f   : > { %v4266_v11 = vpop.xlane.xlu0 %4265 }
 0x930   : > { %v9486_v8 = vpop.eup %8048  ;;  %v4319_v39 = vmul.f32 1.442695, %v4297_v6  ;;  %v4298_v27 = vsub.f32 %v9411_v23, %v4266_v11 }
 0x931   : > { %v4348_v20 = vsel %vm1911_vm5, %v9486_v8, 0.0 }
 0x932   : > { %8054 = vpow2.f32 %v4319_v39  ;;  %v4321_v40 = vmul.f32 1.442695, %v4298_v27  ;;  %4349 = vadd.xlane.f32.xlu0 %v4348_v20 }
 0x934   : > { %v9491_v16 = vpop.eup %8050  ;;  %8056 = vpow2.f32 %v4321_v40 }
 0x935   : > { %v4269_v38 = vpop.xlane.xlu1 %4268  ;;  %v4351_v29 = vsel %vm1911_vm5, %v9491_v16, 0.0 }
 0x936   : > { %v9495_v55 = vpop.eup %8052  ;;  %v4299_v31 = vsub.f32 %v9415_v54, %v4269_v38  ;;  %4352 = vadd.xlane.f32.xlu1 %v4351_v29 }
 0x937   : > { %v4272_v19 = vpop.xlane.xlu0 %4271  ;;  %v4354_v23 = vsel %vm1911_vm5, %v9495_v55, 0.0 }
 0x938   : > { %v4323_v2 = vmul.f32 1.442695, %v4299_v31  ;;  %v4300_v33 = vsub.f32 %v9419_v42, %v4272_v19  ;;  %4355 = vadd.xlane.f32.xlu0 %v4354_v23 }
 0x93a   : > { %8058 = vpow2.f32 %v4323_v2  ;;  %v4325_v63 = vmul.f32 1.442695, %v4300_v33 }
 0x93c   : > { %v9501_v48 = vpop.eup %8054  ;;  %8060 = vpow2.f32 %v4325_v63 }
 0x93d   : > { %v4275_v3 = vpop.xlane.xlu1 %4274  ;;  %v4357_v7 = vsel %vm1911_vm5, %v9501_v48, 0.0 }
 0x93e   : > { %v9505_v45 = vpop.eup %8056  ;;  %v4301_v54 = vsub.f32 %v9423_v35, %v4275_v3  ;;  %4358 = vadd.xlane.f32.xlu1 %v4357_v7 }
 0x93f   : > { %v4278_v59 = vpop.xlane.xlu0 %4277  ;;  %v4360_v0 = vsel %vm1911_vm5, %v9505_v45, 0.0 }
 0x940   : > { %v4327_v42 = vmul.f32 1.442695, %v4301_v54  ;;  %v4302_v6 = vsub.f32 %v9427_v62, %v4278_v59  ;;  %4361 = vadd.xlane.f32.xlu0 %v4360_v0 }
 0x942   : > { %8062 = vpow2.f32 %v4327_v42  ;;  %v4329_v11 = vmul.f32 1.442695, %v4302_v6 }
 0x944   : > { %v9511_v39 = vpop.eup %8058  ;;  %8064 = vpow2.f32 %v4329_v11 }
 0x945   : > { %v4363_v27 = vsel %vm1911_vm5, %v9511_v39, 0.0  ;;  %v4281_v31 = vpop.xlane.xlu1 %4280 }
 0x946   : > { %v9515_v20 = vpop.eup %8060  ;;  %4364 = vadd.xlane.f32.xlu1 %v4363_v27  ;;  %v4303_v23 = vsub.f32 %v9431_v37, %v4281_v31 }
 0x947   : > { %v4366_v35 = vsel %vm1911_vm5, %v9515_v20, 0.0  ;;  %v4284_v19 = vpop.xlane.xlu0 %4283 }
 0x948   : > { %4367 = vadd.xlane.f32.xlu0 %v4366_v35  ;;  %v4304_v33 = vsub.f32 %v9435_v15, %v4284_v19  ;;  %v4331_v3 = vmul.f32 1.442695, %v4303_v23 }
 0x94a   : > { %v4333_v54 = vmul.f32 1.442695, %v4304_v33  ;;  %8066 = vpow2.f32 %v4331_v3  ;;  %v4537_v3 = vsel %vm2109_vm4, %v9453_v28, 0 }
 0x94c   : > { %v9519_v40 = vpop.eup %8062  ;;  %8068 = vpow2.f32 %v4333_v54 }
 0x94d   : > { %v4369_v62 = vsel %vm1911_vm5, %v9519_v40, 0.0  ;;  %v4287_v2 = vpop.xlane.xlu1 %4286 }
 0x94e   : > { %v9523_v38 = vpop.eup %8064  ;;  %4370 = vadd.xlane.f32.xlu1 %v4369_v62  ;;  %v4305_v7 = vsub.f32 %v9439_v12, %v4287_v2 }
 0x94f   : > { %v4372_v29 = vsel %vm1911_vm5, %v9523_v38, 0.0  ;;  %v4290_v63 = vpop.xlane.xlu0 %4289 }
 0x950   : > { %4373 = vadd.xlane.f32.xlu0 %v4372_v29  ;;  %v4306_v59 = vsub.f32 %v9443_v46, %v4290_v63  ;;  %v4335_v0 = vmul.f32 1.442695, %v4305_v7 }
 0x951   : > { %v9555_v27 = vpop.permute.xlu1 %4915 }
 0x952   : > { %8070 = vpow2.f32 %v4335_v0 }
 0x953   : > { %v9559_v62 = vpop.permute.xlu0 %4867 }
 0x955   : > { %v9557_v35 = vpop.permute.xlu1 %4963 }
 0x95f   : > { %5059 = vrot.lane.b32.xlu1 %v9251_v57, %s8252_s30  ;;  %v4337_v57 = vmul.f32 1.442695, %v4306_v59 }
 0x961   : > { %8072 = vpow2.f32 %v4337_v57 }
 0x966   : > { %5011 = vrot.lane.b32.xlu0 %v9247_v1, %s8252_s30  ;;  %v9535_v1 = vpop.eup %8066 }
 0x967   : > { %v9537_v42 = vpop.eup %8068  ;;  %v4375_v37 = vsel %vm1911_vm5, %v9535_v1, 0.0 }
 0x968   : > { %v9541_v15 = vpop.eup %8070  ;;  %v4378_v12 = vsel %vm1911_vm5, %v9537_v42, 0.0 }
 0x969   : > { %v4381_v6 = vsel %vm1911_vm5, %v9541_v15, 0.0 }
 0x96b   : > { %v9545_v46 = vpop.eup %8072 }
 0x96c   : > { %v4384_v11 = vsel %vm1911_vm5, %v9545_v46, 0.0 }
 0x983   : > { %4376 = vadd.xlane.f32.xlu1 %v4375_v37 }
 0x985   : > { %4379 = vadd.xlane.f32.xlu0 %v4378_v12 }
 0x987   : > { %4382 = vadd.xlane.f32.xlu1 %v4381_v6 }
 0x989   : > { %4385 = vadd.xlane.f32.xlu0 %v4384_v11 }
 0x998   : > { %5155 = vrot.lane.b32.xlu1 %v9259_v25, %s8252_s30 }
 0x99f   : > { %5107 = vrot.lane.b32.xlu0 %v9255_v22, %s8252_s30  ;;  %s964_s30 = scalar_lea.vmem %s10052_s8, %s8526_s1 }
 0x9b3   : > { %v4341_v29 = vpop.xlane.xlu1 %4340 }
 0x9b4   : > { %8074 = vrcp.f32 %v4341_v29  ;;  %v4681_v29 = vsel %vm2109_vm4, %v9459_v24, 0 }
 0x9b5   : > { %v4344_v31 = vpop.xlane.xlu0 %4343 }
 0x9b6   : > { %8076 = vrcp.f32 %v4344_v31 }
 0x9bb   : > { %v4347_v19 = vpop.xlane.xlu1 %4346 }
 0x9bc   : > { %8078 = vrcp.f32 %v4347_v19 }
 0x9be   : > { %v8075_v23 = vpop.eup %8074 }
 0x9bf   : > { %v4403_v2 = vmul.f32 %v8075_v23, %v9471_v26  ;;  %v4350_v33 = vpop.xlane.xlu0 %4349  ;;  %v4585_v26 = vsel %vm2109_vm4, %v9455_v30, 0  ;;  %v4633_v30 = vsel %vm2109_vm4, %v9457_v21, 0  ;;  %v4729_v23 = vsel %vm2109_vm4, %v9461_v52, 0 }
 0x9c0   : > { %v8077_v25 = vpop.eup %8076  ;;  %8080 = vrcp.f32 %v4350_v33 }
 0x9c1   : > { %v4404_v22 = vmul.f32 %v8077_v25, %v9475_v43  ;;  %v4419_v63 = vpack.c.bf16 %v4403_v2, %v4403_v2 }
 0x9c3   : > { %7718 = vmatmul.mubr.msk.bf16.vlgmr.msra.gmra.mrb[120].mxu0 %vm1911_vm5, %v4419_v63  ;;  %v4353_v7 = vpop.xlane.xlu1 %4352  ;;  %v4420_v54 = vpack.c.bf16 %v4404_v22, %v4404_v22 }
 0x9c4   : > { %7728 = vmatpush3.bf16.msra.mxu0 %v4537_v3  ;;  %8082 = vrcp.f32 %v4353_v7  ;;  %7729 = vmatprep.mubr.msk.bf16.mxu0 %vm8250_vm3, %v8249_v17  ;;  %v4825_v3 = vsel %vm2109_vm4, %v9465_v10, 0 }
 0x9c5   : > { %7724 = vmatmul.mubr.msk.bf16.vlgmr.msra.gmra.mrb[120].mxu1 %vm1911_vm5, %v4420_v54  ;;  %v4356_v59 = vpop.xlane.xlu0 %4355  ;;  %7739 = vmatprep.subr.bf16.mxu0 %v8249_v17 }
 0x9c6   : > { %v8079_v43 = vpop.eup %8078  ;;  %7734 = vmatpush3.bf16.msra.mxu1 %v4585_v26  ;;  %8084 = vrcp.f32 %v4356_v59  ;;  %7735 = vmatprep.mubr.msk.bf16.mxu1 %vm8250_vm3, %v8249_v17 }
 0x9c7   : > { %v4405_v28 = vmul.f32 %v8079_v43, %v9481_v9  ;;  %7745 = vmatprep.subr.bf16.mxu1 %v8249_v17 }
 0x9c9   : > { %v4421_v0 = vpack.c.bf16 %v4405_v28, %v4405_v28  ;;  %v4921_v28 = vsel %vm2109_vm4, %v9555_v27, 0 }
 0x9ca   : > { %v8081_v57 = vpop.eup %8080 }
 0x9cb   : > { %v4406_v37 = vmul.f32 %v8081_v57, %v9486_v8  ;;  %7730 = vmatmul.mubr.msk.bf16.vlgmr.msra.gmra.mrb[124].mxu0 %vm1911_vm5, %v4421_v0  ;;  %v4359_v12 = vpop.xlane.xlu1 %4358  ;;  %v4969_v0 = vsel %vm2109_vm4, %v9557_v35, 0 }
 0x9cc   : > { %7740 = vmatpush3.bf16.msra.mxu0 %v4633_v30  ;;  %8086 = vrcp.f32 %v4359_v12  ;;  %7741 = vmatprep.mubr.msk.bf16.mxu0 %vm8250_vm3, %v8249_v17 }
 0x9cd   : > { %v4362_v6 = vpop.xlane.xlu0 %4361  ;;  %v4422_v11 = vpack.c.bf16 %v4406_v37, %v4406_v37  ;;  %7751 = vmatprep.subr.bf16.mxu0 %v8249_v17 }
 0x9ce   : > { %v8083_v9 = vpop.eup %8082  ;;  %8088 = vrcp.f32 %v4362_v6 }
 0x9cf   : > { %v4407_v21 = vmul.f32 %v8083_v9, %v9491_v16  ;;  %7736 = vmatmul.mubr.msk.bf16.vlgmr.msra.gmra.mrb[124].mxu1 %vm1911_vm5, %v4422_v11 }
 0x9d0   : > { %v8085_v8 = vpop.eup %8084  ;;  %7746 = vmatpush3.bf16.msra.mxu1 %v4681_v29  ;;  %7747 = vmatprep.mubr.msk.bf16.mxu1 %vm8250_vm3, %v8249_v17 }
 0x9d1   : > { %v4408_v31 = vmul.f32 %v8085_v8, %v9495_v55  ;;  %v4423_v19 = vpack.c.bf16 %v4407_v21, %v4407_v21  ;;  %7757 = vmatprep.subr.bf16.mxu1 %v8249_v17  ;;  %v4777_v55 = vsel %vm2109_vm4, %v9463_v41, 0 }
 0x9d3   : > { %7742 = vmatmul.mubr.msk.bf16.vlgmr.msra.gmra.mrb[128].mxu0 %vm1911_vm5, %v4423_v19  ;;  %v4365_v24 = vpop.xlane.xlu1 %4364  ;;  %v4424_v2 = vpack.c.bf16 %v4408_v31, %v4408_v31 }
 0x9d4   : > { %7752 = vmatpush3.bf16.msra.mxu0 %v4729_v23  ;;  %8090 = vrcp.f32 %v4365_v24  ;;  %7753 = vmatprep.mubr.msk.bf16.mxu0 %vm8250_vm3, %v8249_v17 }
 0x9d5   : > { %v4368_v16 = vpop.xlane.xlu0 %4367  ;;  %7763 = vmatprep.subr.bf16.mxu0 %v8249_v17 }
 0x9d6   : > { %v8087_v33 = vpop.eup %8086  ;;  %8092 = vrcp.f32 %v4368_v16  ;;  %v7970_v16 = vld [vmem:[%s964_s30] sm:$0xff]  }
 0x9d7   : > { %v4409_v25 = vmul.f32 %v8087_v33, %v9501_v48  ;;  %7748 = vmatmul.mubr.msk.bf16.vlgmr.msra.gmra.mrb[128].mxu1 %vm1911_vm5, %v4424_v2 }
 0x9d8   : > { %v8089_v52 = vpop.eup %8088  ;;  %7758 = vmatpush3.bf16.msra.mxu1 %v4777_v55  ;;  %7759 = vmatprep.mubr.msk.bf16.mxu1 %vm8250_vm3, %v8249_v17 }
 0x9d9   : > { %v4410_v22 = vmul.f32 %v8089_v52, %v9505_v45  ;;  %v4425_v63 = vpack.c.bf16 %v4409_v25, %v4409_v25  ;;  %7769 = vmatprep.subr.bf16.mxu1 %v8249_v17  ;;  %v4873_v45 = vsel %vm2109_vm4, %v9559_v62, 0 }
 0x9db   : > { %7754 = vmatmul.mubr.msk.bf16.vlgmr.msra.gmra.mrb[132].mxu0 %vm1911_vm5, %v4425_v63  ;;  %v4371_v41 = vpop.xlane.xlu1 %4370  ;;  %v4426_v7 = vpack.c.bf16 %v4410_v22, %v4410_v22 }
 0x9dc   : > { %7764 = vmatpush3.bf16.msra.mxu0 %v4825_v3  ;;  %8094 = vrcp.f32 %v4371_v41  ;;  %7765 = vmatprep.mubr.msk.bf16.mxu0 %vm8250_vm3, %v8249_v17  ;;  %v7971_v3 = vld [vmem:[%s964_s30 + $0x8] sm:$0xff]  }
 0x9dd   : > { %v4374_v48 = vpop.xlane.xlu0 %4373  ;;  %7775 = vmatprep.subr.bf16.mxu0 %v8249_v17 }
 0x9de   : > { %v8091_v54 = vpop.eup %8090  ;;  %8096 = vrcp.f32 %v4374_v48 }
 0x9df   : > { %v4411_v26 = vmul.f32 %v8091_v54, %v9511_v39  ;;  %7760 = vmatmul.mubr.msk.bf16.vlgmr.msra.gmra.mrb[132].mxu1 %vm1911_vm5, %v4426_v7  ;;  %v5060_v35 = vpop.permute.xlu1 %5059 }
 0x9e0   : > { %v8093_v10 = vpop.eup %8092  ;;  %7770 = vmatpush3.bf16.msra.mxu1 %v4873_v45  ;;  %7771 = vmatprep.mubr.msk.bf16.mxu1 %vm8250_vm3, %v8249_v17  ;;  %v5065_v6 = vsel %vm2109_vm4, %v5060_v35, 0 }
 0x9e1   : > { %v4412_v59 = vmul.f32 %v8093_v10, %v9515_v20  ;;  %v4427_v43 = vpack.c.bf16 %v4411_v26, %v4411_v26  ;;  %7781 = vmatprep.subr.bf16.mxu1 %v8249_v17  ;;  %v5012_v30 = vpop.permute.xlu0 %5011 }
 0x9e2   : > { %v5017_v12 = vsel %vm2109_vm4, %v5012_v30, 0 }
 0x9e3   : > { %7766 = vmatmul.mubr.msk.bf16.vlgmr.msra.gmra.mrb[136].mxu0 %vm1911_vm5, %v4427_v43  ;;  %v4428_v39 = vpack.c.bf16 %v4412_v59, %v4412_v59 }
 0x9e4   : > { %7776 = vmatpush3.bf16.msra.mxu0 %v4921_v28  ;;  %7777 = vmatprep.mubr.msk.bf16.mxu0 %vm8250_vm3, %v8249_v17 }
 0x9e5   : > { %7787 = vmatprep.subr.bf16.mxu0 %v8249_v17 }
 0x9e6   : > { %v8095_v62 = vpop.eup %8094 }
 0x9e7   : > { %v4413_v20 = vmul.f32 %v8095_v62, %v9519_v40  ;;  %7772 = vmatmul.mubr.msk.bf16.vlgmr.msra.gmra.mrb[136].mxu1 %vm1911_vm5, %v4428_v39 }
 0x9e8   : > { %v8097_v57 = vpop.eup %8096  ;;  %7782 = vmatpush3.bf16.msra.mxu1 %v4969_v0  ;;  %7783 = vmatprep.mubr.msk.bf16.mxu1 %vm8250_vm3, %v8249_v17 }
 0x9e9   : > { %v4414_v27 = vmul.f32 %v8097_v57, %v9523_v38  ;;  %v4429_v37 = vpack.c.bf16 %v4413_v20, %v4413_v20  ;;  %7793 = vmatprep.subr.bf16.mxu1 %v8249_v17 }
 0x9eb   : > { %7778 = vmatmul.mubr.msk.bf16.vlgmr.msra.gmra.mrb[140].mxu0 %vm1911_vm5, %v4429_v37  ;;  %v4430_v40 = vpack.c.bf16 %v4414_v27, %v4414_v27 }
 0x9ec   : > { %7788 = vmatpush3.bf16.msra.mxu0 %v5017_v12  ;;  %7789 = vmatprep.mubr.msk.bf16.mxu0 %vm8250_vm3, %v8249_v17 }
 0x9ed   : > { %7799 = vmatprep.subr.bf16.mxu0 %v8249_v17 }
 0x9ef   : > { %7784 = vmatmul.mubr.msk.bf16.vlgmr.msra.gmra.mrb[140].mxu1 %vm1911_vm5, %v4430_v40 }
 0x9f0   : > { %7794 = vmatpush3.bf16.msra.mxu1 %v5065_v6  ;;  %7795 = vmatprep.mubr.msk.bf16.mxu1 %vm8250_vm3, %v8249_v17 }
 0x9f1   : > { %7805 = vmatprep.subr.bf16.mxu1 %v8249_v17 }
 0xa10   : > { %v4377_v38 = vpop.xlane.xlu1 %4376 }
 0xa11   : > { %8098 = vrcp.f32 %v4377_v38 }
 0xa12   : > { %v4380_v11 = vpop.xlane.xlu0 %4379 }
 0xa13   : > { %8100 = vrcp.f32 %v4380_v11 }
 0xa14   : > { %v4383_v9 = vpop.xlane.xlu1 %4382 }
 0xa15   : > { %8102 = vrcp.f32 %v4383_v9 }
 0xa16   : > { %v4386_v29 = vpop.xlane.xlu0 %4385 }
 0xa17   : > { %8104 = vrcp.f32 %v4386_v29 }
 0xa18   : > { %v5156_v33 = vpop.permute.xlu1 %5155 }
 0xa19   : > { %v5161_v22 = vsel %vm2109_vm4, %v5156_v33, 0 }
 0xa1a   : > { %v5108_v19 = vpop.permute.xlu0 %5107 }
 0xa1b   : > { %v8099_v21 = vpop.eup %8098  ;;  %v5113_v55 = vsel %vm2109_vm4, %v5108_v19, 0 }
 0xa1c   : > { %v4415_v8 = vmul.f32 %v8099_v21, %v9535_v1 }
 0xa1d   : > { %v8101_v31 = vpop.eup %8100 }
 0xa1e   : > { %v4416_v23 = vmul.f32 %v8101_v31, %v9537_v42  ;;  %v4431_v24 = vpack.c.bf16 %v4415_v8, %v4415_v8 }
 0xa1f   : > { %v8103_v2 = vpop.eup %8102 }
 0xa20   : > { %7790 = vmatmul.mubr.msk.bf16.vlgmr.msra.gmra.mrb[144].mxu0 %vm1911_vm5, %v4431_v24  ;;  %v4432_v25 = vpack.c.bf16 %v4416_v23, %v4416_v23  ;;  %v4417_v1 = vmul.f32 %v8103_v2, %v9541_v15 }
 0xa21   : > { %v8105_v52 = vpop.eup %8104  ;;  %7800 = vmatpush3.bf16.msra.mxu0 %v5113_v55  ;;  %7801 = vmatprep.mubr.msk.bf16.mxu0 %vm8250_vm3, %v8249_v17 }
 0xa22   : > { %7796 = vmatmul.mubr.msk.bf16.vlgmr.msra.gmra.mrb[144].mxu1 %vm1911_vm5, %v4432_v25  ;;  %7811 = vmatprep.subr.bf16.mxu0 %v7970_v16  ;;  %v4418_v42 = vmul.f32 %v8105_v52, %v9545_v46  ;;  %v4433_v63 = vpack.c.bf16 %v4417_v1, %v4417_v1 }
 0xa23   : > { %7806 = vmatpush3.bf16.msra.mxu1 %v5161_v22  ;;  %7807 = vmatprep.mubr.msk.bf16.mxu1 %vm8250_vm3, %v8249_v17 }
 0xa24   : > { %7915 = vmatprep.subr.bf16.mxu1 %v7970_v16  ;;  %v4434_v41 = vpack.c.bf16 %v4418_v42, %v4418_v42 }
 0xa28   : > { %7802 = vmatmul.mubr.msk.bf16.vlgmr.msra.gmra.mrb[148].mxu0 %vm1911_vm5, %v4433_v63 }
 0xa29   : > { %7812 = vmatpush3.bf16.msra.mxu0 %v7970_v16 }
 0xa2a   : > { %7808 = vmatmul.mubr.msk.bf16.vlgmr.msra.gmra.mrb[148].mxu1 %vm1911_vm5, %v4434_v41  ;;  %7813 = vmatprep.subr.bf16.mxu0 %v7971_v3 }
 0xa2b   : > { %7917 = vmatpush3.bf16.msra.mxu1 %v7970_v16 }
 0xa2c   : > { %7916 = vmatprep.subr.bf16.mxu1 %v7971_v3 }
 0xa2d   : > { %7814 = vmatpush3.bf16.msra.mxu0 %v7971_v3 }
 0xa2f   : > { %7918 = vmatpush3.bf16.msra.mxu1 %v7971_v3 }
 0xa96   : > { %v4477_v15 = vpop.f32.mrb[120].mxu0 }
 0xa97   : > { %v7719_v48 = vpop.f32.mrb[121].mxu0 }
 0xa98   : > { %v4480_v7 = vpop.f32.mrb[122].mxu0  ;;  %v4525_v17 = vpop.f32.mrb[120].mxu1 }
 0xa99   : > { %v5203_v54 = vpack.c.bf16 %v4525_v17, %v4477_v15  ;;  %v7720_v46 = vpop.f32.mrb[123].mxu0  ;;  %v7725_v45 = vpop.f32.mrb[121].mxu1 }
 0xa9a   : > { %v4528_v26 = vpop.f32.mrb[122].mxu1 }
 0xa9b   : > { %v7726_v10 = vpop.f32.mrb[123].mxu1  ;;  %7815 = vmatprep.mubr.msk.bf16.mxu0 %vm989_vm2, %v5203_v54 }
 0xa9e   : > { %v4573_v59 = vpop.f32.mrb[124].mxu0 }
 0xa9f   : > { %v7731_v43 = vpop.f32.mrb[125].mxu0 }
 0xaa0   : > { %v4576_v28 = vpop.f32.mrb[126].mxu0 }
 0xaa1   : > { %v7732_v39 = vpop.f32.mrb[127].mxu0 }
 0xaa2   : > { %v4621_v62 = vpop.f32.mrb[124].mxu1 }
 0xaa3   : > { %v5204_v0 = vpack.c.bf16 %v4621_v62, %v4573_v59  ;;  %v7737_v20 = vpop.f32.mrb[125].mxu1 }
 0xaa4   : > { %v4624_v57 = vpop.f32.mrb[126].mxu1 }
 0xaa5   : > { %v7738_v30 = vpop.f32.mrb[127].mxu1  ;;  %7816 = vmatmul.mubr.msk.bf16.vlgmr.msra.gmra.mrb[152].mxu0 %vm989_vm2, %v5204_v0 }
 0xaa6   : > { %v4669_v27 = vpop.f32.mrb[128].mxu0 }
 0xaa7   : > { %v7743_v37 = vpop.f32.mrb[129].mxu0 }
 0xaa8   : > { %v4672_v12 = vpop.f32.mrb[130].mxu0 }
 0xaa9   : > { %v7744_v35 = vpop.f32.mrb[131].mxu0 }
 0xaaa   : > { %v4717_v40 = vpop.f32.mrb[128].mxu1 }
 0xaab   : > { %v5205_v6 = vpack.c.bf16 %v4717_v40, %v4669_v27  ;;  %v7749_v38 = vpop.f32.mrb[129].mxu1 }
 0xaac   : > { %v4720_v11 = vpop.f32.mrb[130].mxu1 }
 0xaad   : > { %v7750_v9 = vpop.f32.mrb[131].mxu1  ;;  %7819 = vmatprep.mubr.msk.bf16.mxu0 %vm989_vm2, %v5205_v6 }
 0xaae   : > { %v4765_v29 = vpop.f32.mrb[132].mxu0  ;;  %v7972_v9 = vld [vmem:[%s5658_s18] sm:$0xff]  }
 0xaaf   : > { %v7755_v21 = vpop.f32.mrb[133].mxu0  ;;  %7831 = vmatprep.subr.bf16.mxu1 %v7972_v9 }
 0xab0   : > { %v4768_v8 = vpop.f32.mrb[134].mxu0  ;;  %v7974_v21 = vld [vmem:[%s5658_s18 + $0x10] sm:$0xff]  }
 0xab1   : > { %v7756_v31 = vpop.f32.mrb[135].mxu0  ;;  %v7975_v8 = vld [vmem:[%s5658_s18 + $0x18] sm:$0xff]  }
 0xab2   : > { %v4813_v19 = vpop.f32.mrb[132].mxu1 }
 0xab3   : > { %v5206_v23 = vpack.c.bf16 %v4813_v19, %v4765_v29  ;;  %v7761_v24 = vpop.f32.mrb[133].mxu1  ;;  %v7973_v29 = vld [vmem:[%s5658_s18 + $0x8] sm:$0xff]   ;;  %s10069_s18 = sld [smem:[#allocation6_spill]] (!%p7124_p5) }
 0xab4   : > { %v4816_v16 = vpop.f32.mrb[134].mxu1 }
 0xab5   : > { %v7762_v2 = vpop.f32.mrb[135].mxu1  ;;  %7820 = vmatmul.mubr.msk.bf16.gmra.mrb[156].mxu0 %vm989_vm2, %v5206_v23 }
 0xab6   : > { %v4861_v33 = vpop.f32.mrb[136].mxu0 }
 0xab7   : > { %v7767_v55 = vpop.f32.mrb[137].mxu0 }
 0xab8   : > { %v4864_v25 = vpop.f32.mrb[138].mxu0 }
 0xab9   : > { %v7768_v52 = vpop.f32.mrb[139].mxu0 }
 0xaba   : > { %v4909_v1 = vpop.f32.mrb[136].mxu1 }
 0xabb   : > { %v5207_v22 = vpack.c.bf16 %v4909_v1, %v4861_v33  ;;  %v7773_v42 = vpop.f32.mrb[137].mxu1 }
 0xabc   : > { %v4912_v63 = vpop.f32.mrb[138].mxu1 }
 0xabd   : > { %v7774_v3 = vpop.f32.mrb[139].mxu1  ;;  %7823 = vmatprep.mubr.msk.bf16.mxu1 %vm989_vm2, %v5207_v22 }
 0xabe   : > { %v4957_v41 = vpop.f32.mrb[140].mxu0 }
 0xabf   : > { %v7779_v15 = vpop.f32.mrb[141].mxu0 }
 0xac0   : > { %v4960_v48 = vpop.f32.mrb[142].mxu0 }
 0xac1   : > { %v7780_v7 = vpop.f32.mrb[143].mxu0 }
 0xac2   : > { %v5005_v17 = vpop.f32.mrb[140].mxu1 }
 0xac3   : > { %v5208_v54 = vpack.c.bf16 %v5005_v17, %v4957_v41  ;;  %v7785_v46 = vpop.f32.mrb[141].mxu1 }
 0xac4   : > { %v5008_v45 = vpop.f32.mrb[142].mxu1 }
 0xac5   : > { %v7786_v26 = vpop.f32.mrb[143].mxu1  ;;  %7824 = vmatmul.mubr.msk.bf16.vlgmr.msra.gmra.mrb[152].mxu1 %vm989_vm2, %v5208_v54 }
 0xac6   : > { %7832 = vmatpush3.bf16.msra.mxu1 %v7972_v9 }
 0xac7   : > { %7833 = vmatprep.subr.bf16.mxu1 %v7973_v29 }
 0xaca   : > { %7834 = vmatpush3.bf16.msra.mxu1 %v7973_v29 }
 0xacb   : > { %7835 = vmatprep.subr.bf16.mxu1 %v7974_v21 }
 0xace   : > { %7836 = vmatpush3.bf16.msra.mxu1 %v7974_v21 }
 0xacf   : > { %7837 = vmatprep.subr.bf16.mxu1 %v7975_v8 }
 0xad2   : > { %7838 = vmatpush3.bf16.msra.mxu1 %v7975_v8 }
 0xaf3   : > { %v5053_v10 = vpop.f32.mrb[144].mxu0 }
 0xaf4   : > { %v7791_v59 = vpop.f32.mrb[145].mxu0 }
 0xaf5   : > { %v5056_v43 = vpop.f32.mrb[146].mxu0  ;;  %v5101_v28 = vpop.f32.mrb[144].mxu1 }
 0xaf6   : > { %v5209_v39 = vpack.c.bf16 %v5101_v28, %v5053_v10  ;;  %v7792_v62 = vpop.f32.mrb[147].mxu0  ;;  %v7797_v0 = vpop.f32.mrb[145].mxu1 }
 0xaf7   : > { %v5104_v20 = vpop.f32.mrb[146].mxu1 }
 0xaf8   : > { %v7798_v57 = vpop.f32.mrb[147].mxu1  ;;  %7827 = vmatprep.mubr.msk.bf16.mxu1 %vm989_vm2, %v5209_v39 }
 0xafb   : > { %v5149_v30 = vpop.f32.mrb[148].mxu0 }
 0xafc   : > { %v7803_v27 = vpop.f32.mrb[149].mxu0 }
 0xafd   : > { %v5152_v37 = vpop.f32.mrb[150].mxu0  ;;  %v5197_v12 = vpop.f32.mrb[148].mxu1 }
 0xafe   : > { %v5210_v35 = vpack.c.bf16 %v5197_v12, %v5149_v30  ;;  %v7804_v40 = vpop.f32.mrb[151].mxu0  ;;  %v7809_v6 = vpop.f32.mrb[149].mxu1 }
 0xaff   : > { %v5200_v38 = vpop.f32.mrb[150].mxu1 }
 0xb00   : > { %v7810_v11 = vpop.f32.mrb[151].mxu1  ;;  %7828 = vmatmul.mubr.msk.bf16.gmra.mrb[156].mxu1 %vm989_vm2, %v5210_v35 }
 0xb78   : > { %v7817_v31 = vpop.f32.mrb[152].mxu0 }
 0xb79   : > { %v5281_v19 = vpop.f32.mrb[153].mxu0 }
 0xb7a   : > { %v7818_v23 = vpop.f32.mrb[154].mxu0 }
 0xb7b   : > { %v5284_v24 = vpop.f32.mrb[155].mxu0 }
 0xb88   : > { %v7821_v16 = vpop.f32.mrb[156].mxu0 }
 0xb89   : > { %v5360_v2 = vcombine.low %v7817_v31, %v7821_v16  ;;  %v5361_v33 = vcombine.high %v7817_v31, %v7821_v16  ;;  %v5297_v55 = vpop.f32.mrb[157].mxu0 }
 0xb8a   : > { %v5344_v25 = vcombine.low %v5281_v19, %v5297_v55  ;;  %v5345_v52 = vcombine.high %v5281_v19, %v5297_v55  ;;  %v7822_v1 = vpop.f32.mrb[158].mxu0 }
 0xb8b   : > { %v5368_v22 = vrot.slane %v5360_v2, %v9113_v53  ;;  %v5375_v42 = vrot.slane %v5361_v33, %v9113_v53  ;;  %v5496_v63 = vcombine.low %v7818_v23, %v7822_v1  ;;  %v5497_v3 = vcombine.high %v7818_v23, %v7822_v1  ;;  %v5300_v41 = vpop.f32.mrb[159].mxu0 }
 0xb8c   : > { %v5352_v15 = vrot.slane %v5344_v25, %v9113_v53  ;;  %v5359_v48 = vrot.slane %v5345_v52, %v9113_v53  ;;  %v5480_v7 = vcombine.low %v5284_v24, %v5300_v41  ;;  %v5481_v17 = vcombine.high %v5284_v24, %v5300_v41 }
 0xb8d   : > { %v5504_v54 = vrot.slane %v5496_v63, %v9113_v53  ;;  %v5511_v46 = vrot.slane %v5497_v3, %v9113_v53 }
 0xb8e   : > { %v5408_v45 = vcombine.low %v5352_v15, %v5368_v22  ;;  %v5409_v26 = vcombine.high %v5352_v15, %v5368_v22  ;;  %v5424_v10 = vcombine.low %v5359_v48, %v5375_v42  ;;  %v5425_v59 = vcombine.high %v5359_v48, %v5375_v42 }
 0xb8f   : > { %v5488_v43 = vrot.slane %v5480_v7, %v9113_v53  ;;  %v5495_v28 = vrot.slane %v5481_v17, %v9113_v53 }
 0xb90   : > { %v5416_v35 = vrot.slane %v5408_v45, %v9137_v14  ;;  %v5423_v40 = vrot.slane %v5409_v26, %v9137_v14  ;;  %v5432_v9 = vrot.slane %v5424_v10, %v9137_v14  ;;  %v5439_v29 = vrot.slane %v5425_v59, %v9137_v14 }
 0xb91   : > { %v5544_v39 = vcombine.low %v5488_v43, %v5504_v54  ;;  %v5545_v62 = vcombine.high %v5488_v43, %v5504_v54  ;;  %v5560_v0 = vcombine.low %v5495_v28, %v5511_v46  ;;  %v5561_v20 = vcombine.high %v5495_v28, %v5511_v46 }
 0xb93   : > { %v5552_v1 = vrot.slane %v5544_v39, %v9137_v14  ;;  %v5559_v22 = vrot.slane %v5545_v62, %v9137_v14  ;;  %v5568_v7 = vrot.slane %v5560_v0, %v9137_v14  ;;  %v5575_v17 = vrot.slane %v5561_v20, %v9137_v14 }
 0xb98   : > { %v7825_v57 = vpop.f32.mrb[152].mxu1 }
 0xb99   : > { %v5313_v30 = vpop.f32.mrb[153].mxu1 }
 0xb9a   : > { %v7826_v27 = vpop.f32.mrb[154].mxu1 }
 0xb9b   : > { %v5316_v37 = vpop.f32.mrb[155].mxu1 }
 0xbd3   : > { %v7829_v12 = vpop.f32.mrb[156].mxu1 }
 0xbd4   : > { %v5392_v6 = vcombine.low %v7825_v57, %v7829_v12  ;;  %v5393_v38 = vcombine.high %v7825_v57, %v7829_v12  ;;  %v5329_v11 = vpop.f32.mrb[157].mxu1 }
 0xbd5   : > { %v5376_v21 = vcombine.low %v5313_v30, %v5329_v11  ;;  %v5377_v8 = vcombine.high %v5313_v30, %v5329_v11  ;;  %v7830_v31 = vpop.f32.mrb[158].mxu1 }
 0xbd6   : > { %v5400_v19 = vrot.slane %v5392_v6, %v9113_v53  ;;  %v5407_v23 = vrot.slane %v5393_v38, %v9113_v53  ;;  %v5528_v24 = vcombine.low %v7826_v27, %v7830_v31  ;;  %v5529_v16 = vcombine.high %v7826_v27, %v7830_v31  ;;  %v5332_v2 = vpop.f32.mrb[159].mxu1 }
 0xbd7   : > { %v5384_v33 = vrot.slane %v5376_v21, %v9113_v53  ;;  %v5391_v55 = vrot.slane %v5377_v8, %v9113_v53  ;;  %v5512_v25 = vcombine.low %v5316_v37, %v5332_v2  ;;  %v5513_v52 = vcombine.high %v5316_v37, %v5332_v2 }
 0xbd8   : > { %v5536_v42 = vrot.slane %v5528_v24, %v9113_v53  ;;  %v5543_v63 = vrot.slane %v5529_v16, %v9113_v53 }
 0xbd9   : > { %v5440_v3 = vcombine.low %v5384_v33, %v5400_v19  ;;  %v5441_v41 = vcombine.high %v5384_v33, %v5400_v19  ;;  %v5456_v15 = vcombine.low %v5391_v55, %v5407_v23  ;;  %v5457_v48 = vcombine.high %v5391_v55, %v5407_v23 }
 0xbda   : > { %v5520_v54 = vrot.slane %v5512_v25, %v9113_v53  ;;  %v5527_v46 = vrot.slane %v5513_v52, %v9113_v53 }
 0xbdb   : > { %v5448_v45 = vrot.slane %v5440_v3, %v9137_v14  ;;  %v5455_v26 = vrot.slane %v5441_v41, %v9137_v14  ;;  %v5464_v10 = vrot.slane %v5456_v15, %v9137_v14  ;;  %v5471_v59 = vrot.slane %v5457_v48, %v9137_v14 }
 0xbdc   : > { %v5576_v43 = vcombine.low %v5520_v54, %v5536_v42  ;;  %v5577_v28 = vcombine.high %v5520_v54, %v5536_v42  ;;  %v5592_v39 = vcombine.low %v5527_v46, %v5543_v63  ;;  %v5593_v62 = vcombine.high %v5527_v46, %v5543_v63 }
 0xbdd   : > { %v5472_v57 = vcombine.low %v5416_v35, %v5448_v45  ;;  %v5473_v0 = vcombine.high %v5416_v35, %v5448_v45  ;;  %v5474_v30 = vcombine.low %v5423_v40, %v5455_v26  ;;  %v5475_v20 = vcombine.high %v5423_v40, %v5455_v26 }
 0xbde   : > { %v5476_v27 = vcombine.low %v5432_v9, %v5464_v10  ;;  %v5477_v37 = vcombine.high %v5432_v9, %v5464_v10  ;;  %v5478_v12 = vcombine.low %v5439_v29, %v5471_v59  ;;  %v5479_v53 = vcombine.high %v5439_v29, %v5471_v59 }
 0xbdf   : > { %v5616_v6 = vadd.f32 %v5472_v57, %v9087_v34  ;;  %v5617_v38 = vadd.f32 %v5473_v0, %v9075_v58  ;;  %v5618_v11 = vadd.f32 %v5474_v30, %v9084_v44  ;;  %v5619_v21 = vadd.f32 %v5475_v20, %v9072_v18  ;;  %v7976_v30 = vld [vmem:[%s6022_s24] sm:$0xff]  }
 0xbe0   : > { %v5620_v8 = vadd.f32 %v5476_v27, %v9093_v47  ;;  %v5621_v31 = vadd.f32 %v5477_v37, %v9081_v36  ;;  %v5622_v35 = vadd.f32 %v5478_v12, %v9090_v49  ;;  %v5623_v40 = vadd.f32 %v5479_v53, %v9078_v32  ;;  %7855 = vmatprep.subr.bf16.mxu0 %v7976_v30  ;;  %v7977_v37 = vld [vmem:[%s6022_s24 + $0x8] sm:$0xff]  }
 0xbe1   : > { %v5632_v19 = vpack.c.bf16 %v5617_v38, %v5616_v6  ;;  %v5633_v9 = vpack.c.bf16 %v5619_v21, %v5618_v11  ;;  %v5584_v29 = vrot.slane %v5576_v43, %v9137_v14  ;;  %v5591_v34 = vrot.slane %v5577_v28, %v9137_v14  ;;  %7856 = vmatpush3.bf16.msra.mxu0 %v7976_v30 }
 0xbe2   : > { %v5634_v23 = vpack.c.bf16 %v5621_v31, %v5620_v8  ;;  %v5635_v58 = vpack.c.bf16 %v5623_v40, %v5622_v35  ;;  %v5600_v44 = vrot.slane %v5592_v39, %v9137_v14  ;;  %v5607_v18 = vrot.slane %v5593_v62, %v9137_v14  ;;  %7857 = vmatprep.subr.bf16.mxu0 %v7977_v37 }
 0xbe3   : > { %5640 = vst.msk [vmem:[#allocation4] sm:$0xff] %vm989_vm2, %v5632_v19  ;;  %5641 = vst.msk [vmem:[#allocation4 + $0x8] sm:$0xff] %vm989_vm2, %v5633_v9  ;;  %v5608_v36 = vcombine.low %v5552_v1, %v5584_v29  ;;  %v5609_v49 = vcombine.high %v5552_v1, %v5584_v29  ;;  %v5610_v47 = vcombine.low %v5559_v22, %v5591_v34 }
 0xbe4   : > { %v5611_v32 = vcombine.high %v5559_v22, %v5591_v34  ;;  %5642 = vst.msk [vmem:[#allocation4 + $0x10] sm:$0xff] %vm989_vm2, %v5634_v23  ;;  %5643 = vst.msk [vmem:[#allocation4 + $0x18] sm:$0xff] %vm989_vm2, %v5635_v58  ;;  %v5612_v24 = vcombine.low %v5568_v7, %v5600_v44  ;;  %v5613_v16 = vcombine.high %v5568_v7, %v5600_v44  ;;  %v9741_v7 = vld [vmem:[%s5667_s21] ss:$0 sm:$0xff] }
 0xbe5   : > { %v5614_v2 = vcombine.low %v5575_v17, %v5607_v18  ;;  %v5615_v33 = vcombine.high %v5575_v17, %v5607_v18  ;;  %v5624_v55 = vadd.f32 %v5608_v36, %v9109_v50  ;;  %v5625_v14 = vadd.f32 %v5609_v49, %v9099_v51  ;;  %7858 = vmatpush3.bf16.msra.mxu0 %v7977_v37 }
 0xbe6   : > { %v5626_v25 = vadd.f32 %v5610_v47, %v9106_v60  ;;  %v5627_v52 = vadd.f32 %v5611_v32, %v9096_v61  ;;  %v5628_v1 = vadd.f32 %v5612_v24, %v9129_v56  ;;  %v5629_v22 = vadd.f32 %v5613_v16, %v9142_v5 }
 0xbe7   : > { %v5630_v42 = vadd.f32 %v5614_v2, %v9124_v13  ;;  %v5631_v63 = vadd.f32 %v5615_v33, %v9135_v4  ;;  %v5636_v3 = vpack.c.bf16 %v5625_v14, %v5624_v55 }
 0xbe8   : > { %v5637_v41 = vpack.c.bf16 %v5627_v52, %v5626_v25  ;;  %v5638_v15 = vpack.c.bf16 %v5629_v22, %v5628_v1 }
 0xbe9   : > { %v5639_v48 = vpack.c.bf16 %v5631_v63, %v5630_v42  ;;  %5644 = vst.msk [vmem:[#allocation4 + $0x20] sm:$0xff] %vm989_vm2, %v5636_v3 }
 0xbea   : > { %5645 = vst.msk [vmem:[#allocation4 + $0x28] sm:$0xff] %vm989_vm2, %v5637_v41  ;;  %5646 = vst.msk [vmem:[#allocation4 + $0x30] sm:$0xff] %vm989_vm2, %v5638_v15  ;;  %v5648_v61 = vld [vmem:[#allocation4] sm:$0xff]  ;;  %v5649_v51 = vld [vmem:[#allocation4 + $0x8] sm:$0xff] }
 0xbeb   : > { %5647 = vst.msk [vmem:[#allocation4 + $0x38] sm:$0xff] %vm989_vm2, %v5639_v48  ;;  %7839 = vmatprep.mubr.msk.bf16.mxu1 %vm5699_vm6, %v5648_v61  ;;  %v5650_v60 = vld [vmem:[#allocation4 + $0x10] sm:$0xff]  ;;  %v5651_v50 = vld [vmem:[#allocation4 + $0x18] sm:$0xff] }
 0xbec   : > { %7840 = vmatmul.mubr.msk.bf16.vlgmr.msra.gmra.mrb[160].mxu1 %vm5699_vm6, %v5649_v51 }
 0xbed   : > { %7843 = vmatprep.mubr.msk.bf16.mxu1 %vm5699_vm6, %v5650_v60 }
 0xbf0   : > { %v5652_v13 = vld [vmem:[#allocation4 + $0x20] sm:$0xff] }
 0xbf1   : > { %v5653_v56 = vld [vmem:[#allocation4 + $0x28] sm:$0xff]  ;;  %v5654_v4 = vld [vmem:[#allocation4 + $0x30] sm:$0xff] }
 0xbf2   : > { %v5655_v5 = vld [vmem:[#allocation4 + $0x38] sm:$0xff] }
 0xbf4   : > { %7844 = vmatmul.mubr.msk.bf16.gmra.mrb[164].mxu1 %vm5699_vm6, %v5651_v50 }
 0xbf5   : > { %7847 = vmatprep.mubr.msk.bf16.mxu1 %vm5699_vm6, %v5652_v13 }
 0xbfc   : > { %7848 = vmatmul.mubr.msk.bf16.gmra.mrb[168].mxu1 %vm5699_vm6, %v5653_v56 }
 0xbfd   : > { %7851 = vmatprep.mubr.msk.bf16.mxu1 %vm5699_vm6, %v5654_v4 }
 0xc04   : > { %7852 = vmatmul.mubr.msk.bf16.gmra.mrb[172].mxu1 %vm5699_vm6, %v5655_v5 }
 0xcbf   : > { %v7841_v17 = vpop.f32.mrb[160].mxu1 }
 0xcc0   : > { %v5758_v54 = vpop.f32.mrb[161].mxu1  ;;  %v9747_v10 = vadd.f32 %v7841_v17, %v9741_v7 }
 0xcc1   : > { %v9744_v46 = vadd.f32 %v9741_v7, %v5758_v54  ;;  %v7842_v45 = vpop.f32.mrb[162].mxu1 }
 0xcc2   : > { %v5761_v26 = vpop.f32.mrb[163].mxu1  ;;  %v9755_v39 = vadd.f32 %v7842_v45, %v9741_v7  ;;  %v7098_v41 = vmul.f32 -1.442695, %v9747_v10 }
 0xcc3   : > { %8106 = vtanh.f32 %v9744_v46  ;;  %v9751_v59 = vadd.f32 %v9741_v7, %v5761_v26  ;;  %v7096_v63 = vmul.f32 -1.442695, %v9744_v46 }
 0xcc4   : > { %8108 = vtanh.f32 %v9747_v10  ;;  %v7099_v15 = vmul.f32 -1.442695, %v9755_v39 }
 0xcc5   : > { %8110 = vtanh.f32 %v9751_v59  ;;  %v7097_v3 = vmul.f32 -1.442695, %v9751_v59 }
 0xcc7   : > { %v7845_v43 = vpop.f32.mrb[164].mxu1 }
 0xcc8   : > { %v5774_v28 = vpop.f32.mrb[165].mxu1  ;;  %v9766_v20 = vadd.f32 %v7845_v43, %v9741_v7 }
 0xcc9   : > { %v9759_v62 = vadd.f32 %v9741_v7, %v5774_v28  ;;  %v7846_v57 = vpop.f32.mrb[166].mxu1 }
 0xcca   : > { %v5777_v0 = vpop.f32.mrb[167].mxu1  ;;  %v9777_v31 = vadd.f32 %v7846_v57, %v9741_v7  ;;  %v7102_v50 = vmul.f32 -1.442695, %v9766_v20 }
 0xccb   : > { %8112 = vtanh.f32 %v9759_v62  ;;  %v9773_v53 = vadd.f32 %v9741_v7, %v5777_v0  ;;  %v7100_v48 = vmul.f32 -1.442695, %v9759_v62 }
 0xccc   : > { %8114 = vtanh.f32 %v9755_v39  ;;  %v7103_v13 = vmul.f32 -1.442695, %v9777_v31 }
 0xccd   : > { %v8107_v27 = vpop.eup %8106  ;;  %8116 = vtanh.f32 %v9766_v20  ;;  %v7101_v61 = vmul.f32 -1.442695, %v9773_v53 }
 0xcce   : > { %5949 = vrot.lane.b32.xlu0 %v8107_v27, %s8251_s23  ;;  %v8109_v38 = vpop.eup %8108  ;;  %8118 = vtanh.f32 %v9773_v53 }
 0xccf   : > { %v7849_v12 = vpop.f32.mrb[168].mxu1  ;;  %v8111_v8 = vpop.eup %8110  ;;  %8120 = vtanh.f32 %v9777_v31 }
 0xcd0   : > { %v5790_v6 = vpop.f32.mrb[169].mxu1  ;;  %5951 = vrot.lane.b32.xlu1 %v8111_v8, %s8251_s23  ;;  %v9789_v44 = vadd.f32 %v7849_v12, %v9741_v7 }
 0xcd1   : > { %v7850_v11 = vpop.f32.mrb[170].mxu1  ;;  %v9784_v9 = vadd.f32 %v9741_v7, %v5790_v6 }
 0xcd2   : > { %5953 = vrot.lane.b32.xlu0 %v8109_v38, %s8251_s23  ;;  %v5793_v21 = vpop.f32.mrb[171].mxu1  ;;  %v9796_v49 = vadd.f32 %v7850_v11, %v9741_v7  ;;  %v7106_v59 = vmul.f32 -1.442695, %v9789_v44 }
 0xcd3   : > { %8122 = vtanh.f32 %v9784_v9  ;;  %v5794_v18 = vadd.f32 %v9741_v7, %v5793_v21  ;;  %v7104_v45 = vmul.f32 -1.442695, %v9784_v9 }
 0xcd4   : > { %8124 = vtanh.f32 %v9789_v44  ;;  %v7107_v57 = vmul.f32 -1.442695, %v9796_v49 }
 0xcd5   : > { %v8113_v35 = vpop.eup %8112  ;;  %8126 = vtanh.f32 %v5794_v18  ;;  %v7105_v10 = vmul.f32 -1.442695, %v5794_v18 }
 0xcd6   : > { %5957 = vrot.lane.b32.xlu0 %v8113_v35, %s8251_s23  ;;  %v8115_v40 = vpop.eup %8114  ;;  %8128 = vtanh.f32 %v9796_v49 }
 0xcd7   : > { %v7853_v19 = vpop.f32.mrb[172].mxu1  ;;  %5955 = vrot.lane.b32.xlu1 %v8115_v40, %s8251_s23  ;;  %v8117_v34 = vpop.eup %8116 }
 0xcd8   : > { %v5806_v29 = vpop.f32.mrb[173].mxu1  ;;  %v8119_v36 = vpop.eup %8118  ;;  %v9804_v16 = vadd.f32 %v7853_v19, %v9741_v7 }
 0xcd9   : > { %v7854_v23 = vpop.f32.mrb[174].mxu1  ;;  %v8121_v47 = vpop.eup %8120  ;;  %v9799_v32 = vadd.f32 %v9741_v7, %v5806_v29 }
 0xcda   : > { %5961 = vrot.lane.b32.xlu0 %v8117_v34, %s8251_s23  ;;  %v5809_v58 = vpop.f32.mrb[175].mxu1  ;;  %v9814_v14 = vadd.f32 %v7854_v23, %v9741_v7  ;;  %v7110_v23 = vmul.f32 -1.442695, %v9804_v16 }
 0xcdb   : > { %5959 = vrot.lane.b32.xlu1 %v8119_v36, %s8251_s23  ;;  %8130 = vtanh.f32 %v9799_v32  ;;  %v9809_v2 = vadd.f32 %v9741_v7, %v5809_v58  ;;  %v7108_v21 = vmul.f32 -1.442695, %v9799_v32 }
 0xcdc   : > { %8132 = vtanh.f32 %v9804_v16  ;;  %v7111_v36 = vmul.f32 -1.442695, %v9814_v14 }
 0xcdd   : > { %v8123_v24 = vpop.eup %8122  ;;  %8134 = vtanh.f32 %v9809_v2  ;;  %v7109_v35 = vmul.f32 -1.442695, %v9809_v2 }
 0xcde   : > { %5965 = vrot.lane.b32.xlu0 %v8123_v24, %s8251_s23  ;;  %v8125_v33 = vpop.eup %8124  ;;  %8136 = vtanh.f32 %v9814_v14 }
 0xcdf   : > { %5963 = vrot.lane.b32.xlu1 %v8121_v47, %s8251_s23  ;;  %v8127_v55 = vpop.eup %8126  ;;  %8138 = vpow2.f32 %v7096_v63 }
 0xce0   : > { %v8129_v25 = vpop.eup %8128  ;;  %8140 = vpow2.f32 %v7097_v3 }
 0xce1   : > { %8142 = vpow2.f32 %v7098_v41 }
 0xce2   : > { %5969 = vrot.lane.b32.xlu0 %v8125_v33, %s8251_s23  ;;  %8144 = vpow2.f32 %v7099_v15 }
 0xce3   : > { %5967 = vrot.lane.b32.xlu1 %v8127_v55, %s8251_s23  ;;  %8146 = vpow2.f32 %v7100_v48 }
 0xce4   : > { %8148 = vpow2.f32 %v7101_v61 }
 0xce5   : > { %v8131_v52 = vpop.eup %8130  ;;  %8150 = vpow2.f32 %v7102_v50 }
 0xce6   : > { %5973 = vrot.lane.b32.xlu0 %v8131_v52, %s8251_s23  ;;  %v8133_v1 = vpop.eup %8132  ;;  %8152 = vpow2.f32 %v7103_v13 }
 0xce7   : > { %5971 = vrot.lane.b32.xlu1 %v8129_v25, %s8251_s23  ;;  %v8135_v22 = vpop.eup %8134 }
 0xce8   : > { %v8137_v42 = vpop.eup %8136 }
 0xce9   : > { %v8139_v51 = vpop.eup %8138 }
 0xcea   : > { %5977 = vrot.lane.b32.xlu0 %v8133_v1, %s8251_s23  ;;  %v8141_v60 = vpop.eup %8140  ;;  %v5869_v56 = vadd.f32 1.0, %v8139_v51 }
 0xceb   : > { %5975 = vrot.lane.b32.xlu1 %v8135_v22, %s8251_s23  ;;  %v8143_v4 = vpop.eup %8142  ;;  %v5870_v5 = vadd.f32 1.0, %v8141_v60 }
 0xcec   : > { %v8145_v7 = vpop.eup %8144  ;;  %v5871_v17 = vadd.f32 1.0, %v8143_v4  ;;  %8154 = vrcp.f32 %v5869_v56 }
 0xced   : > { %v5872_v54 = vadd.f32 1.0, %v8145_v7  ;;  %8156 = vrcp.f32 %v5870_v5  ;;  %v8147_v46 = vpop.eup %8146 }
 0xcee   : > { %v8149_v26 = vpop.eup %8148  ;;  %8158 = vrcp.f32 %v5871_v17  ;;  %v5873_v43 = vadd.f32 1.0, %v8147_v46 }
 0xcef   : > { %5979 = vrot.lane.b32.xlu1 %v8137_v42, %s8251_s23  ;;  %8160 = vrcp.f32 %v5872_v54  ;;  %v5874_v39 = vadd.f32 1.0, %v8149_v26  ;;  %v8151_v62 = vpop.eup %8150 }
 0xcf0   : > { %8162 = vpow2.f32 %v7104_v45  ;;  %v8153_v0 = vpop.eup %8152  ;;  %v5875_v27 = vadd.f32 1.0, %v8151_v62 }
 0xcf1   : > { %8164 = vpow2.f32 %v7105_v10  ;;  %v5876_v12 = vadd.f32 1.0, %v8153_v0 }
 0xcf2   : > { %8166 = vpow2.f32 %v7106_v59 }
 0xcf3   : > { %8168 = vrcp.f32 %v5873_v43 }
 0xcf4   : > { %8170 = vrcp.f32 %v5874_v39 }
 0xcf5   : > { %8172 = vpow2.f32 %v7107_v57 }
 0xcf6   : > { %v8155_v30 = vpop.eup %8154  ;;  %8174 = vrcp.f32 %v5875_v27 }
 0xcf7   : > { %v8157_v20 = vpop.eup %8156  ;;  %8176 = vrcp.f32 %v5876_v12 }
 0xcf8   : > { %v8159_v11 = vpop.eup %8158  ;;  %8178 = vpow2.f32 %v7108_v21 }
 0xcf9   : > { %v8161_v31 = vpop.eup %8160  ;;  %8180 = vpow2.f32 %v7109_v35 }
 0xcfa   : > { %v8163_v29 = vpop.eup %8162  ;;  %8182 = vpow2.f32 %v7110_v23 }
 0xcfb   : > { %v8165_v34 = vpop.eup %8164  ;;  %v5877_v47 = vadd.f32 1.0, %v8163_v29  ;;  %8184 = vpow2.f32 %v7111_v36 }
 0xcfc   : > { %v8167_v18 = vpop.eup %8166  ;;  %v5878_v24 = vadd.f32 1.0, %v8165_v34 }
 0xcfd   : > { %v8169_v49 = vpop.eup %8168  ;;  %v5879_v16 = vadd.f32 1.0, %v8167_v18  ;;  %8186 = vrcp.f32 %v5877_v47 }
 0xcfe   : > { %v8171_v32 = vpop.eup %8170  ;;  %8188 = vrcp.f32 %v5878_v24 }
 0xcff   : > { %v8173_v2 = vpop.eup %8172  ;;  %8190 = vrcp.f32 %v5879_v16 }
 0xd00   : > { %v8175_v1 = vpop.eup %8174  ;;  %v5880_v22 = vadd.f32 1.0, %v8173_v2  ;;  %v8204_v2 = vld [vmem:[#allocation2 + $0x18] sm:$0xff] }
 0xd01   : > { %v8177_v42 = vpop.eup %8176 }
 0xd02   : > { %v8179_v15 = vpop.eup %8178  ;;  %8192 = vrcp.f32 %v5880_v22 }
 0xd03   : > { %v8181_v48 = vpop.eup %8180  ;;  %v5881_v60 = vadd.f32 1.0, %v8179_v15 }
 0xd04   : > { %v8183_v50 = vpop.eup %8182  ;;  %v5882_v13 = vadd.f32 1.0, %v8181_v48 }
 0xd05   : > { %v8185_v56 = vpop.eup %8184  ;;  %v5883_v7 = vadd.f32 1.0, %v8183_v50  ;;  %8194 = vrcp.f32 %v5881_v60 }
 0xd06   : > { %v5884_v54 = vadd.f32 1.0, %v8185_v56  ;;  %8196 = vrcp.f32 %v5882_v13  ;;  %v8208_v56 = vld [vmem:[#allocation2 + $0x38] sm:$0xff] }
 0xd07   : > { %v8187_v4 = vpop.eup %8186  ;;  %8198 = vrcp.f32 %v5883_v7  ;;  %v8209_v7 = vld [vmem:[#allocation2 + $0x28] sm:$0xff] }
 0xd08   : > { %v8189_v5 = vpop.eup %8188  ;;  %8200 = vrcp.f32 %v5884_v54 }
 0xd09   : > { %v8191_v10 = vpop.eup %8190 }
 0xd0c   : > { %v8193_v43 = vpop.eup %8192 }
 0xd40   : > { %v5950_v28 = vpop.permute.xlu0 %5949 }
 0xd41   : > { %v5997_v53 = vmul.f32 %v8155_v30, %v5950_v28  ;;  %v8195_v30 = vpop.eup %8194 }
 0xd42   : > { %v5952_v37 = vpop.permute.xlu1 %5951 }
 0xd43   : > { %v5998_v6 = vmul.f32 %v8157_v20, %v5952_v37  ;;  %v8197_v20 = vpop.eup %8196 }
 0xd44   : > { %v5954_v38 = vpop.permute.xlu0 %5953 }
 0xd45   : > { %v6013_v8 = vpack.c.bf16 %v5998_v6, %v5997_v53  ;;  %v5999_v19 = vmul.f32 %v8159_v11, %v5954_v38  ;;  %v8199_v6 = vpop.eup %8198 }
 0xd46   : > { %v8201_v11 = vpop.eup %8200 }
 0xd47   : > { %7859 = vmatprep.mubr.msk.bf16.mxu0 %vm989_vm2, %v6013_v8 }
 0xd48   : > { %v5958_v44 = vpop.permute.xlu0 %5957 }
 0xd49   : > { %v5956_v40 = vpop.permute.xlu1 %5955  ;;  %v6001_v55 = vmul.f32 %v8169_v49, %v5958_v44  ;;  %v8203_v49 = vld [vmem:[#allocation2] sm:$0xff] }
 0xd4a   : > { %v6000_v9 = vmul.f32 %v8161_v31, %v5956_v40  ;;  %v9851_v40 = vld [vmem:[%s6027_s29] ss:$0 sm:$0xff] }
 0xd4c   : > { %v6014_v58 = vpack.c.bf16 %v6000_v9, %v5999_v19  ;;  %v5962_v52 = vpop.permute.xlu0 %5961 }
 0xd4d   : > { %v5960_v33 = vpop.permute.xlu1 %5959  ;;  %v6003_v3 = vmul.f32 %v8175_v1, %v5962_v52 }
 0xd4e   : > { %7860 = vmatmul.mubr.msk.bf16.vlgmr.msra.gmra.mrb[160].mxu0 %vm989_vm2, %v6014_v58  ;;  %v6002_v25 = vmul.f32 %v8171_v32, %v5960_v33  ;;  %v8202_v58 = vld [vmem:[#allocation2 + $0x10] sm:$0xff] }
 0xd50   : > { %v6015_v14 = vpack.c.bf16 %v6002_v25, %v6001_v55  ;;  %v5966_v51 = vpop.permute.xlu0 %5965  ;;  %v8205_v25 = vld [vmem:[#allocation2 + $0x8] sm:$0xff] }
 0xd51   : > { %v5964_v63 = vpop.permute.xlu1 %5963  ;;  %v6005_v46 = vmul.f32 %v8187_v4, %v5966_v51  ;;  %v8207_v51 = vld [vmem:[#allocation2 + $0x20] sm:$0xff] }
 0xd52   : > { %v6004_v41 = vmul.f32 %v8177_v42, %v5964_v63  ;;  %7863 = vmatprep.mubr.msk.bf16.mxu0 %vm989_vm2, %v6015_v14 }
 0xd54   : > { %v6016_v61 = vpack.c.bf16 %v6004_v41, %v6003_v3  ;;  %v5970_v26 = vpop.permute.xlu0 %5969  ;;  %v8206_v41 = vld [vmem:[#allocation2 + $0x30] sm:$0xff] }
 0xd55   : > { %v5968_v17 = vpop.permute.xlu1 %5967  ;;  %v6007_v39 = vmul.f32 %v8191_v10, %v5970_v26 }
 0xd56   : > { %7864 = vmatmul.mubr.msk.bf16.gmra.mrb[164].mxu0 %vm989_vm2, %v6016_v61  ;;  %v6006_v45 = vmul.f32 %v8189_v5, %v5968_v17 }
 0xd58   : > { %v6017_v59 = vpack.c.bf16 %v6006_v45, %v6005_v46  ;;  %v5974_v0 = vpop.permute.xlu0 %5973 }
 0xd59   : > { %v5972_v28 = vpop.permute.xlu1 %5971  ;;  %v6009_v37 = vmul.f32 %v8195_v30, %v5974_v0  ;;  %v8211_v0 = vld [vmem:[#allocation2 + $0x40] sm:$0xff] }
 0xd5a   : > { %v6008_v62 = vmul.f32 %v8193_v43, %v5972_v28  ;;  %7867 = vmatprep.mubr.msk.bf16.mxu0 %vm989_vm2, %v6017_v59  ;;  %v8210_v28 = vld [vmem:[#allocation2 + $0x50] sm:$0xff] }
 0xd5c   : > { %v6018_v57 = vpack.c.bf16 %v6008_v62, %v6007_v39  ;;  %v5978_v53 = vpop.permute.xlu0 %5977 }
 0xd5d   : > { %v5976_v27 = vpop.permute.xlu1 %5975  ;;  %v6011_v8 = vmul.f32 %v8199_v6, %v5978_v53  ;;  %v8213_v6 = vld [vmem:[#allocation2 + $0x48] sm:$0xff] }
 0xd5e   : > { %7868 = vmatmul.mubr.msk.bf16.gmra.mrb[168].mxu0 %vm989_vm2, %v6018_v57  ;;  %v6010_v12 = vmul.f32 %v8197_v20, %v5976_v27 }
 0xd60   : > { %v6019_v38 = vpack.c.bf16 %v6010_v12, %v6009_v37  ;;  %v8212_v37 = vld [vmem:[#allocation2 + $0x58] sm:$0xff] }
 0xd61   : > { %v5980_v21 = vpop.permute.xlu1 %5979 }
 0xd62   : > { %v6012_v31 = vmul.f32 %v8201_v11, %v5980_v21  ;;  %7871 = vmatprep.mubr.msk.bf16.mxu0 %vm989_vm2, %v6019_v38 }
 0xd64   : > { %v6020_v35 = vpack.c.bf16 %v6012_v31, %v6011_v8 }
 0xd66   : > { %7872 = vmatmul.mubr.msk.bf16.gmra.mrb[172].mxu0 %vm989_vm2, %v6020_v35 }
 0xe21   : > { %v7861_v19 = vpop.f32.mrb[160].mxu0 }
 0xe22   : > { %v6114_v9 = vadd.f32 %v7861_v19, %v9851_v40  ;;  %v6105_v29 = vpop.f32.mrb[161].mxu0 }
 0xe23   : > { %v6106_v34 = vadd.f32 %v9851_v40, %v6105_v29  ;;  %v7862_v23 = vpop.f32.mrb[162].mxu0  ;;  %v8214_v29 = vld [vmem:[#allocation2 + $0x70] sm:$0xff] }
 0xe24   : > { %v6170_v44 = vadd.f32 %v8202_v58, %v6114_v9  ;;  %v6117_v18 = vadd.f32 %v7862_v23, %v9851_v40  ;;  %v6108_v36 = vpop.f32.mrb[163].mxu0  ;;  %6252 = vrot.lane.b32.xlu0 %v6114_v9, %s8251_s23 }
 0xe25   : > { %v6168_v47 = vadd.f32 %v8203_v49, %v6106_v34  ;;  %v6109_v32 = vadd.f32 %v9851_v40, %v6108_v36 }
 0xe26   : > { %v6186_v24 = vmul.f32 0.70710677, %v6170_v44  ;;  %v6171_v33 = vadd.f32 %v8204_v2, %v6117_v18  ;;  %6254 = vrot.lane.b32.xlu1 %v6117_v18, %s8251_s23  ;;  %v8215_v44 = vld [vmem:[#allocation2 + $0x60] sm:$0xff]  ;;  %v8217_v2 = vld [vmem:[#allocation2 + $0x68] sm:$0xff] }
 0xe27   : > { %v6184_v55 = vmul.f32 0.70710677, %v6168_v47  ;;  %v6169_v16 = vadd.f32 %v8205_v25, %v6109_v32  ;;  %v8216_v47 = vld [vmem:[#allocation2 + $0x78] sm:$0xff] }
 0xe28   : > { %6202 = vst.msk [vmem:[#allocation2 + $0x10] sm:$0xff] %vm989_vm2, %v6186_v24  ;;  %v6187_v52 = vmul.f32 0.70710677, %v6171_v33  ;;  %6248 = vrot.lane.b32.xlu0 %v6106_v34, %s8251_s23 }
 0xe29   : > { %6200 = vst.msk [vmem:[#allocation2] sm:$0xff] %vm989_vm2, %v6184_v55  ;;  %v6185_v1 = vmul.f32 0.70710677, %v6169_v16  ;;  %v7865_v22 = vpop.f32.mrb[164].mxu0 }
 0xe2a   : > { %6203 = vst.msk [vmem:[#allocation2 + $0x18] sm:$0xff] %vm989_vm2, %v6187_v52  ;;  %6250 = vrot.lane.b32.xlu1 %v6109_v32, %s8251_s23  ;;  %v6130_v14 = vadd.f32 %v7865_v22, %v9851_v40  ;;  %v6121_v42 = vpop.f32.mrb[165].mxu0  ;;  %v6219_v52 = vld [vmem:[#allocation3 + $0x18] sm:$0xff] }
 0xe2b   : > { %6201 = vst.msk [vmem:[#allocation2 + $0x8] sm:$0xff] %vm989_vm2, %v6185_v1  ;;  %v6122_v63 = vadd.f32 %v9851_v40, %v6121_v42  ;;  %v7866_v3 = vpop.f32.mrb[166].mxu0 }
 0xe2c   : > { %v6174_v15 = vadd.f32 %v8206_v41, %v6130_v14  ;;  %v6133_v48 = vadd.f32 %v7866_v3, %v9851_v40  ;;  %v6124_v61 = vpop.f32.mrb[167].mxu0  ;;  %6260 = vrot.lane.b32.xlu0 %v6130_v14, %s8251_s23  ;;  %v6216_v14 = vld [vmem:[#allocation3] sm:$0xff]  ;;  %v6217_v3 = vld [vmem:[#allocation3 + $0x8] sm:$0xff] }
 0xe2d   : > { %v6172_v60 = vadd.f32 %v8207_v51, %v6122_v63  ;;  %v6125_v50 = vadd.f32 %v9851_v40, %v6124_v61  ;;  %v6222_v61 = vld [vmem:[#allocation3 + $0x30] sm:$0xff] }
 0xe2e   : > { %v6190_v13 = vmul.f32 0.70710677, %v6174_v15  ;;  %v6175_v4 = vadd.f32 %v8208_v56, %v6133_v48  ;;  %6262 = vrot.lane.b32.xlu1 %v6133_v48, %s8251_s23  ;;  %v6220_v56 = vld [vmem:[#allocation3 + $0x20] sm:$0xff] }
 0xe2f   : > { %v6188_v5 = vmul.f32 0.70710677, %v6172_v60  ;;  %v6173_v17 = vadd.f32 %v8209_v7, %v6125_v50  ;;  %v6223_v60 = vld [vmem:[#allocation3 + $0x38] sm:$0xff]  ;;  %v6221_v7 = vld [vmem:[#allocation3 + $0x28] sm:$0xff] }
 0xe30   : > { %6206 = vst.msk [vmem:[#allocation2 + $0x30] sm:$0xff] %vm989_vm2, %v6190_v13  ;;  %v6191_v54 = vmul.f32 0.70710677, %v6175_v4  ;;  %6256 = vrot.lane.b32.xlu0 %v6122_v63, %s8251_s23 }
 0xe31   : > { %6204 = vst.msk [vmem:[#allocation2 + $0x20] sm:$0xff] %vm989_vm2, %v6188_v5  ;;  %v6189_v46 = vmul.f32 0.70710677, %v6173_v17  ;;  %v7869_v45 = vpop.f32.mrb[168].mxu0 }
 0xe32   : > { %6207 = vst.msk [vmem:[#allocation2 + $0x38] sm:$0xff] %vm989_vm2, %v6191_v54  ;;  %6258 = vrot.lane.b32.xlu1 %v6125_v50, %s8251_s23  ;;  %v6146_v26 = vadd.f32 %v7869_v45, %v9851_v40  ;;  %v6137_v10 = vpop.f32.mrb[169].mxu0  ;;  %v6226_v45 = vld [vmem:[#allocation3 + $0x50] sm:$0xff] }
 0xe33   : > { %6205 = vst.msk [vmem:[#allocation2 + $0x28] sm:$0xff] %vm989_vm2, %v6189_v46  ;;  %v6138_v59 = vadd.f32 %v9851_v40, %v6137_v10  ;;  %v7870_v43 = vpop.f32.mrb[170].mxu0  ;;  %v6227_v10 = vld [vmem:[#allocation3 + $0x58] sm:$0xff] }
 0xe34   : > { %v6178_v39 = vadd.f32 %v8210_v28, %v6146_v26  ;;  %v6149_v62 = vadd.f32 %v7870_v43, %v9851_v40  ;;  %6268 = vrot.lane.b32.xlu0 %v6146_v26, %s8251_s23  ;;  %v6140_v57 = vpop.f32.mrb[171].mxu0  ;;  %v6224_v28 = vld [vmem:[#allocation3 + $0x40] sm:$0xff] }
 0xe35   : > { %v6176_v30 = vadd.f32 %v8211_v0, %v6138_v59  ;;  %v6141_v20 = vadd.f32 %v9851_v40, %v6140_v57  ;;  %v6225_v57 = vld [vmem:[#allocation3 + $0x48] sm:$0xff] }
 0xe36   : > { %v6194_v27 = vmul.f32 0.70710677, %v6178_v39  ;;  %v6179_v12 = vadd.f32 %v8212_v37, %v6149_v62  ;;  %6270 = vrot.lane.b32.xlu1 %v6149_v62, %s8251_s23 }
 0xe37   : > { %v6192_v53 = vmul.f32 0.70710677, %v6176_v30  ;;  %v6177_v38 = vadd.f32 %v8213_v6, %v6141_v20 }
 0xe38   : > { %6210 = vst.msk [vmem:[#allocation2 + $0x50] sm:$0xff] %vm989_vm2, %v6194_v27  ;;  %v6195_v11 = vmul.f32 0.70710677, %v6179_v12  ;;  %6264 = vrot.lane.b32.xlu0 %v6138_v59, %s8251_s23  ;;  %v6228_v27 = vld [vmem:[#allocation3 + $0x60] sm:$0xff]  ;;  %v6229_v12 = vld [vmem:[#allocation3 + $0x68] sm:$0xff] }
 0xe39   : > { %6208 = vst.msk [vmem:[#allocation2 + $0x40] sm:$0xff] %vm989_vm2, %v6192_v53  ;;  %v6193_v21 = vmul.f32 0.70710677, %v6177_v38  ;;  %v7873_v8 = vpop.f32.mrb[172].mxu0  ;;  %v6230_v38 = vld [vmem:[#allocation3 + $0x70] sm:$0xff] }
 0xe3a   : > { %6211 = vst.msk [vmem:[#allocation2 + $0x58] sm:$0xff] %vm989_vm2, %v6195_v11  ;;  %6266 = vrot.lane.b32.xlu1 %v6141_v20, %s8251_s23  ;;  %v6162_v31 = vadd.f32 %v7873_v8, %v9851_v40  ;;  %v6153_v35 = vpop.f32.mrb[173].mxu0  ;;  %v6231_v8 = vld [vmem:[#allocation3 + $0x78] sm:$0xff] }
 0xe3b   : > { %6209 = vst.msk [vmem:[#allocation2 + $0x48] sm:$0xff] %vm989_vm2, %v6193_v21  ;;  %v6154_v19 = vadd.f32 %v9851_v40, %v6153_v35  ;;  %v7874_v9 = vpop.f32.mrb[174].mxu0 }
 0xe3c   : > { %v6182_v34 = vadd.f32 %v8214_v29, %v6162_v31  ;;  %v6165_v23 = vadd.f32 %v7874_v9, %v9851_v40  ;;  %v6156_v58 = vpop.f32.mrb[175].mxu0  ;;  %v8218_v9 = vld [vmem:[%s10057_s13] sm:$0xff] (!%p7124_p5)   ;;  %v8219_v29 = vld [vmem:[%s10057_s13 + $0x8] sm:$0xff] (!%p7124_p5)  }
 0xe3d   : > { %v6180_v18 = vadd.f32 %v8215_v44, %v6154_v19  ;;  %v6157_v36 = vadd.f32 %v9851_v40, %v6156_v58  ;;  %6272 = vrot.lane.b32.xlu0 %v6154_v19, %s8251_s23  ;;  %v6218_v40 = vld [vmem:[#allocation3 + $0x10] sm:$0xff]  ;;  %7875 = vmatprep.subr.bf16.mxu0 (!%p7124_p5), %v8218_v9 }
 0xe3e   : > { %v6198_v49 = vmul.f32 0.70710677, %v6182_v34  ;;  %v6183_v32 = vadd.f32 %v8216_v47, %v6165_v23  ;;  %7876 = vmatpush3.bf16.msra.mxu0 (!%p7124_p5), %v8218_v9 }
 0xe3f   : > { %v6196_v24 = vmul.f32 0.70710677, %v6180_v18  ;;  %v6181_v33 = vadd.f32 %v8217_v2, %v6157_v36  ;;  %6274 = vrot.lane.b32.xlu1 %v6157_v36, %s8251_s23  ;;  %7877 = vmatprep.subr.bf16.mxu0 (!%p7124_p5), %v8219_v29 }
 0xe40   : > { %6214 = vst.msk [vmem:[#allocation2 + $0x70] sm:$0xff] %vm989_vm2, %v6198_v49  ;;  %v6199_v55 = vmul.f32 0.70710677, %v6183_v32 }
 0xe41   : > { %6212 = vst.msk [vmem:[#allocation2 + $0x60] sm:$0xff] %vm989_vm2, %v6196_v24  ;;  %v6197_v25 = vmul.f32 0.70710677, %v6181_v33  ;;  %6276 = vrot.lane.b32.xlu0 %v6162_v31, %s8251_s23 }
 0xe42   : > { %6215 = vst.msk [vmem:[#allocation2 + $0x78] sm:$0xff] %vm989_vm2, %v6199_v55  ;;  %7878 = vmatpush3.bf16.msra.mxu0 (!%p7124_p5), %v8219_v29 }
 0xe43   : > { %6213 = vst.msk [vmem:[#allocation2 + $0x68] sm:$0xff] %vm989_vm2, %v6197_v25  ;;  %6278 = vrot.lane.b32.xlu1 %v6165_v23, %s8251_s23 }
 0xe96   : > { %v6253_v16 = vpop.permute.xlu0 %6252 }
 0xe97   : > { %v6298_v1 = vadd.f32 %v6253_v16, %v6218_v40 }
 0xe98   : > { %v6255_v22 = vpop.permute.xlu1 %6254 }
 0xe99   : > { %6314 = vst.msk [vmem:[#allocation3 + $0x10] sm:$0xff] %vm989_vm2, %v6298_v1  ;;  %v6299_v42 = vadd.f32 %v6255_v22, %v6219_v52 }
 0xe9a   : > { %v6249_v63 = vpop.permute.xlu0 %6248 }
 0xe9b   : > { %6315 = vst.msk [vmem:[#allocation3 + $0x18] sm:$0xff] %vm989_vm2, %v6299_v42  ;;  %v6296_v41 = vadd.f32 %v6249_v63, %v6216_v14 }
 0xe9c   : > { %v6251_v15 = vpop.permute.xlu1 %6250 }
 0xe9d   : > { %6312 = vst.msk [vmem:[#allocation3] sm:$0xff] %vm989_vm2, %v6296_v41  ;;  %v6297_v48 = vadd.f32 %v6251_v15, %v6217_v3 }
 0xe9e   : > { %v6261_v51 = vpop.permute.xlu0 %6260 }
 0xe9f   : > { %6313 = vst.msk [vmem:[#allocation3 + $0x8] sm:$0xff] %vm989_vm2, %v6297_v48  ;;  %v6302_v50 = vadd.f32 %v6261_v51, %v6222_v61 }
 0xea0   : > { %v6263_v13 = vpop.permute.xlu1 %6262  ;;  %v6334_v58 = vld [vmem:[#allocation3 + $0x10] sm:$0xff] (!%p7124_p5) }
 0xea1   : > { %6318 = vst.msk [vmem:[#allocation3 + $0x30] sm:$0xff] %vm989_vm2, %v6302_v50  ;;  %v6303_v4 = vadd.f32 %v6263_v13, %v6223_v60  ;;  %v6350_v47 = vmul.f32 (!%p7124_p5), 0.70710677, %v6334_v58 }
 0xea2   : > { %v6257_v5 = vpop.permute.xlu0 %6256  ;;  %v6335_v36 = vld [vmem:[#allocation3 + $0x18] sm:$0xff] (!%p7124_p5) }
 0xea3   : > { %6319 = vst.msk [vmem:[#allocation3 + $0x38] sm:$0xff] %vm989_vm2, %v6303_v4  ;;  %v6300_v17 = vadd.f32 %v6257_v5, %v6220_v56  ;;  %v6351_v32 = vmul.f32 (!%p7124_p5), 0.70710677, %v6335_v36 }
 0xea4   : > { %v6259_v54 = vpop.permute.xlu1 %6258  ;;  %v6332_v34 = vld [vmem:[#allocation3] sm:$0xff] (!%p7124_p5) }
 0xea5   : > { %6316 = vst.msk [vmem:[#allocation3 + $0x20] sm:$0xff] %vm989_vm2, %v6300_v17  ;;  %v6301_v46 = vadd.f32 %v6259_v54, %v6221_v7  ;;  %v6348_v44 = vmul.f32 (!%p7124_p5), 0.70710677, %v6332_v34  ;;  %v6365_v25 = vpack.c.bf16 (!%p7124_p5), %v6351_v32, %v6350_v47 }
 0xea6   : > { %v6269_v26 = vpop.permute.xlu0 %6268  ;;  %v6333_v23 = vld [vmem:[#allocation3 + $0x8] sm:$0xff] (!%p7124_p5) }
 0xea7   : > { %6317 = vst.msk [vmem:[#allocation3 + $0x28] sm:$0xff] %vm989_vm2, %v6301_v46  ;;  %v6306_v59 = vadd.f32 %v6269_v26, %v6226_v45  ;;  %v6349_v18 = vmul.f32 (!%p7124_p5), 0.70710677, %v6333_v23 }
 0xea8   : > { %v6271_v43 = vpop.permute.xlu1 %6270  ;;  %v6338_v40 = vld [vmem:[#allocation3 + $0x30] sm:$0xff] (!%p7124_p5) }
 0xea9   : > { %6322 = vst.msk [vmem:[#allocation3 + $0x50] sm:$0xff] %vm989_vm2, %v6306_v59  ;;  %v6307_v39 = vadd.f32 %v6271_v43, %v6227_v10  ;;  %v6364_v2 = vpack.c.bf16 (!%p7124_p5), %v6349_v18, %v6348_v44  ;;  %v6354_v14 = vmul.f32 (!%p7124_p5), 0.70710677, %v6338_v40  ;;  %v8220_v10 = vld [vmem:[%s10059_s15] sm:$0xff] (!%p7124_p5)   ;;  %v8221_v59 = vld [vmem:[%s10059_s15 + $0x8] sm:$0xff] (!%p7124_p5)  }
 0xeaa   : > { %v6265_v62 = vpop.permute.xlu0 %6264  ;;  %v6339_v16 = vld [vmem:[#allocation3 + $0x38] sm:$0xff] (!%p7124_p5)  ;;  %7895 = vmatprep.subr.bf16.mxu1 (!%p7124_p5), %v8220_v10  ;;  %v7125_v43 = vld [vmem:[%s10058_s14] ss:$0 sm:$0xff] (!%p7124_p5) }
 0xeab   : > { %6323 = vst.msk [vmem:[#allocation3 + $0x58] sm:$0xff] %vm989_vm2, %v6307_v39  ;;  %v6304_v0 = vadd.f32 %v6265_v62, %v6224_v28  ;;  %7879 = vmatprep.mubr.msk.bf16.mxu0 (!%p7124_p5), %vm989_vm2, %v6364_v2  ;;  %v6355_v42 = vmul.f32 (!%p7124_p5), 0.70710677, %v6339_v16  ;;  %7896 = vmatpush3.bf16.msra.mxu1 (!%p7124_p5), %v8220_v10 }
 0xeac   : > { %v6267_v30 = vpop.permute.xlu1 %6266  ;;  %v6336_v49 = vld [vmem:[#allocation3 + $0x20] sm:$0xff] (!%p7124_p5)  ;;  %7880 = vmatmul.mubr.msk.bf16.vlgmr.msra.gmra.mrb[0].mxu0 (!%p7124_p5), %vm989_vm2, %v6365_v25  ;;  %7897 = vmatprep.subr.bf16.mxu1 (!%p7124_p5), %v8221_v59 }
 0xead   : > { %6320 = vst.msk [vmem:[#allocation3 + $0x40] sm:$0xff] %vm989_vm2, %v6304_v0  ;;  %v6305_v20 = vadd.f32 %v6267_v30, %v6225_v57  ;;  %v6352_v33 = vmul.f32 (!%p7124_p5), 0.70710677, %v6336_v49  ;;  %v6367_v41 = vpack.c.bf16 (!%p7124_p5), %v6355_v42, %v6354_v14 }
 0xeae   : > { %v6337_v24 = vld [vmem:[#allocation3 + $0x28] sm:$0xff] (!%p7124_p5) }
 0xeaf   : > { %6321 = vst.msk [vmem:[#allocation3 + $0x48] sm:$0xff] %vm989_vm2, %v6305_v20  ;;  %v6273_v37 = vpop.permute.xlu0 %6272  ;;  %v6353_v55 = vmul.f32 (!%p7124_p5), 0.70710677, %v6337_v24  ;;  %7898 = vmatpush3.bf16.msra.mxu1 (!%p7124_p5), %v8221_v59 }
 0xeb0   : > { %v6308_v53 = vadd.f32 %v6273_v37, %v6228_v27  ;;  %v6342_v48 = vld [vmem:[#allocation3 + $0x50] sm:$0xff] (!%p7124_p5) }
 0xeb1   : > { %v6275_v6 = vpop.permute.xlu1 %6274  ;;  %v6366_v52 = vpack.c.bf16 (!%p7124_p5), %v6353_v55, %v6352_v33  ;;  %v6358_v50 = vmul.f32 (!%p7124_p5), 0.70710677, %v6342_v48 }
 0xeb2   : > { %6324 = vst.msk [vmem:[#allocation3 + $0x60] sm:$0xff] %vm989_vm2, %v6308_v53  ;;  %v6309_v11 = vadd.f32 %v6275_v6, %v6229_v12  ;;  %6331 = sbr.rel (%p7124_p5) target bundleno = 4486 (0x1186), region = 96  ;;  %v6343_v61 = vld [vmem:[#allocation3 + $0x58] sm:$0xff] (!%p7124_p5) }
 0xeb3   : > { %v6277_v21 = vpop.permute.xlu0 %6276  ;;  %7883 = vmatprep.mubr.msk.bf16.mxu0 (!%p7124_p5), %vm989_vm2, %v6366_v52  ;;  %v6359_v13 = vmul.f32 (!%p7124_p5), 0.70710677, %v6343_v61 }
 0xeb4   : > { %6325 = vst.msk [vmem:[#allocation3 + $0x68] sm:$0xff] %vm989_vm2, %v6309_v11  ;;  %v6310_v31 = vadd.f32 %v6277_v21, %v6230_v38  ;;  %v6340_v1 = vld [vmem:[#allocation3 + $0x40] sm:$0xff] (!%p7124_p5)  ;;  %7884 = vmatmul.mubr.msk.bf16.gmra.mrb[4].mxu0 (!%p7124_p5), %vm989_vm2, %v6367_v41 }
 0xeb5   : > { %v6279_v35 = vpop.permute.xlu1 %6278  ;;  %v6356_v63 = vmul.f32 (!%p7124_p5), 0.70710677, %v6340_v1  ;;  %v6369_v5 = vpack.c.bf16 (!%p7124_p5), %v6359_v13, %v6358_v50 }
 0xeb6   : > { %6326 = vst.msk [vmem:[#allocation3 + $0x70] sm:$0xff] %vm989_vm2, %v6310_v31  ;;  %v6311_v19 = vadd.f32 %v6279_v35, %v6231_v8  ;;  %v6341_v22 = vld [vmem:[#allocation3 + $0x48] sm:$0xff] (!%p7124_p5) }
 0xeb7   : > { %v6357_v3 = vmul.f32 (!%p7124_p5), 0.70710677, %v6341_v22 }
 0xeb8   : > { %6327 = vst.msk [vmem:[#allocation3 + $0x78] sm:$0xff] %vm989_vm2, %v6311_v19 }
 0xeb9   : > { %v6368_v15 = vpack.c.bf16 %v6357_v3, %v6356_v63  ;;  %v6344_v51 = vld [vmem:[#allocation3 + $0x60] sm:$0xff] }
 0xeba   : > { %v6360_v56 = vmul.f32 0.70710677, %v6344_v51 }
 0xebb   : > { %v6345_v60 = vld [vmem:[#allocation3 + $0x68] sm:$0xff]  ;;  %7887 = vmatprep.mubr.msk.bf16.mxu0 %vm989_vm2, %v6368_v15 }
 0xebc   : > { %v6361_v4 = vmul.f32 0.70710677, %v6345_v60  ;;  %7888 = vmatmul.mubr.msk.bf16.gmra.mrb[8].mxu0 %vm989_vm2, %v6369_v5 }
 0xebd   : > { %v6346_v17 = vld [vmem:[#allocation3 + $0x70] sm:$0xff] }
 0xebe   : > { %v6370_v7 = vpack.c.bf16 %v6361_v4, %v6360_v56  ;;  %v6362_v46 = vmul.f32 0.70710677, %v6346_v17  ;;  %v7136_v17 = vld [vmem:[#allocation5] ss:$0 sm:$0xff] }
 0xebf   : > { %v6347_v54 = vld [vmem:[#allocation3 + $0x78] sm:$0xff] }
 0xec0   : > { %v6363_v45 = vmul.f32 0.70710677, %v6347_v54  ;;  %7891 = vmatprep.mubr.msk.bf16.mxu0 %vm989_vm2, %v6370_v7 }
 0xec2   : > { %v6371_v26 = vpack.c.bf16 %v6363_v45, %v6362_v46 }
 0xec4   : > { %7892 = vmatmul.mubr.msk.bf16.gmra.mrb[12].mxu0 %vm989_vm2, %v6371_v26 }
 0xf7f   : > { %v7881_v28 = vpop.f32.mrb[0].mxu0 }
 0xf80   : > { %v6462_v39 = vadd.f32 %v7881_v28, %v7125_v43  ;;  %v6453_v62 = vpop.f32.mrb[1].mxu0 }
 0xf81   : > { %v6454_v57 = vadd.f32 %v7125_v43, %v6453_v62  ;;  %v7882_v0 = vpop.f32.mrb[2].mxu0 }
 0xf82   : > { %v6465_v30 = vadd.f32 %v7882_v0, %v7125_v43  ;;  %v6456_v20 = vpop.f32.mrb[3].mxu0  ;;  %v6518_v37 = vmax.f32 %v6462_v39, 0.0 }
 0xf83   : > { %v6457_v27 = vadd.f32 %v7125_v43, %v6456_v20  ;;  %v6516_v53 = vmax.f32 %v6454_v57, 0.0 }
 0xf84   : > { %v6519_v12 = vmax.f32 %v6465_v30, 0.0 }
 0xf85   : > { %v6517_v6 = vmax.f32 %v6457_v27, 0.0 }
 0xf86   : > { %v6533_v38 = vpack.c.bf16 %v6519_v12, %v6518_v37 }
 0xf87   : > { %v7885_v11 = vpop.f32.mrb[4].mxu0  ;;  %v6532_v21 = vpack.c.bf16 %v6517_v6, %v6516_v53 }
 0xf88   : > { %v6478_v8 = vadd.f32 %v7885_v11, %v7125_v43  ;;  %v6469_v31 = vpop.f32.mrb[5].mxu0 }
 0xf89   : > { %v6470_v35 = vadd.f32 %v7125_v43, %v6469_v31  ;;  %v7886_v19 = vpop.f32.mrb[6].mxu0  ;;  %7899 = vmatprep.mubr.msk.bf16.mxu1 %vm989_vm2, %v6532_v21 }
 0xf8a   : > { %v6481_v9 = vadd.f32 %v7886_v19, %v7125_v43  ;;  %v6472_v29 = vpop.f32.mrb[7].mxu0  ;;  %7900 = vmatmul.mubr.msk.bf16.vlgmr.msra.gmra.mrb[0].mxu1 %vm989_vm2, %v6533_v38  ;;  %v6522_v23 = vmax.f32 %v6478_v8, 0.0 }
 0xf8b   : > { %v6473_v34 = vadd.f32 %v7125_v43, %v6472_v29  ;;  %v6520_v44 = vmax.f32 %v6470_v35, 0.0 }
 0xf8c   : > { %v6523_v58 = vmax.f32 %v6481_v9, 0.0 }
 0xf8d   : > { %v6521_v18 = vmax.f32 %v6473_v34, 0.0 }
 0xf8e   : > { %v6535_v36 = vpack.c.bf16 %v6523_v58, %v6522_v23 }
 0xf8f   : > { %v6534_v49 = vpack.c.bf16 %v6521_v18, %v6520_v44  ;;  %v7889_v47 = vpop.f32.mrb[8].mxu0 }
 0xf90   : > { %v6494_v32 = vadd.f32 %v7889_v47, %v7125_v43  ;;  %v6485_v24 = vpop.f32.mrb[9].mxu0 }
 0xf91   : > { %v6486_v2 = vadd.f32 %v7125_v43, %v6485_v24  ;;  %v7890_v33 = vpop.f32.mrb[10].mxu0  ;;  %7903 = vmatprep.mubr.msk.bf16.mxu1 %vm989_vm2, %v6534_v49  ;;  %v6684_v49 = vld [vmem:[%s10069_s18] sm:$0xff]  ;;  %v6686_v24 = vld [vmem:[%s10069_s18 + $0x10] sm:$0xff] }
 0xf92   : > { %v6497_v55 = vadd.f32 %v7890_v33, %v7125_v43  ;;  %v6488_v25 = vpop.f32.mrb[11].mxu0  ;;  %7904 = vmatmul.mubr.msk.bf16.gmra.mrb[4].mxu1 %vm989_vm2, %v6535_v36  ;;  %v6526_v16 = vmax.f32 %v6494_v32, 0.0 }
 0xf93   : > { %v6489_v40 = vadd.f32 %v7125_v43, %v6488_v25  ;;  %v6524_v1 = vmax.f32 %v6486_v2, 0.0  ;;  %v6685_v2 = vld [vmem:[%s10069_s18 + $0x8] sm:$0xff] }
 0xf94   : > { %v6527_v52 = vmax.f32 %v6497_v55, 0.0 }
 0xf95   : > { %v6525_v22 = vmax.f32 %v6489_v40, 0.0 }
 0xf96   : > { %v6537_v14 = vpack.c.bf16 %v6527_v52, %v6526_v16  ;;  %v6687_v16 = vld [vmem:[%s10069_s18 + $0x18] sm:$0xff] }
 0xf97   : > { %v6536_v42 = vpack.c.bf16 %v6525_v22, %v6524_v1  ;;  %v7893_v63 = vpop.f32.mrb[12].mxu0 }
 0xf98   : > { %v6510_v3 = vadd.f32 %v7893_v63, %v7125_v43  ;;  %v6501_v41 = vpop.f32.mrb[13].mxu0 }
 0xf99   : > { %v6502_v15 = vadd.f32 %v7125_v43, %v6501_v41  ;;  %7907 = vmatprep.mubr.msk.bf16.mxu1 %vm989_vm2, %v6536_v42  ;;  %v7894_v48 = vpop.f32.mrb[14].mxu0 }
 0xf9a   : > { %v6530_v61 = vmax.f32 %v6510_v3, 0.0  ;;  %v6513_v51 = vadd.f32 %v7894_v48, %v7125_v43  ;;  %7908 = vmatmul.mubr.msk.bf16.gmra.mrb[8].mxu1 %vm989_vm2, %v6537_v14  ;;  %v6504_v60 = vpop.f32.mrb[15].mxu0  ;;  %v6690_v48 = vld [vmem:[%s10069_s18 + $0x30] sm:$0xff] }
 0xf9b   : > { %v6528_v50 = vmax.f32 %v6502_v15, 0.0  ;;  %v6505_v13 = vadd.f32 %v7125_v43, %v6504_v60  ;;  %v6688_v15 = vld [vmem:[%s10069_s18 + $0x20] sm:$0xff] }
 0xf9c   : > { %v6531_v56 = vmax.f32 %v6513_v51, 0.0 }
 0xf9d   : > { %v6529_v4 = vmax.f32 %v6505_v13, 0.0 }
 0xf9e   : > { %v6539_v5 = vpack.c.bf16 %v6531_v56, %v6530_v61 }
 0xf9f   : > { %v6538_v7 = vpack.c.bf16 %v6529_v4, %v6528_v50  ;;  %v6692_v4 = vld [vmem:[%s10069_s18 + $0x40] sm:$0xff] }
 0xfa1   : > { %7911 = vmatprep.mubr.msk.bf16.mxu1 %vm989_vm2, %v6538_v7 }
 0xfa2   : > { %7912 = vmatmul.mubr.msk.bf16.gmra.mrb[12].mxu1 %vm989_vm2, %v6539_v5  ;;  %v6689_v5 = vld [vmem:[%s10069_s18 + $0x28] sm:$0xff] }
0x105d   : > { %v7901_v54 = vpop.f32.mrb[0].mxu1 }
0x105e   : > { %v6630_v46 = vadd.f32 %v7901_v54, %v7136_v17  ;;  %v6621_v45 = vpop.f32.mrb[1].mxu1 }
0x105f   : > { %v7902_v26 = vpop.f32.mrb[2].mxu1  ;;  %v6622_v59 = vadd.f32 %v7136_v17, %v6621_v45 }
0x1060   : > { %6720 = vrot.lane.b32.xlu0 %v6630_v46, %s8255_s25  ;;  %v6624_v10 = vpop.f32.mrb[3].mxu1  ;;  %v6633_v28 = vadd.f32 %v7902_v26, %v7136_v17  ;;  %v6694_v26 = vld [vmem:[%s10069_s18 + $0x50] sm:$0xff] }
0x1061   : > { %v6625_v0 = vadd.f32 %v7136_v17, %v6624_v10 }
0x1064   : > { %6716 = vrot.lane.b32.xlu0 %v6622_v59, %s8255_s25 }
0x1065   : > { %v7905_v43 = vpop.f32.mrb[4].mxu1 }
0x1066   : > { %v6637_v39 = vpop.f32.mrb[5].mxu1  ;;  %v6646_v20 = vadd.f32 %v7905_v43, %v7136_v17 }
0x1067   : > { %v7906_v62 = vpop.f32.mrb[6].mxu1  ;;  %v6638_v6 = vadd.f32 %v7136_v17, %v6637_v39  ;;  %v6693_v39 = vld [vmem:[%s10069_s18 + $0x48] sm:$0xff] }
0x1068   : > { %v6640_v57 = vpop.f32.mrb[7].mxu1  ;;  %6722 = vrot.lane.b32.xlu0 %v6633_v28, %s8255_s25  ;;  %v6649_v9 = vadd.f32 %v7906_v62, %v7136_v17  ;;  %v6691_v62 = vld [vmem:[%s10069_s18 + $0x38] sm:$0xff] }
0x1069   : > { %v6641_v21 = vadd.f32 %v7136_v17, %v6640_v57 }
0x106c   : > { %6718 = vrot.lane.b32.xlu0 %v6625_v0, %s8255_s25 }
0x106d   : > { %v7909_v30 = vpop.f32.mrb[8].mxu1 }
0x106e   : > { %v6662_v27 = vadd.f32 %v7909_v30, %v7136_v17  ;;  %v6653_v37 = vpop.f32.mrb[9].mxu1 }
0x106f   : > { %v7910_v12 = vpop.f32.mrb[10].mxu1  ;;  %v6654_v38 = vadd.f32 %v7136_v17, %v6653_v37 }
0x1070   : > { %6736 = vrot.lane.b32.xlu1 %v6662_v27, %s8255_s25  ;;  %v6656_v53 = vpop.f32.mrb[11].mxu1  ;;  %6728 = vrot.lane.b32.xlu0 %v6646_v20, %s8255_s25  ;;  %v6665_v8 = vadd.f32 %v7910_v12, %v7136_v17 }
0x1071   : > { %v6657_v29 = vadd.f32 %v7136_v17, %v6656_v53 }
0x1074   : > { %6732 = vrot.lane.b32.xlu1 %v6654_v38, %s8255_s25  ;;  %6724 = vrot.lane.b32.xlu0 %v6638_v6, %s8255_s25 }
0x1075   : > { %v7913_v11 = vpop.f32.mrb[12].mxu1 }
0x1076   : > { %v6669_v31 = vpop.f32.mrb[13].mxu1  ;;  %v6678_v34 = vadd.f32 %v7913_v11, %v7136_v17  ;;  %v6695_v11 = vld [vmem:[%s10069_s18 + $0x58] sm:$0xff] }
0x1077   : > { %v7914_v35 = vpop.f32.mrb[14].mxu1  ;;  %v6670_v23 = vadd.f32 %v7136_v17, %v6669_v31 }
0x1078   : > { %6738 = vrot.lane.b32.xlu1 %v6665_v8, %s8255_s25  ;;  %6726 = vrot.lane.b32.xlu0 %v6641_v21, %s8255_s25  ;;  %v6672_v19 = vpop.f32.mrb[15].mxu1  ;;  %v6681_v44 = vadd.f32 %v7914_v35, %v7136_v17 }
0x1079   : > { %v6673_v58 = vadd.f32 %v7136_v17, %v6672_v19 }
0x107c   : > { %6734 = vrot.lane.b32.xlu1 %v6657_v29, %s8255_s25  ;;  %6730 = vrot.lane.b32.xlu0 %v6649_v9, %s8255_s25 }
0x1080   : > { %6744 = vrot.lane.b32.xlu1 %v6678_v34, %s8255_s25 }
0x1084   : > { %6740 = vrot.lane.b32.xlu1 %v6670_v23, %s8255_s25 }
0x1088   : > { %6742 = vrot.lane.b32.xlu1 %v6673_v58, %s8255_s25 }
0x108c   : > { %6746 = vrot.lane.b32.xlu1 %v6681_v44, %s8255_s25  ;;  %s8256_s25 = smov 127  }
0x10d2   : > { %v6721_v18 = vpop.permute.xlu0 %6720 }
0x10d3   : > { %v6766_v55 = vsub.f32 %v6686_v24, %v6721_v18 }
0x10d5   : > { %v6782_v14 = vmul.f32 %v6766_v55, %v6766_v55 }
0x10d6   : > { %v6717_v36 = vpop.permute.xlu0 %6716 }
0x10d7   : > { %v6764_v32 = vsub.f32 %v6684_v49, %v6717_v36  ;;  %v6800_v60 = vsel %vm6796_vm7, %v6782_v14, 0.0  ;;  %v6696_v49 = vld [vmem:[%s10069_s18 + $0x60] sm:$0xff] }
0x10d9   : > { %v6780_v25 = vmul.f32 %v6764_v32, %v6764_v32  ;;  %v6698_v32 = vld [vmem:[%s10069_s18 + $0x70] sm:$0xff] }
0x10da   : > { %v6723_v47 = vpop.permute.xlu0 %6722 }
0x10db   : > { %v6797_v42 = vsel %vm6796_vm7, %v6780_v25, 0.0  ;;  %v6767_v63 = vsub.f32 %v6687_v16, %v6723_v47  ;;  %v6697_v16 = vld [vmem:[%s10069_s18 + $0x68] sm:$0xff] }
0x10dd   : > { %v6783_v50 = vmul.f32 %v6767_v63, %v6767_v63 }
0x10de   : > { %v6719_v33 = vpop.permute.xlu0 %6718 }
0x10df   : > { %v6765_v40 = vsub.f32 %v6685_v2, %v6719_v33  ;;  %v6802_v45 = vsel %vm6796_vm7, %v6783_v50, 0.0 }
0x10e1   : > { %v6781_v52 = vmul.f32 %v6765_v40, %v6765_v40 }
0x10e2   : > { %v6737_v1 = vpop.permute.xlu1 %6736  ;;  %v6729_v22 = vpop.permute.xlu0 %6728 }
0x10e3   : > { %v6798_v3 = vsel %vm6796_vm7, %v6781_v52, 0.0  ;;  %v6770_v7 = vsub.f32 %v6690_v48, %v6729_v22  ;;  %v6774_v30 = vsub.f32 %v6694_v26, %v6737_v1 }
0x10e4   : > { %v6799_v41 = vadd.f32 %v6798_v3, %v6797_v42 }
0x10e5   : > { %v6786_v57 = vmul.f32 %v6770_v7, %v6770_v7  ;;  %v6790_v19 = vmul.f32 %v6774_v30, %v6774_v30 }
0x10e6   : > { %v6733_v61 = vpop.permute.xlu1 %6732  ;;  %v6725_v51 = vpop.permute.xlu0 %6724  ;;  %v6801_v56 = vadd.f32 %v6800_v60, %v6799_v41 }
0x10e7   : > { %v6768_v13 = vsub.f32 %v6688_v15, %v6725_v51  ;;  %v6772_v10 = vsub.f32 %v6692_v4, %v6733_v61  ;;  %v6808_v8 = vsel %vm6796_vm7, %v6786_v57, 0.0  ;;  %v6821_v2 = vsel %vm6796_vm7, %v6790_v19, 0.0  ;;  %v6699_v15 = vld [vmem:[%s10069_s18 + $0x78] sm:$0xff] }
0x10e8   : > { %v6803_v28 = vadd.f32 %v6802_v45, %v6801_v56 }
0x10e9   : > { %v6784_v17 = vmul.f32 %v6768_v13, %v6768_v13  ;;  %v6788_v12 = vmul.f32 %v6772_v10, %v6772_v10 }
0x10ea   : > { %v6739_v54 = vpop.permute.xlu1 %6738  ;;  %v6727_v46 = vpop.permute.xlu0 %6726 }
0x10eb   : > { %v6804_v59 = vsel %vm6796_vm7, %v6784_v17, 0.0  ;;  %v6769_v43 = vsub.f32 %v6689_v5, %v6727_v46  ;;  %v6818_v34 = vsel %vm6796_vm7, %v6788_v12, 0.0  ;;  %v6775_v23 = vsub.f32 %v6695_v11, %v6739_v54 }
0x10ec   : > { %v6805_v20 = vadd.f32 %v6804_v59, %v6803_v28 }
0x10ed   : > { %v6785_v0 = vmul.f32 %v6769_v43, %v6769_v43  ;;  %v6791_v33 = vmul.f32 %v6775_v23, %v6775_v23 }
0x10ee   : > { %v6735_v27 = vpop.permute.xlu1 %6734  ;;  %v6731_v37 = vpop.permute.xlu0 %6730 }
0x10ef   : > { %v6806_v53 = vsel %vm6796_vm7, %v6785_v0, 0.0  ;;  %v6773_v6 = vsub.f32 %v6693_v39, %v6735_v27  ;;  %v6771_v38 = vsub.f32 %v6691_v62, %v6731_v37  ;;  %v6823_v42 = vsel %vm6796_vm7, %v6791_v33, 0.0 }
0x10f0   : > { %v6807_v21 = vadd.f32 %v6806_v53, %v6805_v20 }
0x10f1   : > { %v6789_v31 = vmul.f32 %v6773_v6, %v6773_v6  ;;  %v6787_v35 = vmul.f32 %v6771_v38, %v6771_v38 }
0x10f2   : > { %v6809_v9 = vadd.f32 %v6808_v8, %v6807_v21  ;;  %v6745_v29 = vpop.permute.xlu1 %6744 }
0x10f3   : > { %v6819_v58 = vsel %vm6796_vm7, %v6789_v31, 0.0  ;;  %v6810_v44 = vsel %vm6796_vm7, %v6787_v35, 0.0  ;;  %v6778_v52 = vsub.f32 %v6698_v32, %v6745_v29 }
0x10f4   : > { %v6820_v18 = vadd.f32 %v6819_v58, %v6818_v34  ;;  %v6811_v36 = vadd.f32 %v6810_v44, %v6809_v9 }
0x10f5   : > { %v6794_v61 = vmul.f32 %v6778_v52, %v6778_v52 }
0x10f6   : > { %v6812_v47 = vrot.slane %v6811_v36, 4  ;;  %v6741_v24 = vpop.permute.xlu1 %6740  ;;  %v6822_v25 = vadd.f32 %v6821_v2, %v6820_v18 }
0x10f7   : > { %v6776_v55 = vsub.f32 %v6696_v49, %v6741_v24  ;;  %v6829_v17 = vsel %vm6796_vm7, %v6794_v61, 0.0 }
0x10f8   : > { %v6813_v40 = vadd.f32 %v6812_v47, %v6811_v36  ;;  %v6824_v41 = vadd.f32 %v6823_v42, %v6822_v25 }
0x10f9   : > { %v6792_v1 = vmul.f32 %v6776_v55, %v6776_v55 }
0x10fa   : > { %v6743_v22 = vpop.permute.xlu1 %6742  ;;  %v6814_v14 = vrot.slane %v6813_v40, 2 }
0x10fb   : > { %v6825_v63 = vsel %vm6796_vm7, %v6792_v1, 0.0  ;;  %v6777_v3 = vsub.f32 %v6697_v16, %v6743_v22 }
0x10fc   : > { %v6815_v48 = vadd.f32 %v6814_v14, %v6813_v40  ;;  %v6826_v60 = vadd.f32 %v6825_v63, %v6824_v41 }
0x10fd   : > { %v6793_v51 = vmul.f32 %v6777_v3, %v6777_v3 }
0x10fe   : > { %v6747_v50 = vpop.permute.xlu1 %6746  ;;  %v6816_v13 = vrot.slane %v6815_v48, 1 }
0x10ff   : > { %v6827_v56 = vsel %vm6796_vm7, %v6793_v51, 0.0  ;;  %v6779_v4 = vsub.f32 %v6699_v15, %v6747_v50 }
0x1100   : > { %v6828_v5 = vadd.f32 %v6827_v56, %v6826_v60  ;;  %v6817_v7 = vadd.f32 %v6816_v13, %v6815_v48 }
0x1101   : > { %v6795_v54 = vmul.f32 %v6779_v4, %v6779_v4 }
0x1102   : > { %v6830_v46 = vadd.f32 %v6829_v17, %v6828_v5  ;;  %6841 = vrot.lane.b32.xlu0 %v6817_v7, %s8256_s25 }
0x1103   : > { %v6831_v45 = vsel %vm6796_vm7, %v6795_v54, 0.0 }
0x1104   : > { %v6832_v26 = vadd.f32 %v6831_v45, %v6830_v46 }
0x1106   : > { %v6833_v10 = vrot.slane %v6832_v26, 4 }
0x1108   : > { %v6834_v59 = vadd.f32 %v6833_v10, %v6832_v26 }
0x110a   : > { %v6835_v43 = vrot.slane %v6834_v59, 2 }
0x110c   : > { %v6836_v28 = vadd.f32 %v6835_v43, %v6834_v59 }
0x110e   : > { %v6837_v39 = vrot.slane %v6836_v28, 1 }
0x1110   : > { %v6838_v62 = vadd.f32 %v6837_v39, %v6836_v28 }
0x1112   : > { %6843 = vrot.lane.b32.xlu1 %v6838_v62, %s8256_s25 }
0x1174   : > { %v6842_v57 = vpop.permute.xlu0 %6841 }
0x1175   : > { %6848 = vst.msk [vmem:[%s10061_s17] sm:$0x1] %vm6847_vm8, %v6842_v57 }
0x1184   : > { %v6844_v0 = vpop.permute.xlu1 %6843 }
0x1185   : > { %6849 = vst.msk [vmem:[%s10061_s17 + $0x1] sm:$0x1] %vm6847_vm8, %v6844_v0 }
0x1186 PF: > { %s29_s28 = sadd.s32 1, %s8244_s28   ;;  %s10070_s26 = smov %s8240_s27 }
0x1187   : > { %p26_p6 = scmp.ge.s32.totalorder %s29_s28, 4   ;;  %s10071_s27 = smov %s10073_s16 }
0x1189   :  { %28 = sbr.rel (!%p26_p6) target bundleno = 3 (0x3), region = 141 }

</bundles_post_ra>
